<compile_context>
chip_gen: v7x
topology: tpu7x:2x2x1
jax: 0.10.0
libtpu: 0.0.40
codegen_flags: <defaults>
</compile_context>

<pallas_src>
import functools

import jax
import jax.numpy as jnp
from jax.experimental import pallas as pl
from jax.experimental.pallas import tpu as pltpu

Z_DIM = 50
Z_PAD = 128           # pad K of first matmul to a full lane width
H_DIM = 1024
IMG_DIM = 28 * 28     # 784 (full array dim -> legal non-128-multiple block)
BN_EPS = 1e-5

_COMPILER_PARAMS = pltpu.CompilerParams(
    dimension_semantics=("parallel",),
    vmem_limit_bytes=32 << 20,
)


def _round_up(x, m):
    return ((x + m - 1) // m) * m


def _tile_cfg(n):
    """Pick a batch tile size and padded batch length.

    - tiny batches: one tile (latency-bound, no point splitting)
    - mid batches: 2 tiles so both v7x TensorCores get work on the only
      "parallel" axis
    - large batches: fixed 512-row tiles (fewer grid steps, VMEM still
      comfortably under the 32 MiB scoped limit on every generation)
    """
    n8 = _round_up(max(n, 1), 8)
    if n8 <= 64:
        tm = n8
    elif n8 <= 1024:
        tm = _round_up((n8 + 1) // 2, 8)
    else:
        tm = 512
    n_pad = _round_up(n8, tm)
    return tm, n_pad


# ---------------------------------------------------------------------------
# Stage 1: z -> Linear -> ReLU -> Linear  (= h2, stored bf16), plus masked
#          per-tile sum / sum-of-squares of h2 (f32) for full-batch BN stats.
# ---------------------------------------------------------------------------
def _stage1_kernel(z_ref, w1_ref, b1_ref, w2_ref, b2_ref,
                   h2_ref, psum_ref, psq_ref, *, tm, n_actual, need_mask):
    z = z_ref[...]                                                    # [TM, 128] bf16

    h1 = jnp.dot(z, w1_ref[...], preferred_element_type=jnp.float32) + b1_ref[...]
    h1 = jnp.maximum(h1, 0.0).astype(jnp.bfloat16)                    # [TM, 1024]

    h2 = jnp.dot(h1, w2_ref[...], preferred_element_type=jnp.float32) + b2_ref[...]
    h2_ref[...] = h2.astype(jnp.bfloat16)                             # bf16 spill

    # Masked partial statistics in f32 (padded batch rows must not contribute).
    if need_mask:
        rows = pl.program_id(0) * tm + jax.lax.broadcasted_iota(
            jnp.int32, (tm, 1), 0)
        h2 = jnp.where(rows < n_actual, h2, 0.0)
    psum_ref[...] = jnp.sum(h2, axis=0, keepdims=True)[None]          # [1, 1, 1024]
    psq_ref[...] = jnp.sum(h2 * h2, axis=0, keepdims=True)[None]      # [1, 1, 1024]


# ---------------------------------------------------------------------------
# Stage 2: in-kernel BN reduction/fold -> affine + ReLU -> Linear -> Tanh
# ---------------------------------------------------------------------------
def _stage2_kernel(h2_ref, psum_ref, psq_ref, gamma_ref, beta_ref,
                   w3_ref, b3_ref, out_ref, *, inv_n):
    # Full-batch BN statistics: reduce the tiny per-tile partials in VMEM.
    s1 = jnp.sum(psum_ref[...], axis=0)                               # [1, 1024]
    s2 = jnp.sum(psq_ref[...], axis=0)                                # [1, 1024]
    mean = s1 * inv_n
    var = jnp.maximum(s2 * inv_n - mean * mean, 0.0)                  # biased batch var
    scale = gamma_ref[...] * jax.lax.rsqrt(var + BN_EPS)
    shift = beta_ref[...] - mean * scale

    h2 = h2_ref[...].astype(jnp.float32)                              # [TM, 1024]
    h3 = jnp.maximum(h2 * scale + shift, 0.0).astype(jnp.bfloat16)    # BN + ReLU
    out = jnp.dot(h3, w3_ref[...], preferred_element_type=jnp.float32) + b3_ref[...]
    out_ref[...] = jnp.tanh(out)                                      # [TM, 784] f32


# ---------------------------------------------------------------------------
# Parameters
# ---------------------------------------------------------------------------
def make_params(key):
    """Deterministic init matching the PyTorch module shapes (f32, unpadded)."""
    ks = jax.random.split(key, 6)

    def linear(kw, kb, fan_in, fan_out):
        bound = 1.0 / jnp.sqrt(fan_in)
        w = jax.random.uniform(kw, (fan_in, fan_out), jnp.float32, -bound, bound)
        b = jax.random.uniform(kb, (1, fan_out), jnp.float32, -bound, bound)
        return w, b

    w1, b1 = linear(ks[0], ks[1], Z_DIM, H_DIM)
    w2, b2 = linear(ks[2], ks[3], H_DIM, H_DIM)
    w3, b3 = linear(ks[4], ks[5], H_DIM, IMG_DIM)
    gamma = jnp.ones((1, H_DIM), jnp.float32)   # BatchNorm1d weight
    beta = jnp.zeros((1, H_DIM), jnp.float32)   # BatchNorm1d bias
    return (w1, b1, w2, b2, gamma, beta, w3, b3)


def prepare_params(params):
    """Pad + cast parameters into the kernel-ready layout (bf16 weights)."""
    w1, b1, w2, b2, gamma, beta, w3, b3 = params
    w1p = (jnp.zeros((Z_PAD, H_DIM), jnp.float32)
           .at[:Z_DIM].set(w1).astype(jnp.bfloat16))
    return (w1p, b1, w2.astype(jnp.bfloat16), b2, gamma, beta,
            w3.astype(jnp.bfloat16), b3)


# ---------------------------------------------------------------------------
# Forward
# ---------------------------------------------------------------------------
def _g_mlp(z_f32, prepared):
    w1, b1, w2, b2, gamma, beta, w3, b3 = prepared
    n = z_f32.shape[0]
    # TODO(synk): PyTorch BatchNorm1d raises on n == 1 in training mode; this
    # implementation silently normalizes instead.
    tm, n_pad = _tile_cfg(n)
    num_tiles = pl.cdiv(n_pad, tm)

    # Pad z to [n_pad, Z_PAD] and cast to bf16 (MXU input format).
    z = jnp.pad(z_f32.astype(jnp.bfloat16),
                ((0, n_pad - n), (0, Z_PAD - Z_DIM)))

    const2d = lambda i: (0, 0)
    const3d = lambda i: (0, 0, 0)

    # ----- Stage 1: two matmuls + partial BN statistics ---------------------
    h2, psum, psq = pl.pallas_call(
        functools.partial(_stage1_kernel, tm=tm, n_actual=n,
                          need_mask=(n != n_pad)),
        grid=(num_tiles,),
        in_specs=[
            pl.BlockSpec((tm, Z_PAD), lambda i: (i, 0)),       # z tile
            pl.BlockSpec((Z_PAD, H_DIM), const2d),             # w1 (resident)
            pl.BlockSpec((1, H_DIM), const2d),                 # b1
            pl.BlockSpec((H_DIM, H_DIM), const2d),             # w2 (resident)
            pl.BlockSpec((1, H_DIM), const2d),                 # b2
        ],
        out_specs=[
            pl.BlockSpec((tm, H_DIM), lambda i: (i, 0)),       # h2 tile (bf16)
            pl.BlockSpec((1, 1, H_DIM), lambda i: (i, 0, 0)),  # per-tile sum
            pl.BlockSpec((1, 1, H_DIM), lambda i: (i, 0, 0)),  # per-tile sumsq
        ],
        out_shape=(
            jax.ShapeDtypeStruct((n_pad, H_DIM), jnp.bfloat16),
            jax.ShapeDtypeStruct((num_tiles, 1, H_DIM), jnp.float32),
            jax.ShapeDtypeStruct((num_tiles, 1, H_DIM), jnp.float32),
        ),
        compiler_params=_COMPILER_PARAMS,
    )(z, w1, b1, w2, b2)

    # ----- Stage 2: in-kernel BN fold + ReLU + third matmul + tanh ----------
    # TODO(synk): running_mean/running_var updates (unbiased var) not reproduced.
    out = pl.pallas_call(
        functools.partial(_stage2_kernel, inv_n=1.0 / n),
        grid=(num_tiles,),
        in_specs=[
            pl.BlockSpec((tm, H_DIM), lambda i: (i, 0)),            # h2 tile
            pl.BlockSpec((num_tiles, 1, H_DIM), const3d),           # psum (all tiles)
            pl.BlockSpec((num_tiles, 1, H_DIM), const3d),           # psq  (all tiles)
            pl.BlockSpec((1, H_DIM), const2d),                      # gamma
            pl.BlockSpec((1, H_DIM), const2d),                      # beta
            pl.BlockSpec((H_DIM, IMG_DIM), const2d),                # w3 (resident)
            pl.BlockSpec((1, IMG_DIM), const2d),                    # b3
        ],
        out_specs=pl.BlockSpec((tm, IMG_DIM), lambda i: (i, 0)),
        out_shape=jax.ShapeDtypeStruct((n_pad, IMG_DIM), jnp.float32),
        compiler_params=_COMPILER_PARAMS,
    )(h2, psum, psq, gamma, beta, w3, b3)

    return out if n == n_pad else out[:n]


def g_forward(n, key, prepared_params):
    """Equivalent of G.forward(n): returns (samples, g_samples)."""
    z = jax.random.normal(key, (n, Z_DIM), dtype=jnp.float32)  # samples
    g_samples = _g_mlp(z, prepared_params)
    return z, g_samples


if __name__ == "__main__":
    key = jax.random.PRNGKey(0)
    pkey, zkey = jax.random.split(key)
    params = prepare_params(make_params(pkey))

    n = 8  # small batch
    samples, g_samples = g_forward(n, zkey, params)
    jax.block_until_ready((samples, g_samples))

    assert samples.shape == (n, Z_DIM)
    assert g_samples.shape == (n, IMG_DIM)
    assert bool(jnp.all(jnp.isfinite(g_samples)))
    assert bool(jnp.all(jnp.abs(g_samples) <= 1.0))  # tanh range

    print("KERNEL_OK")
</pallas_src>

<mosaic_0001>
module attributes {stable_mosaic.version = 11 : i64} {
  func.func @_stage1_kernel(%arg0: i32, %arg1: memref<8x128xbf16, #tpu.memory_space<vmem>>, %arg2: memref<128x1024xbf16, #tpu.memory_space<vmem>>, %arg3: memref<1x1024xf32, #tpu.memory_space<vmem>>, %arg4: memref<1024x1024xbf16, #tpu.memory_space<vmem>>, %arg5: memref<1x1024xf32, #tpu.memory_space<vmem>>, %arg6: memref<8x1024xbf16, #tpu.memory_space<vmem>>, %arg7: memref<1x1x1024xf32, #tpu.memory_space<vmem>>, %arg8: memref<1x1x1024xf32, #tpu.memory_space<vmem>>) attributes {dimension_semantics = [#tpu.dimension_semantics<parallel>], iteration_bounds = array<i64: 1>, scalar_prefetch = 0 : i64, scratch_operands = 0 : i64, tpu.core_type = #tpu.core_type<tc>, window_params = [{transform_indices = @transform_0, window_bounds = array<i64: 8, 128>}, {pipeline_mode = #tpu.pipeline_mode<synchronous>, transform_indices = @transform_1, window_bounds = array<i64: 128, 1024>}, {pipeline_mode = #tpu.pipeline_mode<synchronous>, transform_indices = @transform_2, window_bounds = array<i64: 1, 1024>}, {pipeline_mode = #tpu.pipeline_mode<synchronous>, transform_indices = @transform_3, window_bounds = array<i64: 1024, 1024>}, {pipeline_mode = #tpu.pipeline_mode<synchronous>, transform_indices = @transform_4, window_bounds = array<i64: 1, 1024>}, {transform_indices = @transform_5, window_bounds = array<i64: 8, 1024>}, {transform_indices = @transform_6, window_bounds = array<i64: 1, 1, 1024>}, {transform_indices = @transform_7, window_bounds = array<i64: 1, 1, 1024>}]} {
    %c0 = arith.constant 0 : index
    %c0_0 = arith.constant 0 : index
    %0 = vector.load %arg1[%c0, %c0_0] : memref<8x128xbf16, #tpu.memory_space<vmem>>, vector<8x128xbf16>
    %c0_1 = arith.constant 0 : index
    %c0_2 = arith.constant 0 : index
    %1 = vector.load %arg2[%c0_1, %c0_2] : memref<128x1024xbf16, #tpu.memory_space<vmem>>, vector<128x1024xbf16>
    %cst = arith.constant dense<0.000000e+00> : vector<8x1024xf32>
    %2 = tpu.matmul %0, %1, %cst {dimension_numbers = #tpu.dot_dimension_numbers<[1], [0], [0], [1], [0, 0, 1, 1], [], []>} : vector<8x128xbf16>, vector<128x1024xbf16>, vector<8x1024xf32> -> vector<8x1024xf32>
    %c0_3 = arith.constant 0 : index
    %c0_4 = arith.constant 0 : index
    %3 = vector.load %arg3[%c0_3, %c0_4] : memref<1x1024xf32, #tpu.memory_space<vmem>>, vector<1x1024xf32>
    %4 = vector.broadcast %3 : vector<1x1024xf32> to vector<8x1024xf32>
    %5 = arith.addf %2, %4 : vector<8x1024xf32>
    %cst_5 = arith.constant 0.000000e+00 : f32
    %6 = vector.broadcast %cst_5 : f32 to vector<8x1024xf32>
    %7 = arith.maximumf %5, %6 : vector<8x1024xf32>
    %8 = arith.truncf %7 : vector<8x1024xf32> to vector<8x1024xbf16>
    %c0_6 = arith.constant 0 : index
    %c0_7 = arith.constant 0 : index
    %9 = vector.load %arg4[%c0_6, %c0_7] : memref<1024x1024xbf16, #tpu.memory_space<vmem>>, vector<1024x1024xbf16>
    %cst_8 = arith.constant dense<0.000000e+00> : vector<8x1024xf32>
    %10 = tpu.matmul %8, %9, %cst_8 {dimension_numbers = #tpu.dot_dimension_numbers<[1], [0], [0], [1], [0, 0, 1, 1], [], []>} : vector<8x1024xbf16>, vector<1024x1024xbf16>, vector<8x1024xf32> -> vector<8x1024xf32>
    %c0_9 = arith.constant 0 : index
    %c0_10 = arith.constant 0 : index
    %11 = vector.load %arg5[%c0_9, %c0_10] : memref<1x1024xf32, #tpu.memory_space<vmem>>, vector<1x1024xf32>
    %12 = vector.broadcast %11 : vector<1x1024xf32> to vector<8x1024xf32>
    %13 = arith.addf %10, %12 : vector<8x1024xf32>
    %14 = arith.truncf %13 : vector<8x1024xf32> to vector<8x1024xbf16>
    %c0_11 = arith.constant 0 : index
    %c0_12 = arith.constant 0 : index
    %15 = vector.load %arg6[%c0_11, %c0_12] : memref<8x1024xbf16, #tpu.memory_space<vmem>>, vector<8x1024xbf16>
    tpu.vector_store %arg6[%c0_11, %c0_12], %14 {strides = array<i32>} : memref<8x1024xbf16, #tpu.memory_space<vmem>>, vector<8x1024xbf16>,
    %cst_13 = arith.constant dense<0.000000e+00> : vector<1024xf32>
    %16 = vector.multi_reduction <add>, %13, %cst_13 [0] : vector<8x1024xf32> to vector<1024xf32>
    %17 = vector.shape_cast %16 : vector<1024xf32> to vector<1x1024xf32>
    %18 = vector.shape_cast %17 : vector<1x1024xf32> to vector<1x1x1024xf32>
    %c0_14 = arith.constant 0 : index
    %c0_15 = arith.constant 0 : index
    %c0_16 = arith.constant 0 : index
    %19 = vector.load %arg7[%c0_14, %c0_15, %c0_16] : memref<1x1x1024xf32, #tpu.memory_space<vmem>>, vector<1x1x1024xf32>
    tpu.vector_store %arg7[%c0_14, %c0_15, %c0_16], %18 {strides = array<i32>} : memref<1x1x1024xf32, #tpu.memory_space<vmem>>, vector<1x1x1024xf32>,
    %20 = arith.mulf %13, %13 : vector<8x1024xf32>
    %cst_17 = arith.constant dense<0.000000e+00> : vector<1024xf32>
    %21 = vector.multi_reduction <add>, %20, %cst_17 [0] : vector<8x1024xf32> to vector<1024xf32>
    %22 = vector.shape_cast %21 : vector<1024xf32> to vector<1x1024xf32>
    %23 = vector.shape_cast %22 : vector<1x1024xf32> to vector<1x1x1024xf32>
    %c0_18 = arith.constant 0 : index
    %c0_19 = arith.constant 0 : index
    %c0_20 = arith.constant 0 : index
    %24 = vector.load %arg8[%c0_18, %c0_19, %c0_20] : memref<1x1x1024xf32, #tpu.memory_space<vmem>>, vector<1x1x1024xf32>
    tpu.vector_store %arg8[%c0_18, %c0_19, %c0_20], %23 {strides = array<i32>} : memref<1x1x1024xf32, #tpu.memory_space<vmem>>, vector<1x1x1024xf32>,
    return
  }
  func.func @transform_0(%arg0: i32) -> (i32, i32) {
    %c0_i32 = arith.constant 0 : i32
    %c0_i32_0 = arith.constant 0 : i32
    return %arg0, %c0_i32 : i32, i32
  }
  func.func @transform_1(%arg0: i32) -> (i32, i32) {
    %c0_i32 = arith.constant 0 : i32
    %c0_i32_0 = arith.constant 0 : i32
    %c0_i32_1 = arith.constant 0 : i32
    return %c0_i32, %c0_i32_0 : i32, i32
  }
  func.func @transform_2(%arg0: i32) -> (i32, i32) {
    %c0_i32 = arith.constant 0 : i32
    %c0_i32_0 = arith.constant 0 : i32
    %c0_i32_1 = arith.constant 0 : i32
    return %c0_i32, %c0_i32_0 : i32, i32
  }
  func.func @transform_3(%arg0: i32) -> (i32, i32) {
    %c0_i32 = arith.constant 0 : i32
    %c0_i32_0 = arith.constant 0 : i32
    %c0_i32_1 = arith.constant 0 : i32
    return %c0_i32, %c0_i32_0 : i32, i32
  }
  func.func @transform_4(%arg0: i32) -> (i32, i32) {
    %c0_i32 = arith.constant 0 : i32
    %c0_i32_0 = arith.constant 0 : i32
    %c0_i32_1 = arith.constant 0 : i32
    return %c0_i32, %c0_i32_0 : i32, i32
  }
  func.func @transform_5(%arg0: i32) -> (i32, i32) {
    %c0_i32 = arith.constant 0 : i32
    %c0_i32_0 = arith.constant 0 : i32
    return %arg0, %c0_i32 : i32, i32
  }
  func.func @transform_6(%arg0: i32) -> (i32, i32, i32) {
    %c0_i32 = arith.constant 0 : i32
    %c0_i32_0 = arith.constant 0 : i32
    %c0_i32_1 = arith.constant 0 : i32
    return %arg0, %c0_i32, %c0_i32_0 : i32, i32, i32
  }
  func.func @transform_7(%arg0: i32) -> (i32, i32, i32) {
    %c0_i32 = arith.constant 0 : i32
    %c0_i32_0 = arith.constant 0 : i32
    %c0_i32_1 = arith.constant 0 : i32
    return %arg0, %c0_i32, %c0_i32_0 : i32, i32, i32
  }
}

</mosaic_0001>

<bundles_post_ra>
// kernel: tpu_custom_call.1
= control target key start
LH: loop header
LB: loop body
LE: loop exit
PB: predicated region body
PF: predicated region fallthrough
CT: control target
= control target key end

     0   :  { %13 = vsyncpa [#allocation3], 0  ;;  %s6048_s0 = inlined_call_operand.hbm [shape: bf16[8,128], index: 0, kind: input, shape index: {}]   ;;  %s6049_s1 = inlined_call_operand.hbm [shape: bf16[128,1024], index: 1, kind: input, shape index: {}]   ;;  %s6050_s2 = inlined_call_operand.hbm [shape: f32[1,1024], index: 2, kind: input, shape index: {}]   ;;  %s6051_s3 = inlined_call_operand.hbm [shape: bf16[1024,1024], index: 3, kind: input, shape index: {}]   ;;  %s6052_s4 = inlined_call_operand.hbm [shape: f32[1,1024], index: 4, kind: input, shape index: {}]   ;;  %s6053_s5 = inlined_call_operand.hbm [shape: bf16[8,1024], index: 5, kind: output, shape index: {0}]   ;;  %s6054_s6 = inlined_call_operand.hbm [shape: f32[1,1,1024], index: 6, kind: output, shape index: {1}]   ;;  %s6055_s7 = inlined_call_operand.hbm [shape: f32[1,1,1024], index: 7, kind: output, shape index: {2}]  }
   0x1   :  { %14 = vsyncpa [#allocation6], 0 }
   0x2   :  { %15 = vsyncpa [#allocation9], 0 }
   0x3   :  { %16 = vsyncpa [#allocation4], 0 }
   0x4   :  { %17 = vsyncpa [#allocation13], 0  ;;  %s5606_s24 = smov [#allocation5]   ;;  %s5420_s28 = scalar_lea.hbm %s6049_s1, 8192 }
   0x5   :  { %s33_s25 = sshll.u32 %s5606_s24, 4  ;;  %p5421_p0 = scmp.ne.s32.totalorder %s6049_s1, %s5420_s28  ;;  %s34_s25 = int_to_ptr.vmem [resolvable:$true] %s33_s25 }
   0x6   :  { %p5424_p1 = scmp.lt.u32.totalorder %s5420_s28, %s6049_s1 }
   0x8   :  { %p5426_p2 = pnand %p5424_p1, %p5421_p0 }
   0xa   :  { %5429 = shalt.err (!%p5426_p2)
}
   0xb   :  { %s5430_s10 = scalar_lea.vmem %s34_s25, 8192  ;;  %p5435_p4 = scmp.lt.s32.totalorder %s34_s25, %s34_s25 }
   0xc   :  { %p5431_p3 = scmp.ne.s32.totalorder %s34_s25, %s5430_s10  ;;  %p5436_p5 = scmp.lt.s32.totalorder %s5430_s10, %s5430_s10 }
   0xe   :  { %p5437_p6 = por %p5436_p5, %p5435_p4 }
  0x10   :  { %p5438_p7 = pnand %p5437_p6, %p5431_p3 }
  0x12   :  { %5441 = shalt.err (!%p5438_p7)
}
  0x13   :  { %s5607_s11 = smov 512   ;;  %s5608_s12 = smov 32  }
  0x14   :  { %39 = dma.hbm_to_vmem [thread:$0]  %s6049_s1, 8192, %s34_s25, [#allocation6], %s5607_s11, %s5607_s11, %s5608_s12  }
  0x15   :  { %s5609_s15 = smov [#allocation8]   ;;  %s5610_s17 = smov [#allocation2]  }
  0x16   :  { %s55_s16 = sshll.u32 %s5609_s15, 4  ;;  %s24_s18 = sshll.u32 %s5610_s17, 4  ;;  %s56_s16 = int_to_ptr.vmem [resolvable:$true] %s55_s16  ;;  %s25_s18 = int_to_ptr.vmem [resolvable:$true] %s24_s18 }
  0x17   :  { %s5442_s21 = scalar_lea.hbm %s6051_s3, 65536 }
  0x18   :  { %p5443_p8 = scmp.ne.s32.totalorder %s6051_s3, %s5442_s21  ;;  %p5446_p9 = scmp.lt.u32.totalorder %s5442_s21, %s6051_s3 }
  0x1a   :  { %p5448_p10 = pnand %p5446_p9, %p5443_p8 }
  0x1c   :  { %5451 = shalt.err (!%p5448_p10)
}
  0x1d   :  { %s5452_s1 = scalar_lea.vmem %s56_s16, 65536  ;;  %p5457_p12 = scmp.lt.s32.totalorder %s56_s16, %s56_s16 }
  0x1e   :  { %p5453_p11 = scmp.ne.s32.totalorder %s56_s16, %s5452_s1  ;;  %p5458_p13 = scmp.lt.s32.totalorder %s5452_s1, %s5452_s1 }
  0x20   :  { %p5459_p0 = por %p5458_p13, %p5457_p12 }
  0x22   :  { %p5460_p1 = pnand %p5459_p0, %p5453_p11 }
  0x24   :  { %5463 = shalt.err (!%p5460_p1)
}
  0x25   :  { %61 = dma.hbm_to_vmem [thread:$0]  %s6051_s3, 65536, %s56_s16, [#allocation9], %s5607_s11, %s5607_s11, %s5608_s12  }
  0x26   :  { %s5464_s30 = scalar_lea.hbm %s6048_s0, 64 }
  0x27   :  { %p5465_p2 = scmp.ne.s32.totalorder %s6048_s0, %s5464_s30  ;;  %p5468_p3 = scmp.lt.u32.totalorder %s5464_s30, %s6048_s0 }
  0x29   :  { %p5470_p4 = pnand %p5468_p3, %p5465_p2 }
  0x2b   :  { %5473 = shalt.err (!%p5470_p4)
}
  0x2c   :  { %s5474_s14 = scalar_lea.vmem %s25_s18, 64  ;;  %p5479_p6 = scmp.lt.s32.totalorder %s25_s18, %s25_s18 }
  0x2d   :  { %p5475_p5 = scmp.ne.s32.totalorder %s25_s18, %s5474_s14  ;;  %p5480_p7 = scmp.lt.s32.totalorder %s5474_s14, %s5474_s14 }
  0x2f   :  { %p5481_p8 = por %p5480_p7, %p5479_p6 }
  0x31   :  { %p5482_p9 = pnand %p5481_p8, %p5475_p5 }
  0x33   :  { %5485 = shalt.err (!%p5482_p9)
}
  0x34   :  { %27 = dma.hbm_to_vmem [thread:$0]  %s6048_s0, 64, %s25_s18, [#allocation3]  }
  0x35   :  { %s5611_s12 = smov [#allocation7]   ;;  %s5612_s16 = smov [#allocation10]  }
  0x36   :  { %s46_s15 = sshll.u32 %s5611_s12, 4  ;;  %s68_s17 = sshll.u32 %s5612_s16, 4  ;;  %s47_s15 = int_to_ptr.vmem [resolvable:$true] %s46_s15  ;;  %s69_s17 = int_to_ptr.vmem [resolvable:$true] %s68_s17 }
  0x37   :  { %s5486_s21 = scalar_lea.hbm %s6050_s2, 128 }
  0x38   :  { %p5487_p10 = scmp.ne.s32.totalorder %s6050_s2, %s5486_s21  ;;  %p5490_p11 = scmp.lt.u32.totalorder %s5486_s21, %s6050_s2 }
  0x3a   :  { %p5492_p12 = pnand %p5490_p11, %p5487_p10 }
  0x3c   :  { %5495 = shalt.err (!%p5492_p12)
}
  0x3d   :  { %s5496_s0 = scalar_lea.vmem %s47_s15, 128  ;;  %p5501_p0 = scmp.lt.s32.totalorder %s47_s15, %s47_s15 }
  0x3e   :  { %p5497_p13 = scmp.ne.s32.totalorder %s47_s15, %s5496_s0  ;;  %p5502_p1 = scmp.lt.s32.totalorder %s5496_s0, %s5496_s0 }
  0x40   :  { %p5503_p2 = por %p5502_p1, %p5501_p0 }
  0x42   :  { %p5504_p3 = pnand %p5503_p2, %p5497_p13 }
  0x44   :  { %5507 = shalt.err (!%p5504_p3)
}
  0x45   :  { %49 = dma.hbm_to_vmem [thread:$0]  %s6050_s2, 128, %s47_s15, [#allocation6]  }
  0x46   :  { %s5508_s28 = scalar_lea.hbm %s6052_s4, 128 }
  0x47   :  { %p5509_p4 = scmp.ne.s32.totalorder %s6052_s4, %s5508_s28  ;;  %p5512_p5 = scmp.lt.u32.totalorder %s5508_s28, %s6052_s4 }
  0x49   :  { %p5514_p6 = pnand %p5512_p5, %p5509_p4 }
  0x4b   :  { %5517 = shalt.err (!%p5514_p6)
}
  0x4c   :  { %s5518_s10 = scalar_lea.vmem %s69_s17, 128  ;;  %p5523_p8 = scmp.lt.s32.totalorder %s69_s17, %s69_s17 }
  0x4d   :  { %p5519_p7 = scmp.ne.s32.totalorder %s69_s17, %s5518_s10  ;;  %p5524_p9 = scmp.lt.s32.totalorder %s5518_s10, %s5518_s10 }
  0x4f   :  { %p5525_p10 = por %p5524_p9, %p5523_p8 }
  0x51   :  { %p5526_p11 = pnand %p5525_p10, %p5519_p7 }
  0x53   :  { %5529 = shalt.err (!%p5526_p11)
}
  0x54   :  { %71 = dma.hbm_to_vmem [thread:$0]  %s6052_s4, 128, %s69_s17, [#allocation9]  }
  0x55   :  { %5596 = dma.done.wait [#allocation3], 64  }
  0x56   :  { %5597 = vsyncadd [#allocation3], 4294967232 }
  0x57   :  { %5598 = dma.done.wait [#allocation6], 8320  }
  0x58   :  { %5599 = vsyncadd [#allocation6], 4294958976 }
  0x59   :  { %5600 = dma.done.wait [#allocation9], 65664  }
  0x5a   :  { %5601 = vsyncadd [#allocation9], 4294901632  ;;  %v5613_v0 = vmov 0   ;;  %v89_v1 = vld [vmem:[#allocation5] sm:$0xff]  ;;  %v90_v14 = vld [vmem:[#allocation5 + $0x8] sm:$0xff]  ;;  %s5615_s4 = smov [#allocation11]  }
  0x5b   :  { %547 = vmatprep.mubr.bf16.mxu0 %v5613_v0  ;;  %588 = vmatprep.mubr.bf16.mxu1 %v5613_v0  ;;  %v93_v2 = vld [vmem:[#allocation5 + $0x20] sm:$0xff]  ;;  %v94_v15 = vld [vmem:[#allocation5 + $0x28] sm:$0xff]  ;;  %v91_v58 = vld [vmem:[#allocation5 + $0x10] sm:$0xff]  ;;  %s4729_s14 = sshll.u32 %s5615_s4, 4  ;;  %s4730_s14 = int_to_ptr.vmem [resolvable:$true] %s4729_s14 }
  0x5c   :  { %v97_v3 = vld [vmem:[#allocation5 + $0x40] sm:$0xff]  ;;  %v4768_v4 = vcombine.high %v89_v1, %v93_v2  ;;  %v4767_v5 = vcombine.low %v89_v1, %v93_v2  ;;  %v98_v16 = vld [vmem:[#allocation5 + $0x48] sm:$0xff]  ;;  %v4770_v18 = vcombine.high %v90_v14, %v94_v15  ;;  %v4769_v19 = vcombine.low %v90_v14, %v94_v15  ;;  %v95_v59 = vld [vmem:[#allocation5 + $0x30] sm:$0xff]  ;;  %s5530_s3 = scalar_lea.vmem %s4730_s14, 512  ;;  %p5535_p13 = scmp.lt.s32.totalorder %s4730_s14, %s4730_s14 }
  0x5d   :  { %v101_v6 = vld [vmem:[#allocation5 + $0x60] sm:$0xff]  ;;  %v102_v17 = vld [vmem:[#allocation5 + $0x68] sm:$0xff]  ;;  %v4772_v1 = vcombine.high %v91_v58, %v95_v59  ;;  %p5531_p12 = scmp.ne.s32.totalorder %s4730_s14, %s5530_s3  ;;  %p5536_p0 = scmp.lt.s32.totalorder %s5530_s3, %s5530_s3 }
  0x5e   :  { %v4776_v7 = vcombine.high %v97_v3, %v101_v6  ;;  %v105_v8 = vld [vmem:[#allocation5 + $0x80] sm:$0xff]  ;;  %515 = vmatprep.subr.bf16.mxu0 %v4768_v4  ;;  %v4775_v10 = vcombine.low %v97_v3, %v101_v6  ;;  %v4778_v20 = vcombine.high %v98_v16, %v102_v17  ;;  %v106_v22 = vld [vmem:[#allocation5 + $0x88] sm:$0xff]  ;;  %556 = vmatprep.subr.bf16.mxu1 %v4770_v18  ;;  %v99_v3 = vld [vmem:[#allocation5 + $0x50] sm:$0xff] }
  0x5f   :  { %v109_v9 = vld [vmem:[#allocation5 + $0xa0] sm:$0xff]  ;;  %516 = vmatpush1.bf16.msra.mxu0 %v4767_v5  ;;  %v110_v23 = vld [vmem:[#allocation5 + $0xa8] sm:$0xff]  ;;  %557 = vmatpush1.bf16.msra.mxu1 %v4769_v19  ;;  %v4777_v27 = vcombine.low %v98_v16, %v102_v17  ;;  %v103_v4 = vld [vmem:[#allocation5 + $0x70] sm:$0xff]  ;;  %p5537_p1 = por %p5536_p0, %p5535_p13 }
  0x60   :  { %517 = vmatprep.subr.bf16.mxu0 %v4776_v7  ;;  %v4784_v11 = vcombine.high %v105_v8, %v109_v9  ;;  %v113_v12 = vld [vmem:[#allocation5 + $0xc0] sm:$0xff]  ;;  %v4783_v21 = vcombine.low %v105_v8, %v109_v9  ;;  %558 = vmatprep.subr.bf16.mxu1 %v4778_v20  ;;  %v4786_v28 = vcombine.high %v106_v22, %v110_v23  ;;  %v114_v30 = vld [vmem:[#allocation5 + $0xc8] sm:$0xff]  ;;  %v5720_v6 = vld [vmem:[#allocation2] sm:$0xf] }
  0x61   :  { %v117_v13 = vld [vmem:[#allocation5 + $0xe0] sm:$0xff]  ;;  %v118_v31 = vld [vmem:[#allocation5 + $0xe8] sm:$0xff]  ;;  %v4785_v35 = vcombine.low %v106_v22, %v110_v23  ;;  %v4771_v7 = vcombine.low %v91_v58, %v95_v59  ;;  %v92_v8 = vld [vmem:[#allocation5 + $0x18] sm:$0xff]  ;;  %v4779_v15 = vcombine.low %v99_v3, %v103_v4  ;;  %p5538_p2 = pnand %p5537_p1, %p5531_p12 }
  0x62   :  { %v4792_v24 = vcombine.high %v113_v12, %v117_v13  ;;  %v121_v25 = vld [vmem:[#allocation5 + $0x100] sm:$0xff]  ;;  %v4791_v29 = vcombine.low %v113_v12, %v117_v13  ;;  %v4794_v36 = vcombine.high %v114_v30, %v118_v31  ;;  %v122_v38 = vld [vmem:[#allocation5 + $0x108] sm:$0xff]  ;;  %v4793_v43 = vcombine.low %v114_v30, %v118_v31  ;;  %v96_v9 = vld [vmem:[#allocation5 + $0x38] sm:$0xff] }
  0x63   :  { %518 = vmatpush1.bf16.msra.mxu0 %v4775_v10  ;;  %v125_v26 = vld [vmem:[#allocation5 + $0x120] sm:$0xff]  ;;  %559 = vmatpush1.bf16.msra.mxu1 %v4777_v27  ;;  %v126_v39 = vld [vmem:[#allocation5 + $0x128] sm:$0xff]  ;;  %v4780_v10 = vcombine.high %v99_v3, %v103_v4  ;;  %v107_v12 = vld [vmem:[#allocation5 + $0x90] sm:$0xff]  ;;  %v4774_v14 = vcombine.high %v92_v8, %v96_v9 }
  0x64   :  { %519 = vmatprep.subr.bf16.mxu0 %v4784_v11  ;;  %v4800_v32 = vcombine.high %v121_v25, %v125_v26  ;;  %v129_v33 = vld [vmem:[#allocation5 + $0x140] sm:$0xff]  ;;  %560 = vmatprep.subr.bf16.mxu1 %v4786_v28  ;;  %v4799_v37 = vcombine.low %v121_v25, %v125_v26  ;;  %v4802_v44 = vcombine.high %v122_v38, %v126_v39  ;;  %v130_v46 = vld [vmem:[#allocation5 + $0x148] sm:$0xff]  ;;  %v111_v13 = vld [vmem:[#allocation5 + $0xb0] sm:$0xff] }
  0x65   :  { %v133_v34 = vld [vmem:[#allocation5 + $0x160] sm:$0xff]  ;;  %v134_v47 = vld [vmem:[#allocation5 + $0x168] sm:$0xff]  ;;  %v4801_v51 = vcombine.low %v122_v38, %v126_v39  ;;  %v100_v16 = vld [vmem:[#allocation5 + $0x58] sm:$0xff]  ;;  %v4788_v18 = vcombine.high %v107_v12, %v111_v13  ;;  %v4787_v23 = vcombine.low %v107_v12, %v111_v13 }
  0x66   :  { %v4808_v40 = vcombine.high %v129_v33, %v133_v34  ;;  %v137_v41 = vld [vmem:[#allocation5 + $0x180] sm:$0xff]  ;;  %v4807_v45 = vcombine.low %v129_v33, %v133_v34  ;;  %v4810_v52 = vcombine.high %v130_v46, %v134_v47  ;;  %v138_v54 = vld [vmem:[#allocation5 + $0x188] sm:$0xff]  ;;  %v4809_v57 = vcombine.low %v130_v46, %v134_v47  ;;  %v104_v17 = vld [vmem:[#allocation5 + $0x78] sm:$0xff] }
  0x67   :  { %520 = vmatpush1.bf16.msra.mxu0 %v4783_v21  ;;  %v141_v42 = vld [vmem:[#allocation5 + $0x1a0] sm:$0xff]  ;;  %561 = vmatpush1.bf16.msra.mxu1 %v4785_v35  ;;  %v142_v55 = vld [vmem:[#allocation5 + $0x1a8] sm:$0xff]  ;;  %v115_v19 = vld [vmem:[#allocation5 + $0xd0] sm:$0xff]  ;;  %v4773_v21 = vcombine.low %v92_v8, %v96_v9  ;;  %v4782_v22 = vcombine.high %v100_v16, %v104_v17 }
  0x68   :  { %521 = vmatprep.subr.bf16.mxu0 %v4792_v24  ;;  %562 = vmatprep.subr.bf16.mxu1 %v4794_v36  ;;  %v4816_v48 = vcombine.high %v137_v41, %v141_v42  ;;  %v145_v49 = vld [vmem:[#allocation5 + $0x1c0] sm:$0xff]  ;;  %v4815_v53 = vcombine.low %v137_v41, %v141_v42  ;;  %v4818_v60 = vcombine.high %v138_v54, %v142_v55  ;;  %v146_v62 = vld [vmem:[#allocation5 + $0x1c8] sm:$0xff]  ;;  %v119_v20 = vld [vmem:[#allocation5 + $0xf0] sm:$0xff] }
  0x69   :  { %v149_v50 = vld [vmem:[#allocation5 + $0x1e0] sm:$0xff]  ;;  %v150_v63 = vld [vmem:[#allocation5 + $0x1e8] sm:$0xff]  ;;  %v4817_v2 = vcombine.low %v138_v54, %v142_v55  ;;  %v108_v24 = vld [vmem:[#allocation5 + $0x98] sm:$0xff]  ;;  %v4796_v26 = vcombine.high %v115_v19, %v119_v20  ;;  %v4795_v31 = vcombine.low %v115_v19, %v119_v20 }
  0x6a   :  { %v4824_v56 = vcombine.high %v145_v49, %v149_v50  ;;  %v4823_v61 = vcombine.low %v145_v49, %v149_v50  ;;  %v4826_v5 = vcombine.high %v146_v62, %v150_v63  ;;  %v4825_v11 = vcombine.low %v146_v62, %v150_v63  ;;  %v112_v25 = vld [vmem:[#allocation5 + $0xb8] sm:$0xff]  ;;  %v123_v27 = vld [vmem:[#allocation5 + $0x110] sm:$0xff]  ;;  %v695_v59 = vld [vmem:[#allocation8] sm:$0xff] }
  0x6b   :  { %522 = vmatpush1.bf16.msra.mxu0 %v4791_v29  ;;  %563 = vmatpush1.bf16.msra.mxu1 %v4793_v43  ;;  %v127_v28 = vld [vmem:[#allocation5 + $0x130] sm:$0xff]  ;;  %v4781_v29 = vcombine.low %v100_v16, %v104_v17  ;;  %v4790_v30 = vcombine.high %v108_v24, %v112_v25  ;;  %v120_v33 = vld [vmem:[#allocation5 + $0xf8] sm:$0xff]  ;;  %v703_v4 = vld [vmem:[#allocation8 + $0x40] sm:$0xff] }
  0x6c   :  { %523 = vmatprep.subr.bf16.mxu0 %v4800_v32  ;;  %564 = vmatprep.subr.bf16.mxu1 %v4802_v44  ;;  %v116_v32 = vld [vmem:[#allocation5 + $0xd8] sm:$0xff]  ;;  %v4804_v34 = vcombine.high %v123_v27, %v127_v28  ;;  %v131_v35 = vld [vmem:[#allocation5 + $0x150] sm:$0xff]  ;;  %v4803_v39 = vcombine.low %v123_v27, %v127_v28  ;;  %v711_v13 = vld [vmem:[#allocation8 + $0x80] sm:$0xff] }
  0x6d   :  { %v135_v36 = vld [vmem:[#allocation5 + $0x170] sm:$0xff]  ;;  %v4798_v38 = vcombine.high %v116_v32, %v120_v33  ;;  %v128_v41 = vld [vmem:[#allocation5 + $0x138] sm:$0xff]  ;;  %v4797_v44 = vcombine.low %v116_v32, %v120_v33 }
  0x6e   :  { %v139_v42 = vld [vmem:[#allocation5 + $0x190] sm:$0xff]  ;;  %v4811_v46 = vcombine.low %v131_v35, %v135_v36  ;;  %v132_v47 = vld [vmem:[#allocation5 + $0x158] sm:$0xff] }
  0x6f   :  { %524 = vmatpush1.bf16.msra.mxu0 %v4799_v37  ;;  %565 = vmatpush1.bf16.msra.mxu1 %v4801_v51  ;;  %v4789_v37 = vcombine.low %v108_v24, %v112_v25  ;;  %v143_v43 = vld [vmem:[#allocation5 + $0x1b0] sm:$0xff]  ;;  %v140_v55 = vld [vmem:[#allocation5 + $0x198] sm:$0xff] }
  0x70   :  { %525 = vmatprep.subr.bf16.mxu0 %v4808_v40  ;;  %566 = vmatprep.subr.bf16.mxu1 %v4810_v52  ;;  %v124_v40 = vld [vmem:[#allocation5 + $0x118] sm:$0xff]  ;;  %v4820_v49 = vcombine.high %v139_v42, %v143_v43  ;;  %v147_v50 = vld [vmem:[#allocation5 + $0x1d0] sm:$0xff]  ;;  %v4819_v54 = vcombine.low %v139_v42, %v143_v43  ;;  %v743_v43 = vld [vmem:[#allocation8 + $0x180] sm:$0xff] }
  0x71   :  { %v151_v51 = vld [vmem:[#allocation5 + $0x1f0] sm:$0xff]  ;;  %v4805_v52 = vcombine.low %v124_v40, %v128_v41  ;;  %v148_v63 = vld [vmem:[#allocation5 + $0x1d8] sm:$0xff] }
  0x72   :  { %v4827_v62 = vcombine.low %v147_v50, %v151_v51  ;;  %v696_v9 = vld [vmem:[#allocation8 + $0x8] sm:$0xff] }
  0x73   :  { %526 = vmatpush1.bf16.msra.mxu0 %v4807_v45  ;;  %567 = vmatpush1.bf16.msra.mxu1 %v4809_v57  ;;  %v4806_v45 = vcombine.high %v124_v40, %v128_v41  ;;  %v4828_v57 = vcombine.high %v147_v50, %v151_v51  ;;  %v704_v17 = vld [vmem:[#allocation8 + $0x48] sm:$0xff]  ;;  %v751_v51 = vld [vmem:[#allocation8 + $0x1c0] sm:$0xff] }
  0x74   :  { %527 = vmatprep.subr.bf16.mxu0 %v4816_v48  ;;  %568 = vmatprep.subr.bf16.mxu1 %v4818_v60  ;;  %v136_v48 = vld [vmem:[#allocation5 + $0x178] sm:$0xff]  ;;  %v699_v60 = vld [vmem:[#allocation8 + $0x20] sm:$0xff]  ;;  %v712_v25 = vld [vmem:[#allocation8 + $0x88] sm:$0xff] }
  0x75   :  { %v4813_v58 = vcombine.low %v132_v47, %v136_v48  ;;  %v4831_v8 = vcombine.low %v695_v59, %v699_v60  ;;  %v720_v33 = vld [vmem:[#allocation8 + $0xc8] sm:$0xff] }
  0x76   :  { %v728_v40 = vld [vmem:[#allocation8 + $0x108] sm:$0xff] }
  0x77   :  { %528 = vmatpush1.bf16.msra.mxu0 %v4815_v53  ;;  %569 = vmatpush1.bf16.msra.mxu1 %v4817_v2  ;;  %v4814_v53 = vcombine.high %v132_v47, %v136_v48  ;;  %v4832_v2 = vcombine.high %v695_v59, %v699_v60  ;;  %v732_v41 = vld [vmem:[#allocation8 + $0x128] sm:$0xff]  ;;  %v759_v59 = vld [vmem:[#allocation8 + $0x200] sm:$0xff] }
  0x78   :  { %529 = vmatprep.subr.bf16.mxu0 %v4824_v56  ;;  %570 = vmatprep.subr.bf16.mxu1 %v4826_v5  ;;  %v144_v56 = vld [vmem:[#allocation5 + $0x1b8] sm:$0xff]  ;;  %v707_v5 = vld [vmem:[#allocation8 + $0x60] sm:$0xff]  ;;  %v736_v47 = vld [vmem:[#allocation8 + $0x148] sm:$0xff]  ;;  %v4865_v50 = vcombine.low %v728_v40, %v732_v41 }
  0x79   :  { %v4821_v3 = vcombine.low %v140_v55, %v144_v56  ;;  %v4839_v16 = vcombine.low %v703_v4, %v707_v5  ;;  %v740_v48 = vld [vmem:[#allocation8 + $0x168] sm:$0xff]  ;;  %v763_v60 = vld [vmem:[#allocation8 + $0x220] sm:$0xff] }
  0x7b   :  { %530 = vmatpush1.bf16.msra.mxu0 %v4823_v61  ;;  %571 = vmatpush1.bf16.msra.mxu1 %v4825_v11  ;;  %v4822_v61 = vcombine.high %v140_v55, %v144_v56  ;;  %v4840_v11 = vcombine.high %v703_v4, %v707_v5  ;;  %v744_v55 = vld [vmem:[#allocation8 + $0x188] sm:$0xff]  ;;  %v767_v4 = vld [vmem:[#allocation8 + $0x240] sm:$0xff] }
  0x7c   :  { %597 = vmatprep.subr.bf16.mxu0 %v4772_v1  ;;  %638 = vmatprep.subr.bf16.mxu1 %v4774_v14  ;;  %v152_v1 = vld [vmem:[#allocation5 + $0x1f8] sm:$0xff]  ;;  %v715_v14 = vld [vmem:[#allocation8 + $0xa0] sm:$0xff]  ;;  %v748_v56 = vld [vmem:[#allocation8 + $0x1a8] sm:$0xff] }
  0x7d   :  { %v4829_v12 = vcombine.low %v148_v63, %v152_v1  ;;  %v4848_v19 = vcombine.high %v711_v13, %v715_v14  ;;  %v4847_v24 = vcombine.low %v711_v13, %v715_v14  ;;  %v771_v5 = vld [vmem:[#allocation8 + $0x260] sm:$0xff] }
  0x7e   :  { %548 = vmatmul.mubr.bf16.vlgmr.msra.gmra.mrb[0].mxu0 %v5720_v6  ;;  %589 = vmatmul.mubr.bf16.vlgmr.msra.gmra.mrb[0].mxu1 %v5720_v6  ;;  %v775_v13 = vld [vmem:[#allocation8 + $0x280] sm:$0xff] }
  0x7f   :  { %598 = vmatpush1.bf16.msra.mxu0 %v4771_v7  ;;  %629 = vmatprep.mubr.bf16.mxu0 %v5613_v0  ;;  %v4830_v7 = vcombine.high %v148_v63, %v152_v1  ;;  %v752_v63 = vld [vmem:[#allocation8 + $0x1c8] sm:$0xff]  ;;  %v779_v14 = vld [vmem:[#allocation8 + $0x2a0] sm:$0xff] }
  0x80   :  { %599 = vmatprep.subr.bf16.mxu0 %v4780_v10  ;;  %639 = vmatpush1.bf16.msra.mxu1 %v4773_v21  ;;  %v700_v10 = vld [vmem:[#allocation8 + $0x28] sm:$0xff]  ;;  %v719_v21 = vld [vmem:[#allocation8 + $0xc0] sm:$0xff] }
  0x81   :  { %670 = vmatprep.mubr.bf16.mxu1 %v5613_v0  ;;  %640 = vmatprep.subr.bf16.mxu1 %v4782_v22  ;;  %v4812_v0 = vcombine.high %v131_v35, %v135_v36  ;;  %v4833_v20 = vcombine.low %v696_v9, %v700_v10  ;;  %v723_v22 = vld [vmem:[#allocation8 + $0xe0] sm:$0xff]  ;;  %v756_v1 = vld [vmem:[#allocation8 + $0x1e8] sm:$0xff] }
  0x82   :  { %v4856_v27 = vcombine.high %v719_v21, %v723_v22  ;;  %v4855_v32 = vcombine.low %v719_v21, %v723_v22  ;;  %v783_v21 = vld [vmem:[#allocation8 + $0x2c0] sm:$0xff] }
  0x83   :  { %600 = vmatpush1.bf16.msra.mxu0 %v4779_v15  ;;  %v4834_v15 = vcombine.high %v696_v9, %v700_v10  ;;  %v760_v9 = vld [vmem:[#allocation8 + $0x208] sm:$0xff]  ;;  %v787_v22 = vld [vmem:[#allocation8 + $0x2e0] sm:$0xff] }
  0x84   :  { %601 = vmatprep.subr.bf16.mxu0 %v4788_v18  ;;  %641 = vmatpush1.bf16.msra.mxu1 %v4781_v29  ;;  %v708_v18 = vld [vmem:[#allocation8 + $0x68] sm:$0xff]  ;;  %v727_v29 = vld [vmem:[#allocation8 + $0x100] sm:$0xff] }
  0x85   :  { %642 = vmatprep.subr.bf16.mxu1 %v4790_v30  ;;  %v4841_v28 = vcombine.low %v704_v17, %v708_v18  ;;  %v731_v30 = vld [vmem:[#allocation8 + $0x120] sm:$0xff]  ;;  %v764_v10 = vld [vmem:[#allocation8 + $0x228] sm:$0xff] }
  0x86   :  { %v4864_v35 = vcombine.high %v727_v29, %v731_v30 }
  0x87   :  { %602 = vmatpush1.bf16.msra.mxu0 %v4787_v23  ;;  %v4842_v23 = vcombine.high %v704_v17, %v708_v18  ;;  %v768_v17 = vld [vmem:[#allocation8 + $0x248] sm:$0xff] }
  0x88   :  { %603 = vmatprep.subr.bf16.mxu0 %v4796_v26  ;;  %643 = vmatpush1.bf16.msra.mxu1 %v4789_v37  ;;  %v716_v26 = vld [vmem:[#allocation8 + $0xa8] sm:$0xff]  ;;  %v735_v37 = vld [vmem:[#allocation8 + $0x140] sm:$0xff] }
  0x89   :  { %644 = vmatprep.subr.bf16.mxu1 %v4798_v38  ;;  %v4849_v36 = vcombine.low %v712_v25, %v716_v26  ;;  %v739_v38 = vld [vmem:[#allocation8 + $0x160] sm:$0xff]  ;;  %v772_v18 = vld [vmem:[#allocation8 + $0x268] sm:$0xff] }
  0x8b   :  { %604 = vmatpush1.bf16.msra.mxu0 %v4795_v31  ;;  %v4850_v31 = vcombine.high %v712_v25, %v716_v26  ;;  %v776_v25 = vld [vmem:[#allocation8 + $0x288] sm:$0xff] }
  0x8c   :  { %605 = vmatprep.subr.bf16.mxu0 %v4804_v34  ;;  %645 = vmatpush1.bf16.msra.mxu1 %v4797_v44  ;;  %v724_v34 = vld [vmem:[#allocation8 + $0xe8] sm:$0xff]  ;;  %v747_v44 = vld [vmem:[#allocation8 + $0x1a0] sm:$0xff] }
  0x8d   :  { %646 = vmatprep.subr.bf16.mxu1 %v4806_v45  ;;  %v4857_v42 = vcombine.low %v720_v33, %v724_v34  ;;  %v4866_v45 = vcombine.high %v728_v40, %v732_v41  ;;  %v780_v26 = vld [vmem:[#allocation8 + $0x2a8] sm:$0xff] }
  0x8e   :  { %v792_v40 = vld [vmem:[#allocation8 + $0x308] sm:$0xff] }
  0x8f   :  { %606 = vmatpush1.bf16.msra.mxu0 %v4803_v39  ;;  %v4863_v39 = vcombine.low %v727_v29, %v731_v30  ;;  %v791_v29 = vld [vmem:[#allocation8 + $0x300] sm:$0xff]  ;;  %v796_v41 = vld [vmem:[#allocation8 + $0x328] sm:$0xff] }
  0x90   :  { %607 = vmatprep.subr.bf16.mxu0 %v4812_v0  ;;  %647 = vmatpush1.bf16.msra.mxu1 %v4805_v52  ;;  %v4872_v0 = vcombine.high %v735_v37, %v739_v38  ;;  %v755_v52 = vld [vmem:[#allocation8 + $0x1e0] sm:$0xff] }
  0x91   :  { %648 = vmatprep.subr.bf16.mxu1 %v4814_v53  ;;  %v4874_v53 = vcombine.high %v736_v47, %v740_v48  ;;  %v795_v30 = vld [vmem:[#allocation8 + $0x320] sm:$0xff] }
  0x93   :  { %608 = vmatpush1.bf16.msra.mxu0 %v4811_v46  ;;  %v4871_v46 = vcombine.low %v735_v37, %v739_v38  ;;  %v799_v37 = vld [vmem:[#allocation8 + $0x340] sm:$0xff] }
  0x94   :  { %609 = vmatprep.subr.bf16.mxu0 %v4820_v49  ;;  %649 = vmatpush1.bf16.msra.mxu1 %v4813_v58  ;;  %v4880_v49 = vcombine.high %v743_v43, %v747_v44  ;;  %v4873_v58 = vcombine.low %v736_v47, %v740_v48  ;;  %v803_v38 = vld [vmem:[#allocation8 + $0x360] sm:$0xff]  ;;  %v800_v47 = vld [vmem:[#allocation8 + $0x348] sm:$0xff] }
  0x95   :  { %650 = vmatprep.subr.bf16.mxu1 %v4822_v61  ;;  %v4882_v61 = vcombine.high %v744_v55, %v748_v56  ;;  %v804_v48 = vld [vmem:[#allocation8 + $0x368] sm:$0xff] }
  0x97   :  { %610 = vmatpush1.bf16.msra.mxu0 %v4819_v54  ;;  %v4879_v54 = vcombine.low %v743_v43, %v747_v44  ;;  %v4930_v43 = vcombine.high %v792_v40, %v796_v41  ;;  %v807_v44 = vld [vmem:[#allocation8 + $0x380] sm:$0xff] }
  0x98   :  { %611 = vmatprep.subr.bf16.mxu0 %v4828_v57  ;;  %651 = vmatpush1.bf16.msra.mxu1 %v4821_v3  ;;  %v4888_v57 = vcombine.high %v751_v51, %v755_v52  ;;  %v4881_v3 = vcombine.low %v744_v55, %v748_v56  ;;  %v808_v55 = vld [vmem:[#allocation8 + $0x388] sm:$0xff] }
  0x99   :  { %652 = vmatprep.subr.bf16.mxu1 %v4830_v7  ;;  %v4890_v7 = vcombine.high %v752_v63, %v756_v1  ;;  %v812_v56 = vld [vmem:[#allocation8 + $0x3a8] sm:$0xff] }
  0x9b   :  { %612 = vmatpush1.bf16.msra.mxu0 %v4827_v62  ;;  %v4887_v62 = vcombine.low %v751_v51, %v755_v52  ;;  %v4938_v51 = vcombine.high %v800_v47, %v804_v48  ;;  %v815_v52 = vld [vmem:[#allocation8 + $0x3c0] sm:$0xff] }
  0x9c   :  { %3809 = vmatprep.subr.bf16.mxu0 %v4832_v2  ;;  %653 = vmatpush1.bf16.msra.mxu1 %v4829_v12  ;;  %v4896_v2 = vcombine.high %v759_v59, %v763_v60  ;;  %v4889_v12 = vcombine.low %v752_v63, %v756_v1  ;;  %v816_v1 = vld [vmem:[#allocation8 + $0x3c8] sm:$0xff] }
  0x9d   :  { %3973 = vmatprep.subr.bf16.mxu1 %v4834_v15  ;;  %v4898_v15 = vcombine.high %v760_v9, %v764_v10 }
  0x9e   :  { %630 = vmatmul.mubr.bf16.vlgmr.msra.gmra.mrb[4].mxu0 %v5720_v6 }
  0x9f   :  { %3810 = vmatpush1.bf16.msra.mxu0 %v4831_v8  ;;  %671 = vmatmul.mubr.bf16.vlgmr.msra.gmra.mrb[4].mxu1 %v5720_v6  ;;  %v4858_v6 = vcombine.high %v720_v33, %v724_v34  ;;  %v4895_v8 = vcombine.low %v759_v59, %v763_v60  ;;  %v784_v33 = vld [vmem:[#allocation8 + $0x2c8] sm:$0xff]  ;;  %v4946_v59 = vcombine.high %v808_v55, %v812_v56  ;;  %v823_v60 = vld [vmem:[#allocation8 + $0x400] sm:$0xff] }
  0xa0   :  { %3811 = vmatprep.subr.bf16.mxu0 %v4840_v11  ;;  %3974 = vmatpush1.bf16.msra.mxu1 %v4833_v20  ;;  %v4904_v11 = vcombine.high %v767_v4, %v771_v5  ;;  %v4897_v20 = vcombine.low %v760_v9, %v764_v10  ;;  %v788_v34 = vld [vmem:[#allocation8 + $0x2e8] sm:$0xff] }
  0xa1   :  { %3975 = vmatprep.subr.bf16.mxu1 %v4842_v23  ;;  %v4906_v23 = vcombine.high %v768_v17, %v772_v18 }
  0xa3   :  { %3812 = vmatpush1.bf16.msra.mxu0 %v4839_v16  ;;  %v4903_v16 = vcombine.low %v767_v4, %v771_v5 }
  0xa4   :  { %3813 = vmatprep.subr.bf16.mxu0 %v4848_v19  ;;  %3976 = vmatpush1.bf16.msra.mxu1 %v4841_v28  ;;  %v4912_v19 = vcombine.high %v775_v13, %v779_v14  ;;  %v4905_v28 = vcombine.low %v768_v17, %v772_v18 }
  0xa5   :  { %3977 = vmatprep.subr.bf16.mxu1 %v4850_v31  ;;  %v4914_v31 = vcombine.high %v776_v25, %v780_v26 }
  0xa7   :  { %3814 = vmatpush1.bf16.msra.mxu0 %v4847_v24  ;;  %v4911_v24 = vcombine.low %v775_v13, %v779_v14 }
  0xa8   :  { %3815 = vmatprep.subr.bf16.mxu0 %v4856_v27  ;;  %3978 = vmatpush1.bf16.msra.mxu1 %v4849_v36  ;;  %v4920_v27 = vcombine.high %v783_v21, %v787_v22  ;;  %v4913_v36 = vcombine.low %v776_v25, %v780_v26 }
  0xa9   :  { %3979 = vmatprep.subr.bf16.mxu1 %v4858_v6  ;;  %v4922_v6 = vcombine.high %v784_v33, %v788_v34 }
  0xab   :  { %3816 = vmatpush1.bf16.msra.mxu0 %v4855_v32  ;;  %v4919_v32 = vcombine.low %v783_v21, %v787_v22 }
  0xac   :  { %3817 = vmatprep.subr.bf16.mxu0 %v4864_v35  ;;  %3980 = vmatpush1.bf16.msra.mxu1 %v4857_v42  ;;  %v4928_v35 = vcombine.high %v791_v29, %v795_v30  ;;  %v4921_v42 = vcombine.low %v784_v33, %v788_v34 }
  0xad   :  { %3981 = vmatprep.subr.bf16.mxu1 %v4866_v45  ;;  %v811_v45 = vld [vmem:[#allocation8 + $0x3a0] sm:$0xff] }
  0xaf   :  { %3818 = vmatpush1.bf16.msra.mxu0 %v4863_v39  ;;  %v4927_v39 = vcombine.low %v791_v29, %v795_v30  ;;  %v835_v29 = vld [vmem:[#allocation8 + $0x460] sm:$0xff]  ;;  %v832_v30 = vld [vmem:[#allocation8 + $0x448] sm:$0xff] }
  0xb0   :  { %3819 = vmatprep.subr.bf16.mxu0 %v4872_v0  ;;  %3982 = vmatpush1.bf16.msra.mxu1 %v4865_v50  ;;  %v4936_v0 = vcombine.high %v799_v37, %v803_v38  ;;  %v4929_v50 = vcombine.low %v792_v40, %v796_v41  ;;  %v840_v40 = vld [vmem:[#allocation8 + $0x488] sm:$0xff] }
  0xb1   :  { %3983 = vmatprep.subr.bf16.mxu1 %v4874_v53  ;;  %v819_v53 = vld [vmem:[#allocation8 + $0x3e0] sm:$0xff]  ;;  %v844_v41 = vld [vmem:[#allocation8 + $0x4a8] sm:$0xff] }
  0xb2   :  { %v4951_v63 = vcombine.low %v815_v52, %v819_v53 }
  0xb3   :  { %3820 = vmatpush1.bf16.msra.mxu0 %v4871_v46  ;;  %v4935_v46 = vcombine.low %v799_v37, %v803_v38  ;;  %v839_v38 = vld [vmem:[#allocation8 + $0x480] sm:$0xff] }
  0xb4   :  { %3821 = vmatprep.subr.bf16.mxu0 %v4880_v49  ;;  %3984 = vmatpush1.bf16.msra.mxu1 %v4873_v58  ;;  %v4944_v49 = vcombine.high %v807_v44, %v811_v45  ;;  %v4937_v58 = vcombine.low %v800_v47, %v804_v48  ;;  %v4978_v48 = vcombine.high %v840_v40, %v844_v41 }
  0xb5   :  { %3985 = vmatprep.subr.bf16.mxu1 %v4882_v61  ;;  %v827_v61 = vld [vmem:[#allocation8 + $0x420] sm:$0xff] }
  0xb6   :  { %v4959_v4 = vcombine.low %v823_v60, %v827_v61  ;;  %v4960_v5 = vcombine.high %v823_v60, %v827_v61  ;;  %v856_v60 = vld [vmem:[#allocation8 + $0x508] sm:$0xff] }
  0xb7   :  { %3822 = vmatpush1.bf16.msra.mxu0 %v4879_v54  ;;  %v4943_v54 = vcombine.low %v807_v44, %v811_v45  ;;  %v860_v61 = vld [vmem:[#allocation8 + $0x528] sm:$0xff] }
  0xb8   :  { %3823 = vmatprep.subr.bf16.mxu0 %v4888_v57  ;;  %3986 = vmatpush1.bf16.msra.mxu1 %v4881_v3  ;;  %v4952_v57 = vcombine.high %v815_v52, %v819_v53  ;;  %v828_v3 = vld [vmem:[#allocation8 + $0x428] sm:$0xff] }
  0xb9   :  { %3987 = vmatprep.subr.bf16.mxu1 %v4890_v7  ;;  %v852_v52 = vld [vmem:[#allocation8 + $0x4e8] sm:$0xff] }
  0xbb   :  { %3824 = vmatpush1.bf16.msra.mxu0 %v4887_v62  ;;  %v824_v62 = vld [vmem:[#allocation8 + $0x408] sm:$0xff] }
  0xbc   :  { %3825 = vmatprep.subr.bf16.mxu0 %v4896_v2  ;;  %3988 = vmatpush1.bf16.msra.mxu1 %v4889_v12  ;;  %v820_v2 = vld [vmem:[#allocation8 + $0x3e8] sm:$0xff]  ;;  %v4961_v7 = vcombine.low %v824_v62, %v828_v3  ;;  %v155_v12 = vlaneseq }
  0xbd   :  { %3989 = vmatprep.subr.bf16.mxu1 %v4898_v15  ;;  %v4954_v9 = vcombine.high %v816_v1, %v820_v2  ;;  %v4953_v10 = vcombine.low %v816_v1, %v820_v2  ;;  %v5731_v15 = vld [vmem:[#allocation7] sm:$0xff]  ;;  %v4994_v2 = vcombine.high %v856_v60, %v860_v61 }
  0xbe   :  { %v5728_v13 = vshrl.u32 %v155_v12, 7  ;;  %v871_v12 = vld [vmem:[#allocation8 + $0x580] sm:$0xff] }
  0xbf   :  { %3826 = vmatpush1.bf16.msra.mxu0 %v4895_v8  ;;  %v4945_v8 = vcombine.low %v808_v55, %v812_v56  ;;  %v4977_v55 = vcombine.low %v840_v40, %v844_v41 }
  0xc0   :  { %3827 = vmatprep.subr.bf16.mxu0 %v4904_v11  ;;  %3990 = vmatpush1.bf16.msra.mxu1 %v4897_v20  ;;  %v4962_v11 = vcombine.high %v824_v62, %v828_v3  ;;  %v157_v14 = vsub.s32 0, %v5728_v13  ;;  %v169_v20 = vsub.s32 3, %v5728_v13  ;;  %v863_v3 = vld [vmem:[#allocation8 + $0x540] sm:$0xff] }
  0xc1   :  { %3991 = vmatprep.subr.bf16.mxu1 %v4906_v23 }
  0xc2   :  { %v158_v17 = vrot.slane %v5731_v15, %v157_v14 }
  0xc3   :  { %3828 = vmatpush1.bf16.msra.mxu0 %v4903_v16  ;;  %v161_v16 = vsub.s32 1, %v5728_v13 }
  0xc4   :  { %3829 = vmatprep.subr.bf16.mxu0 %v4912_v19  ;;  %3992 = vmatpush1.bf16.msra.mxu1 %v4905_v28 }
  0xc5   :  { %3993 = vmatprep.subr.bf16.mxu1 %v4914_v31  ;;  %v162_v18 = vrot.slane %v5731_v15, %v161_v16  ;;  %v836_v31 = vld [vmem:[#allocation8 + $0x468] sm:$0xff] }
  0xc6   :  { %v4970_v37 = vcombine.high %v832_v30, %v836_v31  ;;  %v4969_v45 = vcombine.low %v832_v30, %v836_v31 }
  0xc7   :  { %3830 = vmatpush1.bf16.msra.mxu0 %v4911_v24 }
  0xc8   :  { %3831 = vmatprep.subr.bf16.mxu0 %v4920_v27  ;;  %3994 = vmatpush1.bf16.msra.mxu1 %v4913_v36  ;;  %v831_v27 = vld [vmem:[#allocation8 + $0x440] sm:$0xff] }
  0xc9   :  { %3995 = vmatprep.subr.bf16.mxu1 %v4922_v6  ;;  %v4968_v36 = vcombine.high %v831_v27, %v835_v29  ;;  %v4967_v44 = vcombine.low %v831_v27, %v835_v29  ;;  %v880_v27 = vld [vmem:[#allocation8 + $0x5c8] sm:$0xff] }
  0xcb   :  { %3832 = vmatpush1.bf16.msra.mxu0 %v4919_v32  ;;  %v170_v32 = vrot.slane %v5731_v15, %v169_v20 }
  0xcc   :  { %3833 = vmatprep.subr.bf16.mxu0 %v4928_v35  ;;  %3996 = vmatpush1.bf16.msra.mxu1 %v4921_v42 }
  0xcd   :  { %3997 = vmatprep.subr.bf16.mxu1 %v4930_v43 }
  0xcf   :  { %3834 = vmatpush1.bf16.msra.mxu0 %v4927_v39  ;;  %v843_v39 = vld [vmem:[#allocation8 + $0x4a0] sm:$0xff] }
  0xd0   :  { %3835 = vmatprep.subr.bf16.mxu0 %v4936_v0  ;;  %3998 = vmatpush1.bf16.msra.mxu1 %v4929_v50  ;;  %v4976_v47 = vcombine.high %v839_v38, %v843_v39  ;;  %v851_v50 = vld [vmem:[#allocation8 + $0x4e0] sm:$0xff] }
  0xd1   :  { %3999 = vmatprep.subr.bf16.mxu1 %v4938_v51  ;;  %v848_v51 = vld [vmem:[#allocation8 + $0x4c8] sm:$0xff] }
  0xd3   :  { %3836 = vmatpush1.bf16.msra.mxu0 %v4935_v46 }
  0xd4   :  { %3837 = vmatprep.subr.bf16.mxu0 %v4944_v49  ;;  %4000 = vmatpush1.bf16.msra.mxu1 %v4937_v58  ;;  %v847_v49 = vld [vmem:[#allocation8 + $0x4c0] sm:$0xff] }
  0xd5   :  { %4001 = vmatprep.subr.bf16.mxu1 %v4946_v59  ;;  %v4984_v56 = vcombine.high %v847_v49, %v851_v50  ;;  %v855_v58 = vld [vmem:[#allocation8 + $0x500] sm:$0xff]  ;;  %v4983_v62 = vcombine.low %v847_v49, %v851_v50  ;;  %v900_v49 = vld [vmem:[#allocation8 + $0x668] sm:$0xff] }
  0xd6   :  { %v859_v59 = vld [vmem:[#allocation8 + $0x520] sm:$0xff] }
  0xd7   :  { %3838 = vmatpush1.bf16.msra.mxu0 %v4943_v54  ;;  %v4975_v54 = vcombine.low %v839_v38, %v843_v39  ;;  %v4992_v1 = vcombine.high %v855_v58, %v859_v59  ;;  %v888_v38 = vld [vmem:[#allocation8 + $0x608] sm:$0xff] }
  0xd8   :  { %3839 = vmatprep.subr.bf16.mxu0 %v4952_v57  ;;  %4002 = vmatpush1.bf16.msra.mxu1 %v4945_v8  ;;  %v4986_v57 = vcombine.high %v848_v51, %v852_v52  ;;  %v4991_v8 = vcombine.low %v855_v58, %v859_v59  ;;  %v907_v58 = vld [vmem:[#allocation8 + $0x6a0] sm:$0xff]  ;;  %v904_v59 = vld [vmem:[#allocation8 + $0x688] sm:$0xff] }
  0xd9   :  { %4003 = vmatprep.subr.bf16.mxu1 %v4954_v9  ;;  %v4993_v9 = vcombine.low %v856_v60, %v860_v61  ;;  %v908_v60 = vld [vmem:[#allocation8 + $0x6a8] sm:$0xff] }
  0xdb   :  { %3840 = vmatpush1.bf16.msra.mxu0 %v4951_v63  ;;  %v4985_v63 = vcombine.low %v848_v51, %v852_v52 }
  0xdc   :  { %3850 = vmatprep.subr.bf16.mxu0 %v4960_v5  ;;  %4004 = vmatpush1.bf16.msra.mxu1 %v4953_v10  ;;  %v864_v5 = vld [vmem:[#allocation8 + $0x548] sm:$0xff] }
  0xdd   :  { %4014 = vmatprep.subr.bf16.mxu1 %v4962_v11 }
 0x151   :  { %v549_v19 = vpop.f32.mrb[0].mxu0  ;;  %v5746_v34 = vpop.f32.mrb[0].mxu1 }
 0x152   :  { %v550_v21 = vadd.f32 %v549_v19, %v158_v17  ;;  %v551_v22 = vpop.f32.mrb[1].mxu0  ;;  %v592_v6 = vpop.f32.mrb[1].mxu1  ;;  %v875_v17 = vld [vmem:[#allocation8 + $0x5a0] sm:$0xff]  ;;  %v876_v19 = vld [vmem:[#allocation8 + $0x5a8] sm:$0xff] }
 0x153   :  { %v552_v23 = vadd.f32 %v551_v22, %v162_v18  ;;  %v553_v24 = vpop.f32.mrb[2].mxu0  ;;  %v593_v0 = vadd.f32 %v592_v6, %v170_v32  ;;  %v594_v42 = vpop.f32.mrb[2].mxu1  ;;  %v872_v18 = vld [vmem:[#allocation8 + $0x588] sm:$0xff]  ;;  %v5007_v29 = vcombine.low %v871_v12, %v875_v17 }
 0x154   :  { %v679_v25 = vmax.f32 %v550_v21, 0.0  ;;  %v554_v26 = vpop.f32.mrb[3].mxu0  ;;  %v595_v43 = vpop.f32.mrb[3].mxu1  ;;  %v5010_v24 = vcombine.high %v872_v18, %v876_v19  ;;  %v5009_v30 = vcombine.low %v872_v18, %v876_v19  ;;  %v892_v6 = vld [vmem:[#allocation8 + $0x628] sm:$0xff]  ;;  %v923_v18 = vld [vmem:[#allocation8 + $0x720] sm:$0xff] }
 0x155   :  { %v680_v28 = vmax.f32 %v552_v23, 0.0  ;;  %v682_v46 = vmax.f32 %v593_v0, 0.0  ;;  %v5008_v23 = vcombine.high %v871_v12, %v875_v17  ;;  %v883_v26 = vld [vmem:[#allocation8 + $0x5e0] sm:$0xff]  ;;  %v5025_v51 = vcombine.low %v888_v38, %v892_v6  ;;  %v920_v19 = vld [vmem:[#allocation8 + $0x708] sm:$0xff] }
 0x156   :  { %v5748_v35 = vpack.c.bf16 %v679_v25, %v679_v25  ;;  %v879_v25 = vld [vmem:[#allocation8 + $0x5c0] sm:$0xff] }
 0x157   :  { %v5744_v33 = vpack.c.bf16 %v680_v28, %v680_v28  ;;  %v5754_v53 = vpack.c.bf16 %v682_v46, %v682_v46  ;;  %v884_v28 = vld [vmem:[#allocation8 + $0x5e8] sm:$0xff]  ;;  %v5016_v31 = vcombine.high %v879_v25, %v883_v26  ;;  %v5015_v41 = vcombine.low %v879_v25, %v883_v26  ;;  %v919_v17 = vld [vmem:[#allocation8 + $0x700] sm:$0xff] }
 0x158   :  { %v5018_v32 = vcombine.high %v880_v27, %v884_v28  ;;  %v5017_v0 = vcombine.low %v880_v27, %v884_v28  ;;  %v927_v26 = vld [vmem:[#allocation8 + $0x740] sm:$0xff]  ;;  %v928_v28 = vld [vmem:[#allocation8 + $0x748] sm:$0xff] }
 0x159   :  { %3841 = vmatprep.mubr.bf16.mxu0 %v5744_v33  ;;  %4005 = vmatprep.mubr.bf16.mxu1 %v5744_v33  ;;  %v931_v27 = vld [vmem:[#allocation8 + $0x760] sm:$0xff] }
 0x15a   :  { %3842 = vmatmul.mubr.bf16.vlgmr.msra.gmra.mrb[8].mxu0 %v5748_v35  ;;  %4006 = vmatmul.mubr.bf16.vlgmr.msra.gmra.mrb[8].mxu1 %v5748_v35 }
 0x15b   :  { %3851 = vmatpush1.bf16.msra.mxu0 %v4959_v4  ;;  %4015 = vmatpush1.bf16.msra.mxu1 %v4961_v7  ;;  %v867_v4 = vld [vmem:[#allocation8 + $0x560] sm:$0xff]  ;;  %v868_v7 = vld [vmem:[#allocation8 + $0x568] sm:$0xff] }
 0x15c   :  { %3852 = vmatprep.subr.bf16.mxu0 %v4968_v36  ;;  %4016 = vmatprep.subr.bf16.mxu1 %v4970_v37  ;;  %v5000_v10 = vcombine.high %v863_v3, %v867_v4  ;;  %v5002_v11 = vcombine.high %v864_v5, %v868_v7  ;;  %v4999_v21 = vcombine.low %v863_v3, %v867_v4  ;;  %v887_v36 = vld [vmem:[#allocation8 + $0x600] sm:$0xff] }
 0x15d   :  { %3882 = vmatprep.mubr.bf16.mxu0 %v5754_v53  ;;  %4046 = vmatprep.mubr.bf16.mxu1 %v5754_v53  ;;  %v5001_v22 = vcombine.low %v864_v5, %v868_v7  ;;  %v891_v37 = vld [vmem:[#allocation8 + $0x620] sm:$0xff]  ;;  %v5042_v3 = vcombine.high %v904_v59, %v908_v60  ;;  %v912_v7 = vld [vmem:[#allocation8 + $0x6c8] sm:$0xff] }
 0x15e   :  { %v5024_v43 = vcombine.high %v887_v36, %v891_v37  ;;  %v5023_v50 = vcombine.low %v887_v36, %v891_v37  ;;  %v911_v4 = vld [vmem:[#allocation8 + $0x6c0] sm:$0xff]  ;;  %v5064_v36 = vcombine.high %v927_v26, %v931_v27 }
 0x15f   :  { %3853 = vmatpush1.bf16.msra.mxu0 %v4967_v44  ;;  %4017 = vmatpush1.bf16.msra.mxu1 %v4969_v45  ;;  %v5026_v44 = vcombine.high %v888_v38, %v892_v6  ;;  %v895_v45 = vld [vmem:[#allocation8 + $0x640] sm:$0xff] }
 0x160   :  { %3854 = vmatprep.subr.bf16.mxu0 %v4976_v47  ;;  %4018 = vmatprep.subr.bf16.mxu1 %v4978_v48  ;;  %v899_v47 = vld [vmem:[#allocation8 + $0x660] sm:$0xff]  ;;  %v896_v48 = vld [vmem:[#allocation8 + $0x648] sm:$0xff] }
 0x161   :  { %v915_v5 = vld [vmem:[#allocation8 + $0x6e0] sm:$0xff] }
 0x162   :  { %v935_v38 = vld [vmem:[#allocation8 + $0x780] sm:$0xff] }
 0x163   :  { %3855 = vmatpush1.bf16.msra.mxu0 %v4975_v54  ;;  %4019 = vmatpush1.bf16.msra.mxu1 %v4977_v55  ;;  %v5032_v54 = vcombine.high %v895_v45, %v899_v47  ;;  %v5034_v55 = vcombine.high %v896_v48, %v900_v49  ;;  %v939_v6 = vld [vmem:[#allocation8 + $0x7a0] sm:$0xff] }
 0x164   :  { %3856 = vmatprep.subr.bf16.mxu0 %v4984_v56  ;;  %4020 = vmatprep.subr.bf16.mxu1 %v4986_v57  ;;  %v903_v56 = vld [vmem:[#allocation8 + $0x680] sm:$0xff] }
 0x167   :  { %3857 = vmatpush1.bf16.msra.mxu0 %v4983_v62  ;;  %4021 = vmatpush1.bf16.msra.mxu1 %v4985_v63  ;;  %v5031_v63 = vcombine.low %v895_v45, %v899_v47 }
 0x168   :  { %3858 = vmatprep.subr.bf16.mxu0 %v4992_v1  ;;  %4022 = vmatprep.subr.bf16.mxu1 %v4994_v2  ;;  %v5033_v1 = vcombine.low %v896_v48, %v900_v49  ;;  %v5040_v2 = vcombine.high %v903_v56, %v907_v58  ;;  %v943_v48 = vld [vmem:[#allocation8 + $0x7c0] sm:$0xff] }
 0x169   :  { %v947_v49 = vld [vmem:[#allocation8 + $0x7e0] sm:$0xff] }
 0x16b   :  { %3859 = vmatpush1.bf16.msra.mxu0 %v4991_v8  ;;  %4023 = vmatpush1.bf16.msra.mxu1 %v4993_v9  ;;  %v916_v8 = vld [vmem:[#allocation8 + $0x6e8] sm:$0xff]  ;;  %v5039_v9 = vcombine.low %v903_v56, %v907_v58  ;;  %v5071_v56 = vcombine.low %v935_v38, %v939_v6 }
 0x16c   :  { %3860 = vmatprep.subr.bf16.mxu0 %v5000_v10  ;;  %4024 = vmatprep.subr.bf16.mxu1 %v5002_v11  ;;  %v5041_v10 = vcombine.low %v904_v59, %v908_v60  ;;  %v5048_v11 = vcombine.high %v911_v4, %v915_v5  ;;  %v5050_v12 = vcombine.high %v912_v7, %v916_v8 }
 0x16d   :  { %v5080_v59 = vcombine.high %v943_v48, %v947_v49 }
 0x16f   :  { %3861 = vmatpush1.bf16.msra.mxu0 %v4999_v21  ;;  %4025 = vmatpush1.bf16.msra.mxu1 %v5001_v22  ;;  %v924_v21 = vld [vmem:[#allocation8 + $0x728] sm:$0xff]  ;;  %v5047_v22 = vcombine.low %v911_v4, %v915_v5  ;;  %v5079_v4 = vcombine.low %v943_v48, %v947_v49 }
 0x170   :  { %3862 = vmatprep.subr.bf16.mxu0 %v5008_v23  ;;  %4026 = vmatprep.subr.bf16.mxu1 %v5010_v24  ;;  %v5049_v23 = vcombine.low %v912_v7, %v916_v8  ;;  %v5056_v24 = vcombine.high %v919_v17, %v923_v18  ;;  %v5058_v25 = vcombine.high %v920_v19, %v924_v21  ;;  %v959_v8 = vld [vmem:[#allocation8 + $0x840] sm:$0xff] }
 0x171   :  { %v5758_v39 = vpop.f32.mrb[4].mxu0 }
 0x172   :  { %v5760_v40 = vpop.f32.mrb[5].mxu0  ;;  %v5762_v52 = vpop.f32.mrb[4].mxu1 }
 0x173   :  { %3863 = vmatpush1.bf16.msra.mxu0 %v5007_v29  ;;  %4027 = vmatpush1.bf16.msra.mxu1 %v5009_v30  ;;  %v635_v42 = vpop.f32.mrb[6].mxu0  ;;  %v5764_v57 = vpop.f32.mrb[5].mxu1  ;;  %v932_v29 = vld [vmem:[#allocation8 + $0x768] sm:$0xff]  ;;  %v165_v30 = vsub.s32 2, %v5728_v13 }
 0x174   :  { %3864 = vmatprep.subr.bf16.mxu0 %v5016_v31  ;;  %4028 = vmatprep.subr.bf16.mxu1 %v5018_v32  ;;  %v636_v46 = vpop.f32.mrb[7].mxu0  ;;  %v676_v61 = vpop.f32.mrb[6].mxu1  ;;  %v5055_v31 = vcombine.low %v919_v17, %v923_v18  ;;  %v5057_v32 = vcombine.low %v920_v19, %v924_v21  ;;  %v5066_v37 = vcombine.high %v928_v28, %v932_v29  ;;  %v6057_v42 = vsub.s32 5, %v5728_v13 }
 0x175   :  { %v677_v62 = vpop.f32.mrb[7].mxu1  ;;  %v5065_v45 = vcombine.low %v928_v28, %v932_v29  ;;  %v5072_v46 = vcombine.high %v935_v38, %v939_v6  ;;  %v951_v61 = vld [vmem:[#allocation8 + $0x800] sm:$0xff]  ;;  %v980_v38 = vld [vmem:[#allocation8 + $0x8e8] sm:$0xff] }
 0x176   :  { %v955_v62 = vld [vmem:[#allocation8 + $0x820] sm:$0xff] }
 0x177   :  { %3865 = vmatpush1.bf16.msra.mxu0 %v5015_v41  ;;  %4029 = vmatpush1.bf16.msra.mxu1 %v5017_v0  ;;  %v936_v41 = vld [vmem:[#allocation8 + $0x788] sm:$0xff]  ;;  %v5087_v18 = vcombine.low %v951_v61, %v955_v62 }
 0x178   :  { %3866 = vmatprep.subr.bf16.mxu0 %v5024_v43  ;;  %4030 = vmatprep.subr.bf16.mxu1 %v5026_v44  ;;  %v940_v0 = vld [vmem:[#allocation8 + $0x7a8] sm:$0xff]  ;;  %v166_v43 = vrot.slane %v5731_v15, %v165_v30  ;;  %v5063_v44 = vcombine.low %v927_v26, %v931_v27 }
 0x179   :  { %v5074_v47 = vcombine.high %v936_v41, %v940_v0  ;;  %v5073_v58 = vcombine.low %v936_v41, %v940_v0 }
 0x17b   :  { %3867 = vmatpush1.bf16.msra.mxu0 %v5023_v50  ;;  %4031 = vmatpush1.bf16.msra.mxu1 %v5025_v51  ;;  %v944_v50 = vld [vmem:[#allocation8 + $0x7c8] sm:$0xff] }
 0x17c   :  { %3868 = vmatprep.subr.bf16.mxu0 %v5032_v54  ;;  %4032 = vmatprep.subr.bf16.mxu1 %v5034_v55  ;;  %v948_v51 = vld [vmem:[#allocation8 + $0x7e8] sm:$0xff]  ;;  %v178_v54 = vrot.slane %v5731_v15, %v6057_v42  ;;  %v591_v55 = vadd.f32 %v5746_v34, %v166_v43  ;;  %v5088_v34 = vcombine.high %v951_v61, %v955_v62 }
 0x17d   :  { %v5082_v60 = vcombine.high %v944_v50, %v948_v51  ;;  %v5081_v5 = vcombine.low %v944_v50, %v948_v51 }
 0x17f   :  { %3869 = vmatpush1.bf16.msra.mxu0 %v5031_v63  ;;  %4033 = vmatpush1.bf16.msra.mxu1 %v5033_v1  ;;  %v952_v63 = vld [vmem:[#allocation8 + $0x808] sm:$0xff] }
 0x180   :  { %3870 = vmatprep.subr.bf16.mxu0 %v5040_v2  ;;  %4034 = vmatprep.subr.bf16.mxu1 %v5042_v3  ;;  %v956_v1 = vld [vmem:[#allocation8 + $0x828] sm:$0xff]  ;;  %v634_v2 = vadd.f32 %v5760_v40, %v178_v54  ;;  %v681_v3 = vmax.f32 %v591_v55, 0.0  ;;  %v991_v54 = vld [vmem:[#allocation8 + $0x940] sm:$0xff] }
 0x181   :  { %v5090_v7 = vcombine.high %v952_v63, %v956_v1  ;;  %v5089_v40 = vcombine.low %v952_v63, %v956_v1  ;;  %v995_v55 = vld [vmem:[#allocation8 + $0x960] sm:$0xff] }
 0x182   :  { %v5776_v17 = vpack.c.bf16 %v681_v3, %v681_v3  ;;  %v5128_v61 = vcombine.high %v991_v54, %v995_v55  ;;  %v999_v63 = vld [vmem:[#allocation8 + $0x980] sm:$0xff]  ;;  %v1004_v3 = vld [vmem:[#allocation8 + $0x9a8] sm:$0xff] }
 0x183   :  { %3871 = vmatpush1.bf16.msra.mxu0 %v5039_v9  ;;  %4035 = vmatpush1.bf16.msra.mxu1 %v5041_v10  ;;  %v963_v9 = vld [vmem:[#allocation8 + $0x860] sm:$0xff]  ;;  %v960_v10 = vld [vmem:[#allocation8 + $0x848] sm:$0xff] }
 0x184   :  { %3872 = vmatprep.subr.bf16.mxu0 %v5048_v11  ;;  %4036 = vmatprep.subr.bf16.mxu1 %v5050_v12  ;;  %v964_v11 = vld [vmem:[#allocation8 + $0x868] sm:$0xff]  ;;  %v684_v12 = vmax.f32 %v634_v2, 0.0  ;;  %v5096_v19 = vcombine.high %v959_v8, %v963_v9  ;;  %v5095_v27 = vcombine.low %v959_v8, %v963_v9  ;;  %v1003_v1 = vld [vmem:[#allocation8 + $0x9a0] sm:$0xff] }
 0x185   :  { %v5098_v21 = vcombine.high %v960_v10, %v964_v11  ;;  %v5097_v28 = vcombine.low %v960_v10, %v964_v11  ;;  %v1000_v2 = vld [vmem:[#allocation8 + $0x988] sm:$0xff]  ;;  %v1007_v8 = vld [vmem:[#allocation8 + $0x9c0] sm:$0xff] }
 0x186   :  { %v5778_v26 = vpack.c.bf16 %v684_v12, %v684_v12  ;;  %v1011_v9 = vld [vmem:[#allocation8 + $0x9e0] sm:$0xff]  ;;  %v1008_v10 = vld [vmem:[#allocation8 + $0x9c8] sm:$0xff]  ;;  %v5135_v12 = vcombine.low %v999_v63, %v1003_v1 }
 0x187   :  { %3873 = vmatpush1.bf16.msra.mxu0 %v5047_v22  ;;  %4037 = vmatpush1.bf16.msra.mxu1 %v5049_v23  ;;  %v967_v22 = vld [vmem:[#allocation8 + $0x880] sm:$0xff]  ;;  %v1012_v11 = vld [vmem:[#allocation8 + $0x9e8] sm:$0xff] }
 0x188   :  { %3874 = vmatprep.subr.bf16.mxu0 %v5056_v24  ;;  %4038 = vmatprep.subr.bf16.mxu1 %v5058_v25  ;;  %v971_v23 = vld [vmem:[#allocation8 + $0x8a0] sm:$0xff]  ;;  %v968_v24 = vld [vmem:[#allocation8 + $0x888] sm:$0xff] }
 0x189   :  { %v972_v25 = vld [vmem:[#allocation8 + $0x8a8] sm:$0xff]  ;;  %v5104_v29 = vcombine.high %v967_v22, %v971_v23  ;;  %v5103_v6 = vcombine.low %v967_v22, %v971_v23  ;;  %v1019_v22 = vld [vmem:[#allocation8 + $0xa20] sm:$0xff] }
 0x18a   :  { %v5105_v41 = vcombine.low %v968_v24, %v972_v25  ;;  %v1016_v23 = vld [vmem:[#allocation8 + $0xa08] sm:$0xff] }
 0x18b   :  { %3875 = vmatpush1.bf16.msra.mxu0 %v5055_v31  ;;  %4039 = vmatpush1.bf16.msra.mxu1 %v5057_v32  ;;  %v5106_v31 = vcombine.high %v968_v24, %v972_v25  ;;  %v975_v32 = vld [vmem:[#allocation8 + $0x8c0] sm:$0xff]  ;;  %v1020_v24 = vld [vmem:[#allocation8 + $0xa28] sm:$0xff]  ;;  %v5143_v25 = vcombine.low %v1007_v8, %v1011_v9 }
 0x18c   :  { %3876 = vmatprep.subr.bf16.mxu0 %v5064_v36  ;;  %4040 = vmatprep.subr.bf16.mxu1 %v5066_v37  ;;  %v979_v36 = vld [vmem:[#allocation8 + $0x8e0] sm:$0xff]  ;;  %v976_v37 = vld [vmem:[#allocation8 + $0x8c8] sm:$0xff] }
 0x18d   :  { %v5112_v0 = vcombine.high %v975_v32, %v979_v36  ;;  %v5114_v43 = vcombine.high %v976_v37, %v980_v38  ;;  %v5111_v48 = vcombine.low %v975_v32, %v979_v36  ;;  %v5113_v49 = vcombine.low %v976_v37, %v980_v38  ;;  %v1027_v32 = vld [vmem:[#allocation8 + $0xa60] sm:$0xff]  ;;  %v1024_v36 = vld [vmem:[#allocation8 + $0xa48] sm:$0xff] }
 0x18e   :  { %v1028_v37 = vld [vmem:[#allocation8 + $0xa68] sm:$0xff] }
 0x18f   :  { %3877 = vmatpush1.bf16.msra.mxu0 %v5063_v44  ;;  %4041 = vmatpush1.bf16.msra.mxu1 %v5065_v45  ;;  %v983_v44 = vld [vmem:[#allocation8 + $0x900] sm:$0xff] }
 0x190   :  { %3878 = vmatprep.subr.bf16.mxu0 %v5072_v46  ;;  %4042 = vmatprep.subr.bf16.mxu1 %v5074_v47  ;;  %v987_v45 = vld [vmem:[#allocation8 + $0x920] sm:$0xff]  ;;  %v984_v46 = vld [vmem:[#allocation8 + $0x908] sm:$0xff] }
 0x191   :  { %v988_v47 = vld [vmem:[#allocation8 + $0x928] sm:$0xff]  ;;  %v5120_v50 = vcombine.high %v983_v44, %v987_v45 }
 0x192   :  { %v5122_v51 = vcombine.high %v984_v46, %v988_v47 }
 0x193   :  { %3879 = vmatpush1.bf16.msra.mxu0 %v5071_v56  ;;  %4043 = vmatpush1.bf16.msra.mxu1 %v5073_v58  ;;  %v992_v56 = vld [vmem:[#allocation8 + $0x948] sm:$0xff] }
 0x194   :  { %3880 = vmatprep.subr.bf16.mxu0 %v5080_v59  ;;  %4044 = vmatprep.subr.bf16.mxu1 %v5082_v60  ;;  %v996_v58 = vld [vmem:[#allocation8 + $0x968] sm:$0xff]  ;;  %v5119_v59 = vcombine.low %v983_v44, %v987_v45  ;;  %v5121_v60 = vcombine.low %v984_v46, %v988_v47  ;;  %v1035_v44 = vld [vmem:[#allocation8 + $0xaa0] sm:$0xff] }
 0x195   :  { %v5130_v62 = vcombine.high %v992_v56, %v996_v58  ;;  %v1032_v45 = vld [vmem:[#allocation8 + $0xa88] sm:$0xff] }
 0x196   :  { %v1036_v46 = vld [vmem:[#allocation8 + $0xaa8] sm:$0xff] }
 0x197   :  { %3881 = vmatpush1.bf16.msra.mxu0 %v5079_v4  ;;  %4045 = vmatpush1.bf16.msra.mxu1 %v5081_v5  ;;  %v5127_v4 = vcombine.low %v991_v54, %v995_v55  ;;  %v5129_v5 = vcombine.low %v992_v56, %v996_v58  ;;  %v1043_v54 = vld [vmem:[#allocation8 + $0xae0] sm:$0xff]  ;;  %v1040_v55 = vld [vmem:[#allocation8 + $0xac8] sm:$0xff] }
 0x198   :  { %3891 = vmatprep.subr.bf16.mxu0 %v5088_v34  ;;  %4055 = vmatprep.subr.bf16.mxu1 %v5090_v7  ;;  %v5136_v34 = vcombine.high %v999_v63, %v1003_v1  ;;  %v5138_v7 = vcombine.high %v1000_v2, %v1004_v3  ;;  %v1044_v56 = vld [vmem:[#allocation8 + $0xae8] sm:$0xff]  ;;  %v1051_v63 = vld [vmem:[#allocation8 + $0xb20] sm:$0xff] }
 0x199   :  { %v1048_v1 = vld [vmem:[#allocation8 + $0xb08] sm:$0xff] }
 0x19a   :  { %3883 = vmatmul.mubr.bf16.vlgmr.msra.gmra.mrb[8].mxu0 %v5776_v17  ;;  %4047 = vmatmul.mubr.bf16.vlgmr.msra.gmra.mrb[8].mxu1 %v5776_v17 }
 0x19b   :  { %3892 = vmatpush1.bf16.msra.mxu0 %v5087_v18  ;;  %4056 = vmatpush1.bf16.msra.mxu1 %v5089_v40  ;;  %v5137_v18 = vcombine.low %v1000_v2, %v1004_v3  ;;  %v5144_v40 = vcombine.high %v1007_v8, %v1011_v9  ;;  %v1052_v2 = vld [vmem:[#allocation8 + $0xb28] sm:$0xff]  ;;  %v1059_v8 = vld [vmem:[#allocation8 + $0xb60] sm:$0xff] }
 0x19c   :  { %3893 = vmatprep.subr.bf16.mxu0 %v5096_v19  ;;  %4057 = vmatprep.subr.bf16.mxu1 %v5098_v21  ;;  %v5146_v19 = vcombine.high %v1008_v10, %v1012_v11  ;;  %v1015_v21 = vld [vmem:[#allocation8 + $0xa00] sm:$0xff]  ;;  %v1056_v9 = vld [vmem:[#allocation8 + $0xb48] sm:$0xff] }
 0x19d   :  { %3923 = vmatprep.mubr.bf16.mxu0 %v5778_v26  ;;  %4087 = vmatprep.mubr.bf16.mxu1 %v5778_v26  ;;  %v5151_v38 = vcombine.low %v1015_v21, %v1019_v22 }
 0x19f   :  { %3894 = vmatpush1.bf16.msra.mxu0 %v5095_v27  ;;  %4058 = vmatpush1.bf16.msra.mxu1 %v5097_v28  ;;  %v5145_v27 = vcombine.low %v1008_v10, %v1012_v11  ;;  %v5152_v28 = vcombine.high %v1015_v21, %v1019_v22  ;;  %v1060_v10 = vld [vmem:[#allocation8 + $0xb68] sm:$0xff]  ;;  %v173_v11 = vsub.s32 4, %v5728_v13  ;;  %v1063_v21 = vld [vmem:[#allocation8 + $0xb80] sm:$0xff] }
 0x1a0   :  { %3895 = vmatprep.subr.bf16.mxu0 %v5104_v29  ;;  %4059 = vmatprep.subr.bf16.mxu1 %v5106_v31  ;;  %v5154_v29 = vcombine.high %v1016_v23, %v1020_v24  ;;  %v1023_v31 = vld [vmem:[#allocation8 + $0xa40] sm:$0xff] }
 0x1a1   :  { %v5159_v47 = vcombine.low %v1023_v31, %v1027_v32  ;;  %v1067_v22 = vld [vmem:[#allocation8 + $0xba0] sm:$0xff] }
 0x1a3   :  { %3896 = vmatpush1.bf16.msra.mxu0 %v5103_v6  ;;  %4060 = vmatpush1.bf16.msra.mxu1 %v5105_v41  ;;  %v5153_v6 = vcombine.low %v1016_v23, %v1020_v24  ;;  %v5160_v41 = vcombine.high %v1023_v31, %v1027_v32  ;;  %v1064_v23 = vld [vmem:[#allocation8 + $0xb88] sm:$0xff]  ;;  %v5200_v31 = vcombine.high %v1063_v21, %v1067_v22 }
 0x1a4   :  { %3897 = vmatprep.subr.bf16.mxu0 %v5112_v0  ;;  %4061 = vmatprep.subr.bf16.mxu1 %v5114_v43  ;;  %v5162_v0 = vcombine.high %v1024_v36, %v1028_v37  ;;  %v1031_v43 = vld [vmem:[#allocation8 + $0xa80] sm:$0xff]  ;;  %v1068_v24 = vld [vmem:[#allocation8 + $0xba8] sm:$0xff] }
 0x1a5   :  { %v5167_v58 = vcombine.low %v1031_v43, %v1035_v44  ;;  %v5202_v32 = vcombine.high %v1064_v23, %v1068_v24 }
 0x1a7   :  { %3898 = vmatpush1.bf16.msra.mxu0 %v5111_v48  ;;  %4062 = vmatpush1.bf16.msra.mxu1 %v5113_v49  ;;  %v5161_v48 = vcombine.low %v1024_v36, %v1028_v37  ;;  %v5168_v49 = vcombine.high %v1031_v43, %v1035_v44  ;;  %v1071_v36 = vld [vmem:[#allocation8 + $0xbc0] sm:$0xff]  ;;  %v5199_v43 = vcombine.low %v1063_v21, %v1067_v22  ;;  %v1104_v21 = vld [vmem:[#allocation8 + $0xcc8] sm:$0xff] }
 0x1a8   :  { %3899 = vmatprep.subr.bf16.mxu0 %v5120_v50  ;;  %4063 = vmatprep.subr.bf16.mxu1 %v5122_v51  ;;  %v5170_v50 = vcombine.high %v1032_v45, %v1036_v46  ;;  %v1039_v51 = vld [vmem:[#allocation8 + $0xac0] sm:$0xff]  ;;  %v5201_v44 = vcombine.low %v1064_v23, %v1068_v24  ;;  %v1108_v22 = vld [vmem:[#allocation8 + $0xce8] sm:$0xff] }
 0x1a9   :  { %v5175_v3 = vcombine.low %v1039_v51, %v1043_v54  ;;  %v1075_v37 = vld [vmem:[#allocation8 + $0xbe0] sm:$0xff] }
 0x1ab   :  { %3900 = vmatpush1.bf16.msra.mxu0 %v5119_v59  ;;  %4064 = vmatpush1.bf16.msra.mxu1 %v5121_v60  ;;  %v5169_v59 = vcombine.low %v1032_v45, %v1036_v46  ;;  %v5176_v60 = vcombine.high %v1039_v51, %v1043_v54  ;;  %v5208_v45 = vcombine.high %v1071_v36, %v1075_v37 }
 0x1ac   :  { %3901 = vmatprep.subr.bf16.mxu0 %v5128_v61  ;;  %4065 = vmatprep.subr.bf16.mxu1 %v5130_v62  ;;  %v5178_v61 = vcombine.high %v1040_v55, %v1044_v56  ;;  %v1047_v62 = vld [vmem:[#allocation8 + $0xb00] sm:$0xff] }
 0x1af   :  { %3902 = vmatpush1.bf16.msra.mxu0 %v5127_v4  ;;  %4066 = vmatpush1.bf16.msra.mxu1 %v5129_v5  ;;  %v5177_v4 = vcombine.low %v1040_v55, %v1044_v56  ;;  %v5184_v5 = vcombine.high %v1047_v62, %v1051_v63 }
 0x1b0   :  { %3903 = vmatprep.subr.bf16.mxu0 %v5136_v34  ;;  %4067 = vmatprep.subr.bf16.mxu1 %v5138_v7  ;;  %v5186_v34 = vcombine.high %v1048_v1, %v1052_v2  ;;  %v1055_v7 = vld [vmem:[#allocation8 + $0xb40] sm:$0xff] }
 0x1b3   :  { %3904 = vmatpush1.bf16.msra.mxu0 %v5135_v12  ;;  %4068 = vmatpush1.bf16.msra.mxu1 %v5137_v18  ;;  %v5183_v12 = vcombine.low %v1047_v62, %v1051_v63  ;;  %v5185_v18 = vcombine.low %v1048_v1, %v1052_v2 }
 0x1b4   :  { %3905 = vmatprep.subr.bf16.mxu0 %v5144_v40  ;;  %4069 = vmatprep.subr.bf16.mxu1 %v5146_v19  ;;  %v5192_v40 = vcombine.high %v1055_v7, %v1059_v8  ;;  %v5194_v19 = vcombine.high %v1056_v9, %v1060_v10 }
 0x1b7   :  { %3906 = vmatpush1.bf16.msra.mxu0 %v5143_v25  ;;  %4070 = vmatpush1.bf16.msra.mxu1 %v5145_v27  ;;  %v6056_v25 = vsub.s32 7, %v5728_v13  ;;  %v174_v27 = vrot.slane %v5731_v15, %v173_v11 }
 0x1b8   :  { %3907 = vmatprep.subr.bf16.mxu0 %v5152_v28  ;;  %4071 = vmatprep.subr.bf16.mxu1 %v5154_v29  ;;  %v5191_v28 = vcombine.low %v1055_v7, %v1059_v8  ;;  %v5193_v29 = vcombine.low %v1056_v9, %v1060_v10  ;;  %v1100_v7 = vld [vmem:[#allocation8 + $0xca8] sm:$0xff] }
 0x1bb   :  { %3908 = vmatpush1.bf16.msra.mxu0 %v5151_v38  ;;  %4072 = vmatpush1.bf16.msra.mxu1 %v5153_v6  ;;  %v1072_v38 = vld [vmem:[#allocation8 + $0xbc8] sm:$0xff] }
 0x1bc   :  { %3909 = vmatprep.subr.bf16.mxu0 %v5160_v41  ;;  %4073 = vmatprep.subr.bf16.mxu1 %v5162_v0  ;;  %v1076_v6 = vld [vmem:[#allocation8 + $0xbe8] sm:$0xff]  ;;  %v186_v41 = vrot.slane %v5731_v15, %v6056_v25  ;;  %v632_v0 = vadd.f32 %v5758_v39, %v174_v27  ;;  %v5207_v15 = vcombine.low %v1071_v36, %v1075_v37 }
 0x1bd   :  { %v5210_v46 = vcombine.high %v1072_v38, %v1076_v6  ;;  %v5209_v55 = vcombine.low %v1072_v38, %v1076_v6  ;;  %v1116_v36 = vld [vmem:[#allocation8 + $0xd28] sm:$0xff]  ;;  %v5241_v38 = vcombine.low %v1104_v21, %v1108_v22 }
 0x1be   :  { %v675_v51 = vadd.f32 %v5764_v57, %v186_v41  ;;  %v683_v54 = vmax.f32 %v632_v0, 0.0  ;;  %v1119_v0 = vld [vmem:[#allocation8 + $0xd40] sm:$0xff] }
 0x1bf   :  { %3910 = vmatpush1.bf16.msra.mxu0 %v5159_v47  ;;  %4074 = vmatpush1.bf16.msra.mxu1 %v5161_v48  ;;  %v1079_v47 = vld [vmem:[#allocation8 + $0xc00] sm:$0xff] }
 0x1c0   :  { %3911 = vmatprep.subr.bf16.mxu0 %v5168_v49  ;;  %4075 = vmatprep.subr.bf16.mxu1 %v5170_v50  ;;  %v1083_v48 = vld [vmem:[#allocation8 + $0xc20] sm:$0xff]  ;;  %v1080_v49 = vld [vmem:[#allocation8 + $0xc08] sm:$0xff]  ;;  %v686_v62 = vmax.f32 %v675_v51, 0.0  ;;  %v5794_v63 = vpack.c.bf16 %v683_v54, %v683_v54 }
 0x1c1   :  { %v1084_v50 = vld [vmem:[#allocation8 + $0xc28] sm:$0xff]  ;;  %v5216_v39 = vcombine.high %v1079_v47, %v1083_v48  ;;  %v5215_v1 = vcombine.low %v1079_v47, %v1083_v48  ;;  %v1131_v51 = vld [vmem:[#allocation8 + $0xda0] sm:$0xff] }
 0x1c2   :  { %v5218_v56 = vcombine.high %v1080_v49, %v1084_v50  ;;  %v5217_v57 = vcombine.low %v1080_v49, %v1084_v50  ;;  %v5796_v8 = vpack.c.bf16 %v686_v62, %v686_v62  ;;  %v1127_v50 = vld [vmem:[#allocation8 + $0xd80] sm:$0xff]  ;;  %v1128_v54 = vld [vmem:[#allocation8 + $0xd88] sm:$0xff] }
 0x1c3   :  { %3912 = vmatpush1.bf16.msra.mxu0 %v5167_v58  ;;  %4076 = vmatpush1.bf16.msra.mxu1 %v5169_v59  ;;  %v1087_v58 = vld [vmem:[#allocation8 + $0xc40] sm:$0xff]  ;;  %v1140_v62 = vld [vmem:[#allocation8 + $0xde8] sm:$0xff] }
 0x1c4   :  { %3913 = vmatprep.subr.bf16.mxu0 %v5176_v60  ;;  %4077 = vmatprep.subr.bf16.mxu1 %v5178_v61  ;;  %v1091_v59 = vld [vmem:[#allocation8 + $0xc60] sm:$0xff]  ;;  %v1088_v60 = vld [vmem:[#allocation8 + $0xc48] sm:$0xff] }
 0x1c5   :  { %v1092_v61 = vld [vmem:[#allocation8 + $0xc68] sm:$0xff]  ;;  %v5224_v2 = vcombine.high %v1087_v58, %v1091_v59  ;;  %v5223_v9 = vcombine.low %v1087_v58, %v1091_v59  ;;  %v1135_v59 = vld [vmem:[#allocation8 + $0xdc0] sm:$0xff] }
 0x1c6   :  { %v5225_v10 = vcombine.low %v1088_v60, %v1092_v61 }
 0x1c7   :  { %3914 = vmatpush1.bf16.msra.mxu0 %v5175_v3  ;;  %4078 = vmatpush1.bf16.msra.mxu1 %v5177_v4  ;;  %v5226_v3 = vcombine.high %v1088_v60, %v1092_v61  ;;  %v1095_v4 = vld [vmem:[#allocation8 + $0xc80] sm:$0xff]  ;;  %v1136_v61 = vld [vmem:[#allocation8 + $0xdc8] sm:$0xff] }
 0x1c8   :  { %3915 = vmatprep.subr.bf16.mxu0 %v5184_v5  ;;  %4079 = vmatprep.subr.bf16.mxu1 %v5186_v34  ;;  %v1099_v5 = vld [vmem:[#allocation8 + $0xca0] sm:$0xff]  ;;  %v1096_v34 = vld [vmem:[#allocation8 + $0xc88] sm:$0xff] }
 0x1c9   :  { %v5231_v23 = vcombine.low %v1095_v4, %v1099_v5  ;;  %v5233_v24 = vcombine.low %v1096_v34, %v1100_v7  ;;  %v1139_v60 = vld [vmem:[#allocation8 + $0xde0] sm:$0xff] }
 0x1cb   :  { %3916 = vmatpush1.bf16.msra.mxu0 %v5183_v12  ;;  %4080 = vmatpush1.bf16.msra.mxu1 %v5185_v18  ;;  %v5232_v12 = vcombine.high %v1095_v4, %v1099_v5  ;;  %v5234_v18 = vcombine.high %v1096_v34, %v1100_v7  ;;  %v1143_v4 = vld [vmem:[#allocation8 + $0xe00] sm:$0xff]  ;;  %v1144_v34 = vld [vmem:[#allocation8 + $0xe08] sm:$0xff] }
 0x1cc   :  { %3917 = vmatprep.subr.bf16.mxu0 %v5192_v40  ;;  %4081 = vmatprep.subr.bf16.mxu1 %v5194_v19  ;;  %v1103_v40 = vld [vmem:[#allocation8 + $0xcc0] sm:$0xff]  ;;  %v1148_v7 = vld [vmem:[#allocation8 + $0xe28] sm:$0xff] }
 0x1cd   :  { %v1107_v19 = vld [vmem:[#allocation8 + $0xce0] sm:$0xff] }
 0x1ce   :  { %v5240_v27 = vcombine.high %v1103_v40, %v1107_v19  ;;  %v5239_v37 = vcombine.low %v1103_v40, %v1107_v19  ;;  %v1147_v5 = vld [vmem:[#allocation8 + $0xe20] sm:$0xff] }
 0x1cf   :  { %3918 = vmatpush1.bf16.msra.mxu0 %v5191_v28  ;;  %4082 = vmatpush1.bf16.msra.mxu1 %v5193_v29  ;;  %v5242_v28 = vcombine.high %v1104_v21, %v1108_v22  ;;  %v1111_v29 = vld [vmem:[#allocation8 + $0xd00] sm:$0xff]  ;;  %v1152_v21 = vld [vmem:[#allocation8 + $0xe48] sm:$0xff] }
 0x1d0   :  { %3919 = vmatprep.subr.bf16.mxu0 %v5200_v31  ;;  %4083 = vmatprep.subr.bf16.mxu1 %v5202_v32  ;;  %v1115_v31 = vld [vmem:[#allocation8 + $0xd20] sm:$0xff]  ;;  %v1112_v32 = vld [vmem:[#allocation8 + $0xd08] sm:$0xff] }
 0x1d1   :  { %v5248_v6 = vcombine.high %v1111_v29, %v1115_v31  ;;  %v5250_v41 = vcombine.high %v1112_v32, %v1116_v36  ;;  %v5249_v47 = vcombine.low %v1112_v32, %v1116_v36  ;;  %v1151_v40 = vld [vmem:[#allocation8 + $0xe40] sm:$0xff]  ;;  %v1156_v22 = vld [vmem:[#allocation8 + $0xe68] sm:$0xff] }
 0x1d2   :  { %v1155_v19 = vld [vmem:[#allocation8 + $0xe60] sm:$0xff]  ;;  %v1160_v32 = vld [vmem:[#allocation8 + $0xe88] sm:$0xff] }
 0x1d3   :  { %3920 = vmatpush1.bf16.msra.mxu0 %v5199_v43  ;;  %4084 = vmatpush1.bf16.msra.mxu1 %v5201_v44  ;;  %v1123_v43 = vld [vmem:[#allocation8 + $0xd60] sm:$0xff]  ;;  %v1120_v44 = vld [vmem:[#allocation8 + $0xd48] sm:$0xff] }
 0x1d4   :  { %3921 = vmatprep.subr.bf16.mxu0 %v5208_v45  ;;  %4085 = vmatprep.subr.bf16.mxu1 %v5210_v46  ;;  %v1124_v45 = vld [vmem:[#allocation8 + $0xd68] sm:$0xff]  ;;  %v5247_v46 = vcombine.low %v1111_v29, %v1115_v31  ;;  %v5256_v48 = vcombine.high %v1119_v0, %v1123_v43  ;;  %v1159_v29 = vld [vmem:[#allocation8 + $0xe80] sm:$0xff] }
 0x1d5   :  { %v5258_v49 = vcombine.high %v1120_v44, %v1124_v45  ;;  %v1163_v31 = vld [vmem:[#allocation8 + $0xea0] sm:$0xff]  ;;  %v1164_v36 = vld [vmem:[#allocation8 + $0xea8] sm:$0xff] }
 0x1d7   :  { %3922 = vmatpush1.bf16.msra.mxu0 %v5207_v15  ;;  %4086 = vmatpush1.bf16.msra.mxu1 %v5209_v55  ;;  %v1132_v15 = vld [vmem:[#allocation8 + $0xda8] sm:$0xff]  ;;  %v5255_v55 = vcombine.low %v1119_v0, %v1123_v43  ;;  %v1167_v0 = vld [vmem:[#allocation8 + $0xec0] sm:$0xff] }
 0x1d8   :  { %3932 = vmatprep.subr.bf16.mxu0 %v5216_v39  ;;  %4096 = vmatprep.subr.bf16.mxu1 %v5218_v56  ;;  %v5257_v39 = vcombine.low %v1120_v44, %v1124_v45  ;;  %v5264_v56 = vcombine.high %v1127_v50, %v1131_v51  ;;  %v5266_v58 = vcombine.high %v1128_v54, %v1132_v15  ;;  %v1171_v43 = vld [vmem:[#allocation8 + $0xee0] sm:$0xff]  ;;  %v1168_v44 = vld [vmem:[#allocation8 + $0xec8] sm:$0xff] }
 0x1d9   :  { %v1172_v45 = vld [vmem:[#allocation8 + $0xee8] sm:$0xff] }
 0x1da   :  { %3924 = vmatmul.mubr.bf16.vlgmr.msra.gmra.mrb[8].mxu0 %v5794_v63  ;;  %4088 = vmatmul.mubr.bf16.vlgmr.msra.gmra.mrb[8].mxu1 %v5794_v63 }
 0x1db   :  { %3933 = vmatpush1.bf16.msra.mxu0 %v5215_v1  ;;  %4097 = vmatpush1.bf16.msra.mxu1 %v5217_v57  ;;  %v5263_v1 = vcombine.low %v1127_v50, %v1131_v51  ;;  %v5265_v57 = vcombine.low %v1128_v54, %v1132_v15  ;;  %v1175_v50 = vld [vmem:[#allocation8 + $0xf00] sm:$0xff]  ;;  %v1176_v54 = vld [vmem:[#allocation8 + $0xf08] sm:$0xff] }
 0x1dc   :  { %3934 = vmatprep.subr.bf16.mxu0 %v5224_v2  ;;  %4098 = vmatprep.subr.bf16.mxu1 %v5226_v3  ;;  %v5272_v2 = vcombine.high %v1135_v59, %v1139_v60  ;;  %v5274_v3 = vcombine.high %v1136_v61, %v1140_v62  ;;  %v1179_v51 = vld [vmem:[#allocation8 + $0xf20] sm:$0xff]  ;;  %v1180_v15 = vld [vmem:[#allocation8 + $0xf28] sm:$0xff] }
 0x1dd   :  { %3964 = vmatprep.mubr.bf16.mxu0 %v5796_v8  ;;  %4128 = vmatprep.mubr.bf16.mxu1 %v5796_v8 }
 0x1df   :  { %3935 = vmatpush1.bf16.msra.mxu0 %v5223_v9  ;;  %4099 = vmatpush1.bf16.msra.mxu1 %v5225_v10  ;;  %v5271_v9 = vcombine.low %v1135_v59, %v1139_v60  ;;  %v5273_v10 = vcombine.low %v1136_v61, %v1140_v62  ;;  %v1183_v59 = vld [vmem:[#allocation8 + $0xf40] sm:$0xff]  ;;  %v1184_v61 = vld [vmem:[#allocation8 + $0xf48] sm:$0xff] }
 0x1e0   :  { %3936 = vmatprep.subr.bf16.mxu0 %v5232_v12  ;;  %4100 = vmatprep.subr.bf16.mxu1 %v5234_v18  ;;  %v5280_v12 = vcombine.high %v1143_v4, %v1147_v5  ;;  %v5282_v18 = vcombine.high %v1144_v34, %v1148_v7  ;;  %v1187_v60 = vld [vmem:[#allocation8 + $0xf60] sm:$0xff]  ;;  %v1188_v62 = vld [vmem:[#allocation8 + $0xf68] sm:$0xff] }
 0x1e3   :  { %3937 = vmatpush1.bf16.msra.mxu0 %v5231_v23  ;;  %4101 = vmatpush1.bf16.msra.mxu1 %v5233_v24  ;;  %v5279_v23 = vcombine.low %v1143_v4, %v1147_v5  ;;  %v5281_v24 = vcombine.low %v1144_v34, %v1148_v7  ;;  %v5322_v4 = vcombine.high %v1184_v61, %v1188_v62  ;;  %v1191_v5 = vld [vmem:[#allocation8 + $0xf80] sm:$0xff]  ;;  %v1192_v7 = vld [vmem:[#allocation8 + $0xf88] sm:$0xff] }
 0x1e4   :  { %3938 = vmatprep.subr.bf16.mxu0 %v5240_v27  ;;  %4102 = vmatprep.subr.bf16.mxu1 %v5242_v28  ;;  %v5288_v27 = vcombine.high %v1151_v40, %v1155_v19  ;;  %v5290_v28 = vcombine.high %v1152_v21, %v1156_v22  ;;  %v1195_v34 = vld [vmem:[#allocation8 + $0xfa0] sm:$0xff] }
 0x1e7   :  { %3939 = vmatpush1.bf16.msra.mxu0 %v5239_v37  ;;  %4103 = vmatpush1.bf16.msra.mxu1 %v5241_v38  ;;  %v5287_v37 = vcombine.low %v1151_v40, %v1155_v19  ;;  %v5289_v38 = vcombine.low %v1152_v21, %v1156_v22  ;;  %v5328_v19 = vcombine.high %v1191_v5, %v1195_v34  ;;  %v1199_v22 = vld [vmem:[#allocation8 + $0xfc0] sm:$0xff] }
 0x1e8   :  { %3940 = vmatprep.subr.bf16.mxu0 %v5248_v6  ;;  %4104 = vmatprep.subr.bf16.mxu1 %v5250_v41  ;;  %v5296_v6 = vcombine.high %v1159_v29, %v1163_v31  ;;  %v5298_v41 = vcombine.high %v1160_v32, %v1164_v36 }
 0x1eb   :  { %3941 = vmatpush1.bf16.msra.mxu0 %v5247_v46  ;;  %4105 = vmatpush1.bf16.msra.mxu1 %v5249_v47  ;;  %v5295_v46 = vcombine.low %v1159_v29, %v1163_v31  ;;  %v5297_v47 = vcombine.low %v1160_v32, %v1164_v36 }
 0x1ec   :  { %3942 = vmatprep.subr.bf16.mxu0 %v5256_v48  ;;  %4106 = vmatprep.subr.bf16.mxu1 %v5258_v49  ;;  %v5304_v48 = vcombine.high %v1167_v0, %v1171_v43  ;;  %v5306_v49 = vcombine.high %v1168_v44, %v1172_v45 }
 0x1ef   :  { %3943 = vmatpush1.bf16.msra.mxu0 %v5255_v55  ;;  %4107 = vmatpush1.bf16.msra.mxu1 %v5257_v39  ;;  %v5303_v55 = vcombine.low %v1167_v0, %v1171_v43  ;;  %v5305_v39 = vcombine.low %v1168_v44, %v1172_v45 }
 0x1f0   :  { %3944 = vmatprep.subr.bf16.mxu0 %v5264_v56  ;;  %4108 = vmatprep.subr.bf16.mxu1 %v5266_v58  ;;  %v5312_v56 = vcombine.high %v1175_v50, %v1179_v51  ;;  %v5314_v58 = vcombine.high %v1176_v54, %v1180_v15 }
 0x1f3   :  { %3945 = vmatpush1.bf16.msra.mxu0 %v5263_v1  ;;  %4109 = vmatpush1.bf16.msra.mxu1 %v5265_v57  ;;  %v5311_v1 = vcombine.low %v1175_v50, %v1179_v51  ;;  %v5313_v57 = vcombine.low %v1176_v54, %v1180_v15 }
 0x1f4   :  { %3946 = vmatprep.subr.bf16.mxu0 %v5272_v2  ;;  %4110 = vmatprep.subr.bf16.mxu1 %v5274_v3  ;;  %v181_v2 = vsub.s32 6, %v5728_v13  ;;  %v5320_v3 = vcombine.high %v1183_v59, %v1187_v60 }
 0x1f7   :  { %3947 = vmatpush1.bf16.msra.mxu0 %v5271_v9  ;;  %4111 = vmatpush1.bf16.msra.mxu1 %v5273_v10  ;;  %v1196_v9 = vld [vmem:[#allocation8 + $0xfa8] sm:$0xff]  ;;  %v5319_v10 = vcombine.low %v1183_v59, %v1187_v60  ;;  %v718_v59 = vld [vmem:[#allocation8 + $0xb8] sm:$0xff] }
 0x1f8   :  { %3948 = vmatprep.subr.bf16.mxu0 %v5280_v12  ;;  %4112 = vmatprep.subr.bf16.mxu1 %v5282_v18  ;;  %v5321_v12 = vcombine.low %v1184_v61, %v1188_v62  ;;  %v5419_v18 = vld [vmem:[#allocation7] sm:$0xff]  ;;  %v5330_v21 = vcombine.high %v1192_v7, %v1196_v9  ;;  %v5329_v29 = vcombine.low %v1192_v7, %v1196_v9 }
 0x1f9   :  { %v182_v40 = vrot.slane %v5419_v18, %v181_v2  ;;  %v733_v18 = vld [vmem:[#allocation8 + $0x130] sm:$0xff] }
 0x1fb   :  { %3949 = vmatpush1.bf16.msra.mxu0 %v5279_v23  ;;  %4113 = vmatpush1.bf16.msra.mxu1 %v5281_v24  ;;  %v1203_v23 = vld [vmem:[#allocation8 + $0xfe0] sm:$0xff]  ;;  %v1200_v24 = vld [vmem:[#allocation8 + $0xfc8] sm:$0xff]  ;;  %v673_v31 = vadd.f32 %v5762_v52, %v182_v40  ;;  %v706_v52 = vld [vmem:[#allocation8 + $0x58] sm:$0xff] }
 0x1fc   :  { %3950 = vmatprep.subr.bf16.mxu0 %v5288_v27  ;;  %4114 = vmatprep.subr.bf16.mxu1 %v5290_v28  ;;  %v1204_v27 = vld [vmem:[#allocation8 + $0xfe8] sm:$0xff]  ;;  %v5327_v28 = vcombine.low %v1191_v5, %v1195_v34  ;;  %v5336_v32 = vcombine.high %v1199_v22, %v1203_v23  ;;  %v5335_v0 = vcombine.low %v1199_v22, %v1203_v23  ;;  %v726_v5 = vld [vmem:[#allocation8 + $0xf8] sm:$0xff] }
 0x1fd   :  { %v5338_v36 = vcombine.high %v1200_v24, %v1204_v27  ;;  %v5337_v43 = vcombine.low %v1200_v24, %v1204_v27  ;;  %v685_v44 = vmax.f32 %v673_v31, 0.0  ;;  %v734_v40 = vld [vmem:[#allocation8 + $0x138] sm:$0xff]  ;;  %v737_v24 = vld [vmem:[#allocation8 + $0x150] sm:$0xff] }
 0x1fe   :  { %v741_v27 = vld [vmem:[#allocation8 + $0x170] sm:$0xff] }
 0x1ff   :  { %3951 = vmatpush1.bf16.msra.mxu0 %v5287_v37  ;;  %4115 = vmatpush1.bf16.msra.mxu1 %v5289_v38  ;;  %v697_v37 = vld [vmem:[#allocation8 + $0x10] sm:$0xff]  ;;  %v5806_v51 = vpack.c.bf16 %v685_v44, %v685_v44 }
 0x200   :  { %3952 = vmatprep.subr.bf16.mxu0 %v5296_v6  ;;  %4116 = vmatprep.subr.bf16.mxu1 %v5298_v41  ;;  %v701_v38 = vld [vmem:[#allocation8 + $0x30] sm:$0xff]  ;;  %v698_v6 = vld [vmem:[#allocation8 + $0x18] sm:$0xff] }
 0x201   :  { %v702_v41 = vld [vmem:[#allocation8 + $0x38] sm:$0xff]  ;;  %v4836_v45 = vcombine.high %v697_v37, %v701_v38  ;;  %v4835_v50 = vcombine.low %v697_v37, %v701_v38  ;;  %v745_v38 = vld [vmem:[#allocation8 + $0x190] sm:$0xff] }
 0x202   :  { %v4837_v54 = vcombine.low %v698_v6, %v702_v41 }
 0x203   :  { %3953 = vmatpush1.bf16.msra.mxu0 %v5295_v46  ;;  %4117 = vmatpush1.bf16.msra.mxu1 %v5297_v47  ;;  %v4838_v46 = vcombine.high %v698_v6, %v702_v41  ;;  %v705_v47 = vld [vmem:[#allocation8 + $0x50] sm:$0xff]  ;;  %v746_v41 = vld [vmem:[#allocation8 + $0x198] sm:$0xff] }
 0x204   :  { %3954 = vmatprep.subr.bf16.mxu0 %v5304_v48  ;;  %4118 = vmatprep.subr.bf16.mxu1 %v5306_v49  ;;  %v709_v48 = vld [vmem:[#allocation8 + $0x70] sm:$0xff]  ;;  %v710_v49 = vld [vmem:[#allocation8 + $0x78] sm:$0xff] }
 0x205   :  { %v4844_v15 = vcombine.high %v705_v47, %v709_v48  ;;  %v4843_v60 = vcombine.low %v705_v47, %v709_v48  ;;  %v4845_v61 = vcombine.low %v706_v52, %v710_v49  ;;  %v749_v6 = vld [vmem:[#allocation8 + $0x1b0] sm:$0xff] }
 0x206   :  { %v753_v47 = vld [vmem:[#allocation8 + $0x1d0] sm:$0xff] }
 0x207   :  { %3955 = vmatpush1.bf16.msra.mxu0 %v5303_v55  ;;  %4119 = vmatpush1.bf16.msra.mxu1 %v5305_v39  ;;  %v4846_v55 = vcombine.high %v706_v52, %v710_v49  ;;  %v713_v39 = vld [vmem:[#allocation8 + $0x90] sm:$0xff]  ;;  %v754_v52 = vld [vmem:[#allocation8 + $0x1d8] sm:$0xff] }
 0x208   :  { %3956 = vmatprep.subr.bf16.mxu0 %v5312_v56  ;;  %4120 = vmatprep.subr.bf16.mxu1 %v5314_v58  ;;  %v717_v56 = vld [vmem:[#allocation8 + $0xb0] sm:$0xff]  ;;  %v714_v58 = vld [vmem:[#allocation8 + $0x98] sm:$0xff] }
 0x209   :  { %v4852_v62 = vcombine.high %v713_v39, %v717_v56  ;;  %v4851_v34 = vcombine.low %v713_v39, %v717_v56  ;;  %v4853_v7 = vcombine.low %v714_v58, %v718_v59  ;;  %v757_v48 = vld [vmem:[#allocation8 + $0x1f0] sm:$0xff]  ;;  %v758_v49 = vld [vmem:[#allocation8 + $0x1f8] sm:$0xff] }
 0x20a   :  { %v761_v39 = vld [vmem:[#allocation8 + $0x210] sm:$0xff] }
 0x20b   :  { %3957 = vmatpush1.bf16.msra.mxu0 %v5311_v1  ;;  %4121 = vmatpush1.bf16.msra.mxu1 %v5313_v57  ;;  %v4854_v1 = vcombine.high %v714_v58, %v718_v59  ;;  %v721_v57 = vld [vmem:[#allocation8 + $0xd0] sm:$0xff]  ;;  %v762_v58 = vld [vmem:[#allocation8 + $0x218] sm:$0xff] }
 0x20c   :  { %3958 = vmatprep.subr.bf16.mxu0 %v5320_v3  ;;  %4122 = vmatprep.subr.bf16.mxu1 %v5322_v4  ;;  %v725_v3 = vld [vmem:[#allocation8 + $0xf0] sm:$0xff]  ;;  %v722_v4 = vld [vmem:[#allocation8 + $0xd8] sm:$0xff] }
 0x20d   :  { %v4860_v9 = vcombine.high %v721_v57, %v725_v3  ;;  %v765_v56 = vld [vmem:[#allocation8 + $0x230] sm:$0xff]  ;;  %v766_v59 = vld [vmem:[#allocation8 + $0x238] sm:$0xff] }
 0x20f   :  { %3959 = vmatpush1.bf16.msra.mxu0 %v5319_v10  ;;  %4123 = vmatpush1.bf16.msra.mxu1 %v5321_v12  ;;  %v4862_v10 = vcombine.high %v722_v4, %v726_v5  ;;  %v729_v12 = vld [vmem:[#allocation8 + $0x110] sm:$0xff] }
 0x210   :  { %3960 = vmatprep.subr.bf16.mxu0 %v5328_v19  ;;  %4124 = vmatprep.subr.bf16.mxu1 %v5330_v21  ;;  %v4859_v19 = vcombine.low %v721_v57, %v725_v3  ;;  %v4861_v21 = vcombine.low %v722_v4, %v726_v5  ;;  %v4868_v22 = vcombine.high %v729_v12, %v733_v18  ;;  %v769_v57 = vld [vmem:[#allocation8 + $0x250] sm:$0xff]  ;;  %v770_v4 = vld [vmem:[#allocation8 + $0x258] sm:$0xff] }
 0x211   :  { %v4867_v31 = vcombine.low %v729_v12, %v733_v18  ;;  %v773_v3 = vld [vmem:[#allocation8 + $0x270] sm:$0xff]  ;;  %v774_v5 = vld [vmem:[#allocation8 + $0x278] sm:$0xff] }
 0x212   :  { %v777_v12 = vld [vmem:[#allocation8 + $0x290] sm:$0xff] }
 0x213   :  { %3961 = vmatpush1.bf16.msra.mxu0 %v5327_v28  ;;  %4125 = vmatpush1.bf16.msra.mxu1 %v5329_v29  ;;  %v738_v28 = vld [vmem:[#allocation8 + $0x158] sm:$0xff]  ;;  %v781_v18 = vld [vmem:[#allocation8 + $0x2b0] sm:$0xff] }
 0x214   :  { %3962 = vmatprep.subr.bf16.mxu0 %v5336_v32  ;;  %4126 = vmatprep.subr.bf16.mxu1 %v5338_v36  ;;  %v742_v29 = vld [vmem:[#allocation8 + $0x178] sm:$0xff]  ;;  %v4876_v36 = vcombine.high %v737_v24, %v741_v27 }
 0x215   :  { %v4878_v37 = vcombine.high %v738_v28, %v742_v29  ;;  %v4877_v44 = vcombine.low %v738_v28, %v742_v29  ;;  %v786_v28 = vld [vmem:[#allocation8 + $0x2d8] sm:$0xff] }
 0x216   :  { %v790_v29 = vld [vmem:[#allocation8 + $0x2f8] sm:$0xff] }
 0x217   :  { %3963 = vmatpush1.bf16.msra.mxu0 %v5335_v0  ;;  %4127 = vmatpush1.bf16.msra.mxu1 %v5337_v43  ;;  %v750_v0 = vld [vmem:[#allocation8 + $0x1b8] sm:$0xff]  ;;  %v4875_v43 = vcombine.low %v737_v24, %v741_v27  ;;  %v785_v24 = vld [vmem:[#allocation8 + $0x2d0] sm:$0xff] }
 0x218   :  { %4137 = vmatprep.subr.bf16.mxu0 %v4836_v45  ;;  %4301 = vmatprep.subr.bf16.mxu1 %v4838_v46  ;;  %v4884_v45 = vcombine.high %v745_v38, %v749_v6  ;;  %v4886_v46 = vcombine.high %v746_v41, %v750_v0  ;;  %v789_v27 = vld [vmem:[#allocation8 + $0x2f0] sm:$0xff] }
 0x21a   :  { %3965 = vmatmul.mubr.bf16.vlgmr.msra.gmra.mrb[8].mxu0 %v5806_v51  ;;  %4129 = vmatmul.mubr.bf16.vlgmr.msra.gmra.mrb[8].mxu1 %v5806_v51 }
 0x21b   :  { %4138 = vmatpush1.bf16.msra.mxu0 %v4835_v50  ;;  %4169 = vmatprep.mubr.bf16.mxu0 %v5744_v33  ;;  %v4883_v50 = vcombine.low %v745_v38, %v749_v6  ;;  %v793_v38 = vld [vmem:[#allocation8 + $0x310] sm:$0xff] }
 0x21c   :  { %4302 = vmatpush1.bf16.msra.mxu1 %v4837_v54  ;;  %4333 = vmatprep.mubr.bf16.mxu1 %v5744_v33  ;;  %v730_v33 = vld [vmem:[#allocation8 + $0x118] sm:$0xff]  ;;  %v4885_v54 = vcombine.low %v746_v41, %v750_v0  ;;  %v797_v6 = vld [vmem:[#allocation8 + $0x330] sm:$0xff] }
 0x21d   :  { %4139 = vmatprep.subr.bf16.mxu0 %v4844_v15  ;;  %4303 = vmatprep.subr.bf16.mxu1 %v4846_v55  ;;  %v4870_v23 = vcombine.high %v730_v33, %v734_v40  ;;  %v4869_v32 = vcombine.low %v730_v33, %v734_v40  ;;  %v4892_v15 = vcombine.high %v753_v47, %v757_v48  ;;  %v778_v33 = vld [vmem:[#allocation8 + $0x298] sm:$0xff] }
 0x21e   :  { %v4894_v55 = vcombine.high %v754_v52, %v758_v49  ;;  %v782_v40 = vld [vmem:[#allocation8 + $0x2b8] sm:$0xff] }
 0x21f   :  { %4140 = vmatpush1.bf16.msra.mxu0 %v4843_v60  ;;  %v4891_v60 = vcombine.low %v753_v47, %v757_v48  ;;  %v794_v41 = vld [vmem:[#allocation8 + $0x318] sm:$0xff]  ;;  %v801_v47 = vld [vmem:[#allocation8 + $0x350] sm:$0xff] }
 0x220   :  { %4304 = vmatpush1.bf16.msra.mxu1 %v4845_v61  ;;  %4141 = vmatprep.subr.bf16.mxu0 %v4852_v62  ;;  %v4893_v61 = vcombine.low %v754_v52, %v758_v49  ;;  %v4900_v62 = vcombine.high %v761_v39, %v765_v56  ;;  %v798_v0 = vld [vmem:[#allocation8 + $0x338] sm:$0xff]  ;;  %v805_v48 = vld [vmem:[#allocation8 + $0x370] sm:$0xff] }
 0x221   :  { %4305 = vmatprep.subr.bf16.mxu1 %v4854_v1  ;;  %v4902_v1 = vcombine.high %v762_v58, %v766_v59  ;;  %v802_v52 = vld [vmem:[#allocation8 + $0x358] sm:$0xff] }
 0x222   :  { %v806_v49 = vld [vmem:[#allocation8 + $0x378] sm:$0xff] }
 0x223   :  { %4142 = vmatpush1.bf16.msra.mxu0 %v4851_v34  ;;  %v4899_v34 = vcombine.low %v761_v39, %v765_v56  ;;  %v809_v39 = vld [vmem:[#allocation8 + $0x390] sm:$0xff] }
 0x224   :  { %4306 = vmatpush1.bf16.msra.mxu1 %v4853_v7  ;;  %4143 = vmatprep.subr.bf16.mxu0 %v4860_v9  ;;  %v4901_v7 = vcombine.low %v762_v58, %v766_v59  ;;  %v4908_v9 = vcombine.high %v769_v57, %v773_v3  ;;  %v813_v56 = vld [vmem:[#allocation8 + $0x3b0] sm:$0xff]  ;;  %v810_v58 = vld [vmem:[#allocation8 + $0x398] sm:$0xff] }
 0x225   :  { %4307 = vmatprep.subr.bf16.mxu1 %v4862_v10  ;;  %v4910_v10 = vcombine.high %v770_v4, %v774_v5  ;;  %v814_v59 = vld [vmem:[#allocation8 + $0x3b8] sm:$0xff] }
 0x227   :  { %4144 = vmatpush1.bf16.msra.mxu0 %v4859_v19  ;;  %v4907_v19 = vcombine.low %v769_v57, %v773_v3  ;;  %v817_v57 = vld [vmem:[#allocation8 + $0x3d0] sm:$0xff] }
 0x228   :  { %4308 = vmatpush1.bf16.msra.mxu1 %v4861_v21  ;;  %4145 = vmatprep.subr.bf16.mxu0 %v4868_v22  ;;  %v4909_v21 = vcombine.low %v770_v4, %v774_v5  ;;  %v4916_v22 = vcombine.high %v777_v12, %v781_v18  ;;  %v821_v3 = vld [vmem:[#allocation8 + $0x3f0] sm:$0xff]  ;;  %v818_v4 = vld [vmem:[#allocation8 + $0x3d8] sm:$0xff] }
 0x229   :  { %4309 = vmatprep.subr.bf16.mxu1 %v4870_v23  ;;  %v4918_v23 = vcombine.high %v778_v33, %v782_v40  ;;  %v822_v5 = vld [vmem:[#allocation8 + $0x3f8] sm:$0xff] }
 0x22b   :  { %4146 = vmatpush1.bf16.msra.mxu0 %v4867_v31  ;;  %v4915_v31 = vcombine.low %v777_v12, %v781_v18  ;;  %v825_v12 = vld [vmem:[#allocation8 + $0x410] sm:$0xff] }
 0x22c   :  { %4310 = vmatpush1.bf16.msra.mxu1 %v4869_v32  ;;  %4147 = vmatprep.subr.bf16.mxu0 %v4876_v36  ;;  %v4917_v32 = vcombine.low %v778_v33, %v782_v40  ;;  %v4924_v36 = vcombine.high %v785_v24, %v789_v27  ;;  %v829_v18 = vld [vmem:[#allocation8 + $0x430] sm:$0xff]  ;;  %v826_v33 = vld [vmem:[#allocation8 + $0x418] sm:$0xff] }
 0x22d   :  { %4311 = vmatprep.subr.bf16.mxu1 %v4878_v37  ;;  %v4926_v37 = vcombine.high %v786_v28, %v790_v29  ;;  %v830_v40 = vld [vmem:[#allocation8 + $0x438] sm:$0xff] }
 0x22f   :  { %4148 = vmatpush1.bf16.msra.mxu0 %v4875_v43  ;;  %v4923_v43 = vcombine.low %v785_v24, %v789_v27  ;;  %v833_v24 = vld [vmem:[#allocation8 + $0x450] sm:$0xff] }
 0x230   :  { %4312 = vmatpush1.bf16.msra.mxu1 %v4877_v44  ;;  %4149 = vmatprep.subr.bf16.mxu0 %v4884_v45  ;;  %v4925_v44 = vcombine.low %v786_v28, %v790_v29  ;;  %v4932_v45 = vcombine.high %v793_v38, %v797_v6  ;;  %v837_v27 = vld [vmem:[#allocation8 + $0x470] sm:$0xff]  ;;  %v4963_v28 = vcombine.low %v825_v12, %v829_v18  ;;  %v834_v29 = vld [vmem:[#allocation8 + $0x458] sm:$0xff] }
 0x231   :  { %4313 = vmatprep.subr.bf16.mxu1 %v4886_v46  ;;  %v4934_v46 = vcombine.high %v794_v41, %v798_v0 }
 0x233   :  { %4150 = vmatpush1.bf16.msra.mxu0 %v4883_v50  ;;  %v4931_v50 = vcombine.low %v793_v38, %v797_v6  ;;  %v845_v38 = vld [vmem:[#allocation8 + $0x4b0] sm:$0xff] }
 0x234   :  { %4314 = vmatpush1.bf16.msra.mxu1 %v4885_v54  ;;  %4151 = vmatprep.subr.bf16.mxu0 %v4892_v15  ;;  %v4933_v54 = vcombine.low %v794_v41, %v798_v0  ;;  %v4940_v15 = vcombine.high %v801_v47, %v805_v48  ;;  %v842_v41 = vld [vmem:[#allocation8 + $0x498] sm:$0xff] }
 0x235   :  { %4315 = vmatprep.subr.bf16.mxu1 %v4894_v55  ;;  %v4942_v55 = vcombine.high %v802_v52, %v806_v49  ;;  %v846_v0 = vld [vmem:[#allocation8 + $0x4b8] sm:$0xff] }
 0x237   :  { %4152 = vmatpush1.bf16.msra.mxu0 %v4891_v60  ;;  %v4939_v60 = vcombine.low %v801_v47, %v805_v48  ;;  %v849_v47 = vld [vmem:[#allocation8 + $0x4d0] sm:$0xff] }
 0x238   :  { %4316 = vmatpush1.bf16.msra.mxu1 %v4893_v61  ;;  %4153 = vmatprep.subr.bf16.mxu0 %v4900_v62  ;;  %v4941_v61 = vcombine.low %v802_v52, %v806_v49  ;;  %v4948_v62 = vcombine.high %v809_v39, %v813_v56  ;;  %v853_v48 = vld [vmem:[#allocation8 + $0x4f0] sm:$0xff]  ;;  %v850_v52 = vld [vmem:[#allocation8 + $0x4d8] sm:$0xff] }
 0x239   :  { %4317 = vmatprep.subr.bf16.mxu1 %v4902_v1  ;;  %v4950_v1 = vcombine.high %v810_v58, %v814_v59  ;;  %v854_v49 = vld [vmem:[#allocation8 + $0x4f8] sm:$0xff] }
 0x23b   :  { %4154 = vmatpush1.bf16.msra.mxu0 %v4899_v34  ;;  %v4947_v34 = vcombine.low %v809_v39, %v813_v56  ;;  %v861_v39 = vld [vmem:[#allocation8 + $0x530] sm:$0xff]  ;;  %v858_v56 = vld [vmem:[#allocation8 + $0x518] sm:$0xff] }
 0x23c   :  { %4318 = vmatpush1.bf16.msra.mxu1 %v4901_v7  ;;  %4155 = vmatprep.subr.bf16.mxu0 %v4908_v9  ;;  %v4949_v7 = vcombine.low %v810_v58, %v814_v59  ;;  %v4956_v9 = vcombine.high %v817_v57, %v821_v3  ;;  %v862_v58 = vld [vmem:[#allocation8 + $0x538] sm:$0xff]  ;;  %v4989_v59 = vcombine.low %v850_v52, %v854_v49 }
 0x23d   :  { %4319 = vmatprep.subr.bf16.mxu1 %v4910_v10  ;;  %v4958_v10 = vcombine.high %v818_v4, %v822_v5 }
 0x23f   :  { %4156 = vmatpush1.bf16.msra.mxu0 %v4907_v19  ;;  %v4955_v19 = vcombine.low %v817_v57, %v821_v3  ;;  %v866_v57 = vld [vmem:[#allocation8 + $0x558] sm:$0xff] }
 0x240   :  { %4320 = vmatpush1.bf16.msra.mxu1 %v4909_v21  ;;  %4157 = vmatprep.subr.bf16.mxu0 %v4916_v22  ;;  %v4957_v21 = vcombine.low %v818_v4, %v822_v5  ;;  %v4964_v22 = vcombine.high %v825_v12, %v829_v18  ;;  %v870_v3 = vld [vmem:[#allocation8 + $0x578] sm:$0xff]  ;;  %v4997_v5 = vcombine.low %v858_v56, %v862_v58 }
 0x241   :  { %4321 = vmatprep.subr.bf16.mxu1 %v4918_v23  ;;  %v4966_v23 = vcombine.high %v826_v33, %v830_v40  ;;  %v874_v12 = vld [vmem:[#allocation8 + $0x598] sm:$0xff] }
 0x242   :  { %v878_v18 = vld [vmem:[#allocation8 + $0x5b8] sm:$0xff] }
 0x243   :  { %4158 = vmatpush1.bf16.msra.mxu0 %v4915_v31  ;;  %v838_v31 = vld [vmem:[#allocation8 + $0x478] sm:$0xff] }
 0x244   :  { %4322 = vmatpush1.bf16.msra.mxu1 %v4917_v32  ;;  %4159 = vmatprep.subr.bf16.mxu0 %v4924_v36  ;;  %v4965_v32 = vcombine.low %v826_v33, %v830_v40  ;;  %v4972_v36 = vcombine.high %v833_v24, %v837_v27  ;;  %v4974_v6 = vcombine.high %v834_v29, %v838_v31 }
 0x245   :  { %4323 = vmatprep.subr.bf16.mxu1 %v4926_v37  ;;  %v841_v37 = vld [vmem:[#allocation8 + $0x490] sm:$0xff]  ;;  %v5005_v40 = vcombine.low %v866_v57, %v870_v3 }
 0x247   :  { %4160 = vmatpush1.bf16.msra.mxu0 %v4923_v43  ;;  %v4971_v43 = vcombine.low %v833_v24, %v837_v27  ;;  %v882_v24 = vld [vmem:[#allocation8 + $0x5d8] sm:$0xff] }
 0x248   :  { %4324 = vmatpush1.bf16.msra.mxu1 %v4925_v44  ;;  %4161 = vmatprep.subr.bf16.mxu0 %v4932_v45  ;;  %v4973_v44 = vcombine.low %v834_v29, %v838_v31  ;;  %v4980_v45 = vcombine.high %v841_v37, %v845_v38  ;;  %v886_v27 = vld [vmem:[#allocation8 + $0x5f8] sm:$0xff]  ;;  %v5013_v29 = vcombine.low %v874_v12, %v878_v18 }
 0x249   :  { %4325 = vmatprep.subr.bf16.mxu1 %v4934_v46  ;;  %v4982_v46 = vcombine.high %v842_v41, %v846_v0 }
 0x24b   :  { %4162 = vmatpush1.bf16.msra.mxu0 %v4931_v50  ;;  %v4979_v50 = vcombine.low %v841_v37, %v845_v38  ;;  %v893_v37 = vld [vmem:[#allocation8 + $0x630] sm:$0xff]  ;;  %v890_v38 = vld [vmem:[#allocation8 + $0x618] sm:$0xff] }
 0x24c   :  { %4326 = vmatpush1.bf16.msra.mxu1 %v4933_v54  ;;  %4163 = vmatprep.subr.bf16.mxu0 %v4940_v15  ;;  %v4988_v54 = vcombine.high %v849_v47, %v853_v48  ;;  %v4990_v15 = vcombine.high %v850_v52, %v854_v49 }
 0x24d   :  { %4327 = vmatprep.subr.bf16.mxu1 %v4942_v55  ;;  %v857_v55 = vld [vmem:[#allocation8 + $0x510] sm:$0xff] }
 0x24e   :  { %v4995_v4 = vcombine.low %v857_v55, %v861_v39 }
 0x24f   :  { %4164 = vmatpush1.bf16.msra.mxu0 %v4939_v60  ;;  %v4996_v60 = vcombine.high %v857_v55, %v861_v39  ;;  %v906_v55 = vld [vmem:[#allocation8 + $0x698] sm:$0xff] }
 0x250   :  { %4328 = vmatpush1.bf16.msra.mxu1 %v4941_v61  ;;  %4165 = vmatprep.subr.bf16.mxu0 %v4948_v62  ;;  %v4998_v61 = vcombine.high %v858_v56, %v862_v58  ;;  %v865_v62 = vld [vmem:[#allocation8 + $0x550] sm:$0xff]  ;;  %v910_v39 = vld [vmem:[#allocation8 + $0x6b8] sm:$0xff] }
 0x251   :  { %4329 = vmatprep.subr.bf16.mxu1 %v4950_v1  ;;  %v869_v1 = vld [vmem:[#allocation8 + $0x570] sm:$0xff] }
 0x252   :  { %v5003_v33 = vcombine.low %v865_v62, %v869_v1 }
 0x253   :  { %4166 = vmatpush1.bf16.msra.mxu0 %v4947_v34  ;;  %v5004_v34 = vcombine.high %v865_v62, %v869_v1  ;;  %v914_v62 = vld [vmem:[#allocation8 + $0x6d8] sm:$0xff] }
 0x254   :  { %4330 = vmatpush1.bf16.msra.mxu1 %v4949_v7  ;;  %4167 = vmatprep.subr.bf16.mxu0 %v4956_v9  ;;  %v5006_v7 = vcombine.high %v866_v57, %v870_v3  ;;  %v873_v9 = vld [vmem:[#allocation8 + $0x590] sm:$0xff]  ;;  %v918_v1 = vld [vmem:[#allocation8 + $0x6f8] sm:$0xff]  ;;  %v5045_v3 = vcombine.low %v906_v55, %v910_v39 }
 0x255   :  { %4331 = vmatprep.subr.bf16.mxu1 %v4958_v10  ;;  %v877_v10 = vld [vmem:[#allocation8 + $0x5b0] sm:$0xff] }
 0x257   :  { %4168 = vmatpush1.bf16.msra.mxu0 %v4955_v19  ;;  %v5012_v19 = vcombine.high %v873_v9, %v877_v10 }
 0x258   :  { %4332 = vmatpush1.bf16.msra.mxu1 %v4957_v21  ;;  %4178 = vmatprep.subr.bf16.mxu0 %v4964_v22  ;;  %v5014_v21 = vcombine.high %v874_v12, %v878_v18  ;;  %v881_v22 = vld [vmem:[#allocation8 + $0x5d0] sm:$0xff]  ;;  %v5053_v18 = vcombine.low %v914_v62, %v918_v1 }
 0x259   :  { %4342 = vmatprep.subr.bf16.mxu1 %v4966_v23  ;;  %v885_v23 = vld [vmem:[#allocation8 + $0x5f0] sm:$0xff] }
 0x25a   :  { %4170 = vmatmul.mubr.bf16.vlgmr.msra.gmra.mrb[12].mxu0 %v5748_v35  ;;  %v5020_v31 = vcombine.high %v881_v22, %v885_v23 }
 0x25b   :  { %4334 = vmatmul.mubr.bf16.vlgmr.msra.gmra.mrb[12].mxu1 %v5748_v35  ;;  %4179 = vmatpush1.bf16.msra.mxu0 %v4963_v28  ;;  %v4981_v35 = vcombine.low %v842_v41, %v846_v0  ;;  %v5011_v28 = vcombine.low %v873_v9, %v877_v10  ;;  %v5019_v41 = vcombine.low %v881_v22, %v885_v23  ;;  %v922_v9 = vld [vmem:[#allocation8 + $0x718] sm:$0xff] }
 0x25c   :  { %4210 = vmatprep.mubr.bf16.mxu0 %v5754_v53  ;;  %4343 = vmatpush1.bf16.msra.mxu1 %v4965_v32  ;;  %v5022_v32 = vcombine.high %v882_v24, %v886_v27  ;;  %v5021_v0 = vcombine.low %v882_v24, %v886_v27  ;;  %v926_v10 = vld [vmem:[#allocation8 + $0x738] sm:$0xff] }
 0x25d   :  { %4374 = vmatprep.mubr.bf16.mxu1 %v5754_v53  ;;  %4180 = vmatprep.subr.bf16.mxu0 %v4972_v36  ;;  %v4987_v53 = vcombine.low %v849_v47, %v853_v48  ;;  %v889_v36 = vld [vmem:[#allocation8 + $0x610] sm:$0xff]  ;;  %v898_v47 = vld [vmem:[#allocation8 + $0x658] sm:$0xff]  ;;  %v5061_v27 = vcombine.low %v922_v9, %v926_v10 }
 0x25e   :  { %4344 = vmatprep.subr.bf16.mxu1 %v4974_v6  ;;  %v894_v6 = vld [vmem:[#allocation8 + $0x638] sm:$0xff]  ;;  %v5027_v52 = vcombine.low %v889_v36, %v893_v37 }
 0x25f   :  { %4181 = vmatpush1.bf16.msra.mxu0 %v4971_v43  ;;  %v5028_v43 = vcombine.high %v889_v36, %v893_v37  ;;  %v902_v48 = vld [vmem:[#allocation8 + $0x678] sm:$0xff]  ;;  %v5029_v49 = vcombine.low %v890_v38, %v894_v6 }
 0x260   :  { %4345 = vmatpush1.bf16.msra.mxu1 %v4973_v44  ;;  %4182 = vmatprep.subr.bf16.mxu0 %v4980_v45  ;;  %v5030_v44 = vcombine.high %v890_v38, %v894_v6  ;;  %v897_v45 = vld [vmem:[#allocation8 + $0x650] sm:$0xff]  ;;  %v5037_v58 = vcombine.low %v898_v47, %v902_v48  ;;  %v930_v22 = vld [vmem:[#allocation8 + $0x758] sm:$0xff] }
 0x261   :  { %4346 = vmatprep.subr.bf16.mxu1 %v4982_v46  ;;  %v901_v46 = vld [vmem:[#allocation8 + $0x670] sm:$0xff]  ;;  %v934_v23 = vld [vmem:[#allocation8 + $0x778] sm:$0xff] }
 0x262   :  { %v5035_v56 = vcombine.low %v897_v45, %v901_v46  ;;  %v938_v36 = vld [vmem:[#allocation8 + $0x798] sm:$0xff]  ;;  %v5069_v6 = vcombine.low %v930_v22, %v934_v23 }
 0x263   :  { %4183 = vmatpush1.bf16.msra.mxu0 %v4979_v50  ;;  %v5036_v50 = vcombine.high %v897_v45, %v901_v46  ;;  %v942_v37 = vld [vmem:[#allocation8 + $0x7b8] sm:$0xff] }
 0x264   :  { %4347 = vmatpush1.bf16.msra.mxu1 %v4981_v35  ;;  %4184 = vmatprep.subr.bf16.mxu0 %v4988_v54  ;;  %v5038_v35 = vcombine.high %v898_v47, %v902_v48  ;;  %v905_v54 = vld [vmem:[#allocation8 + $0x690] sm:$0xff]  ;;  %v946_v45 = vld [vmem:[#allocation8 + $0x7d8] sm:$0xff]  ;;  %v5077_v48 = vcombine.low %v938_v36, %v942_v37 }
 0x265   :  { %4348 = vmatprep.subr.bf16.mxu1 %v4990_v15  ;;  %v909_v15 = vld [vmem:[#allocation8 + $0x6b0] sm:$0xff]  ;;  %v950_v46 = vld [vmem:[#allocation8 + $0x7f8] sm:$0xff] }
 0x266   :  { %v5043_v57 = vcombine.low %v905_v54, %v909_v15 }
 0x267   :  { %4185 = vmatpush1.bf16.msra.mxu0 %v4987_v53  ;;  %v5044_v53 = vcombine.high %v905_v54, %v909_v15  ;;  %v954_v54 = vld [vmem:[#allocation8 + $0x818] sm:$0xff] }
 0x268   :  { %4349 = vmatpush1.bf16.msra.mxu1 %v4989_v59  ;;  %4186 = vmatprep.subr.bf16.mxu0 %v4996_v60  ;;  %v5046_v59 = vcombine.high %v906_v55, %v910_v39  ;;  %v913_v60 = vld [vmem:[#allocation8 + $0x6d0] sm:$0xff]  ;;  %v958_v15 = vld [vmem:[#allocation8 + $0x838] sm:$0xff]  ;;  %v5085_v39 = vcombine.low %v946_v45, %v950_v46 }
 0x269   :  { %4350 = vmatprep.subr.bf16.mxu1 %v4998_v61  ;;  %v917_v61 = vld [vmem:[#allocation8 + $0x6f0] sm:$0xff] }
 0x26a   :  { %v5051_v12 = vcombine.low %v913_v60, %v917_v61 }
 0x26b   :  { %4187 = vmatpush1.bf16.msra.mxu0 %v4995_v4  ;;  %v5052_v4 = vcombine.high %v913_v60, %v917_v61  ;;  %v962_v61 = vld [vmem:[#allocation8 + $0x858] sm:$0xff] }
 0x26c   :  { %4351 = vmatpush1.bf16.msra.mxu1 %v4997_v5  ;;  %4188 = vmatprep.subr.bf16.mxu0 %v5004_v34  ;;  %v5054_v5 = vcombine.high %v914_v62, %v918_v1  ;;  %v921_v34 = vld [vmem:[#allocation8 + $0x710] sm:$0xff]  ;;  %v966_v62 = vld [vmem:[#allocation8 + $0x878] sm:$0xff]  ;;  %v5093_v1 = vcombine.low %v954_v54, %v958_v15 }
 0x26d   :  { %4352 = vmatprep.subr.bf16.mxu1 %v5006_v7  ;;  %v925_v7 = vld [vmem:[#allocation8 + $0x730] sm:$0xff] }
 0x26e   :  { %v5059_v24 = vcombine.low %v921_v34, %v925_v7 }
 0x26f   :  { %4189 = vmatpush1.bf16.msra.mxu0 %v5003_v33  ;;  %v5060_v33 = vcombine.high %v921_v34, %v925_v7  ;;  %v970_v34 = vld [vmem:[#allocation8 + $0x898] sm:$0xff] }
 0x270   :  { %4353 = vmatpush1.bf16.msra.mxu1 %v5005_v40  ;;  %4190 = vmatprep.subr.bf16.mxu0 %v5012_v19  ;;  %v5062_v40 = vcombine.high %v922_v9, %v926_v10  ;;  %v929_v19 = vld [vmem:[#allocation8 + $0x750] sm:$0xff]  ;;  %v974_v7 = vld [vmem:[#allocation8 + $0x8b8] sm:$0xff]  ;;  %v5101_v10 = vcombine.low %v962_v61, %v966_v62 }
 0x271   :  { %4354 = vmatprep.subr.bf16.mxu1 %v5014_v21  ;;  %v933_v21 = vld [vmem:[#allocation8 + $0x770] sm:$0xff] }
 0x272   :  { %v5067_v38 = vcombine.low %v929_v19, %v933_v21 }
 0x273   :  { %4191 = vmatpush1.bf16.msra.mxu0 %v5011_v28  ;;  %v5068_v28 = vcombine.high %v929_v19, %v933_v21  ;;  %v978_v19 = vld [vmem:[#allocation8 + $0x8d8] sm:$0xff] }
 0x274   :  { %4355 = vmatpush1.bf16.msra.mxu1 %v5013_v29  ;;  %4192 = vmatprep.subr.bf16.mxu0 %v5020_v31  ;;  %v5070_v29 = vcombine.high %v930_v22, %v934_v23  ;;  %v937_v31 = vld [vmem:[#allocation8 + $0x790] sm:$0xff]  ;;  %v982_v21 = vld [vmem:[#allocation8 + $0x8f8] sm:$0xff] }
 0x275   :  { %4356 = vmatprep.subr.bf16.mxu1 %v5022_v32  ;;  %v941_v32 = vld [vmem:[#allocation8 + $0x7b0] sm:$0xff] }
 0x276   :  { %v5075_v47 = vcombine.low %v937_v31, %v941_v32 }
 0x277   :  { %4193 = vmatpush1.bf16.msra.mxu0 %v5019_v41  ;;  %v5076_v41 = vcombine.high %v937_v31, %v941_v32  ;;  %v990_v31 = vld [vmem:[#allocation8 + $0x938] sm:$0xff]  ;;  %v5117_v32 = vcombine.low %v978_v19, %v982_v21 }
 0x278   :  { %4357 = vmatpush1.bf16.msra.mxu1 %v5021_v0  ;;  %4194 = vmatprep.subr.bf16.mxu0 %v5028_v43  ;;  %v5078_v0 = vcombine.high %v938_v36, %v942_v37  ;;  %v945_v43 = vld [vmem:[#allocation8 + $0x7d0] sm:$0xff] }
 0x279   :  { %4358 = vmatprep.subr.bf16.mxu1 %v5030_v44  ;;  %v949_v44 = vld [vmem:[#allocation8 + $0x7f0] sm:$0xff] }
 0x27a   :  { %v5083_v55 = vcombine.low %v945_v43, %v949_v44 }
 0x27b   :  { %4195 = vmatpush1.bf16.msra.mxu0 %v5027_v52  ;;  %v5084_v52 = vcombine.high %v945_v43, %v949_v44 }
 0x27c   :  { %4359 = vmatpush1.bf16.msra.mxu1 %v5029_v49  ;;  %4196 = vmatprep.subr.bf16.mxu0 %v5036_v50  ;;  %v5086_v49 = vcombine.high %v946_v45, %v950_v46  ;;  %v953_v50 = vld [vmem:[#allocation8 + $0x810] sm:$0xff] }
 0x27d   :  { %4360 = vmatprep.subr.bf16.mxu1 %v5038_v35  ;;  %v957_v35 = vld [vmem:[#allocation8 + $0x830] sm:$0xff] }
 0x27e   :  { %v5091_v60 = vcombine.low %v953_v50, %v957_v35 }
 0x27f   :  { %4197 = vmatpush1.bf16.msra.mxu0 %v5035_v56  ;;  %v5092_v56 = vcombine.high %v953_v50, %v957_v35 }
 0x280   :  { %4361 = vmatpush1.bf16.msra.mxu1 %v5037_v58  ;;  %4198 = vmatprep.subr.bf16.mxu0 %v5044_v53  ;;  %v5094_v58 = vcombine.high %v954_v54, %v958_v15  ;;  %v961_v53 = vld [vmem:[#allocation8 + $0x850] sm:$0xff] }
 0x281   :  { %4362 = vmatprep.subr.bf16.mxu1 %v5046_v59  ;;  %v965_v59 = vld [vmem:[#allocation8 + $0x870] sm:$0xff] }
 0x282   :  { %v5099_v9 = vcombine.low %v961_v53, %v965_v59 }
 0x283   :  { %4199 = vmatpush1.bf16.msra.mxu0 %v5043_v57  ;;  %v5100_v57 = vcombine.high %v961_v53, %v965_v59 }
 0x284   :  { %4363 = vmatpush1.bf16.msra.mxu1 %v5045_v3  ;;  %4200 = vmatprep.subr.bf16.mxu0 %v5052_v4  ;;  %v969_v3 = vld [vmem:[#allocation8 + $0x890] sm:$0xff] }
 0x285   :  { %4364 = vmatprep.subr.bf16.mxu1 %v5054_v5  ;;  %v973_v4 = vld [vmem:[#allocation8 + $0x8b0] sm:$0xff]  ;;  %v5102_v5 = vcombine.high %v962_v61, %v966_v62 }
 0x286   :  { %v5107_v22 = vcombine.low %v969_v3, %v973_v4  ;;  %v1017_v62 = vld [vmem:[#allocation8 + $0xa10] sm:$0xff] }
 0x287   :  { %4201 = vmatpush1.bf16.msra.mxu0 %v5051_v12  ;;  %v5108_v12 = vcombine.high %v969_v3, %v973_v4  ;;  %v1022_v3 = vld [vmem:[#allocation8 + $0xa38] sm:$0xff] }
 0x288   :  { %4365 = vmatpush1.bf16.msra.mxu1 %v5053_v18  ;;  %4202 = vmatprep.subr.bf16.mxu0 %v5060_v33  ;;  %v5110_v18 = vcombine.high %v970_v34, %v974_v7  ;;  %v977_v33 = vld [vmem:[#allocation8 + $0x8d0] sm:$0xff] }
 0x289   :  { %4366 = vmatprep.subr.bf16.mxu1 %v5062_v40  ;;  %v981_v40 = vld [vmem:[#allocation8 + $0x8f0] sm:$0xff] }
 0x28a   :  { %v5116_v23 = vcombine.high %v977_v33, %v981_v40 }
 0x28b   :  { %4203 = vmatpush1.bf16.msra.mxu0 %v5059_v24  ;;  %v5118_v24 = vcombine.high %v978_v19, %v982_v21 }
 0x28c   :  { %4367 = vmatpush1.bf16.msra.mxu1 %v5061_v27  ;;  %4204 = vmatprep.subr.bf16.mxu0 %v5068_v28  ;;  %v985_v27 = vld [vmem:[#allocation8 + $0x910] sm:$0xff] }
 0x28d   :  { %4368 = vmatprep.subr.bf16.mxu1 %v5070_v29  ;;  %v989_v28 = vld [vmem:[#allocation8 + $0x930] sm:$0xff]  ;;  %v986_v29 = vld [vmem:[#allocation8 + $0x918] sm:$0xff] }
 0x28e   :  { %v5124_v36 = vcombine.high %v985_v27, %v989_v28  ;;  %v5126_v37 = vcombine.high %v986_v29, %v990_v31  ;;  %v5123_v43 = vcombine.low %v985_v27, %v989_v28  ;;  %v5125_v44 = vcombine.low %v986_v29, %v990_v31 }
 0x28f   :  { %4205 = vmatpush1.bf16.msra.mxu0 %v5067_v38  ;;  %v993_v38 = vld [vmem:[#allocation8 + $0x950] sm:$0xff] }
 0x290   :  { %4369 = vmatpush1.bf16.msra.mxu1 %v5069_v6  ;;  %4206 = vmatprep.subr.bf16.mxu0 %v5076_v41  ;;  %v997_v6 = vld [vmem:[#allocation8 + $0x970] sm:$0xff]  ;;  %v994_v41 = vld [vmem:[#allocation8 + $0x958] sm:$0xff] }
 0x291   :  { %4370 = vmatprep.subr.bf16.mxu1 %v5078_v0  ;;  %v998_v0 = vld [vmem:[#allocation8 + $0x978] sm:$0xff]  ;;  %v5132_v45 = vcombine.high %v993_v38, %v997_v6  ;;  %v5131_v50 = vcombine.low %v993_v38, %v997_v6 }
 0x292   :  { %v5134_v46 = vcombine.high %v994_v41, %v998_v0  ;;  %v5133_v35 = vcombine.low %v994_v41, %v998_v0 }
 0x293   :  { %4207 = vmatpush1.bf16.msra.mxu0 %v5075_v47  ;;  %v1001_v47 = vld [vmem:[#allocation8 + $0x990] sm:$0xff] }
 0x294   :  { %4371 = vmatpush1.bf16.msra.mxu1 %v5077_v48  ;;  %4208 = vmatprep.subr.bf16.mxu0 %v5084_v52  ;;  %v1005_v48 = vld [vmem:[#allocation8 + $0x9b0] sm:$0xff]  ;;  %v1002_v52 = vld [vmem:[#allocation8 + $0x998] sm:$0xff] }
 0x295   :  { %4372 = vmatprep.subr.bf16.mxu1 %v5086_v49  ;;  %v1006_v49 = vld [vmem:[#allocation8 + $0x9b8] sm:$0xff]  ;;  %v5140_v54 = vcombine.high %v1001_v47, %v1005_v48  ;;  %v5139_v53 = vcombine.low %v1001_v47, %v1005_v48 }
 0x296   :  { %v5142_v15 = vcombine.high %v1002_v52, %v1006_v49  ;;  %v5141_v59 = vcombine.low %v1002_v52, %v1006_v49 }
 0x297   :  { %4209 = vmatpush1.bf16.msra.mxu0 %v5083_v55  ;;  %v1009_v55 = vld [vmem:[#allocation8 + $0x9d0] sm:$0xff] }
 0x298   :  { %4373 = vmatpush1.bf16.msra.mxu1 %v5085_v39  ;;  %4219 = vmatprep.subr.bf16.mxu0 %v5092_v56  ;;  %v1013_v39 = vld [vmem:[#allocation8 + $0x9f0] sm:$0xff]  ;;  %v1010_v56 = vld [vmem:[#allocation8 + $0x9d8] sm:$0xff] }
 0x299   :  { %4383 = vmatprep.subr.bf16.mxu1 %v5094_v58  ;;  %v1014_v58 = vld [vmem:[#allocation8 + $0x9f8] sm:$0xff]  ;;  %v5147_v4 = vcombine.low %v1009_v55, %v1013_v39 }
 0x29a   :  { %4211 = vmatmul.mubr.bf16.vlgmr.msra.gmra.mrb[12].mxu0 %v5776_v17  ;;  %v5150_v61 = vcombine.high %v1010_v56, %v1014_v58 }
 0x29b   :  { %4375 = vmatmul.mubr.bf16.vlgmr.msra.gmra.mrb[12].mxu1 %v5776_v17  ;;  %4220 = vmatpush1.bf16.msra.mxu0 %v5091_v60  ;;  %v5109_v17 = vcombine.low %v970_v34, %v974_v7  ;;  %v5148_v60 = vcombine.high %v1009_v55, %v1013_v39 }
 0x29c   :  { %4251 = vmatprep.mubr.bf16.mxu0 %v5778_v26  ;;  %4384 = vmatpush1.bf16.msra.mxu1 %v5093_v1  ;;  %v1021_v1 = vld [vmem:[#allocation8 + $0xa30] sm:$0xff] }
 0x29d   :  { %4415 = vmatprep.mubr.bf16.mxu1 %v5778_v26  ;;  %4221 = vmatprep.subr.bf16.mxu0 %v5100_v57  ;;  %v5115_v26 = vcombine.low %v977_v33, %v981_v40  ;;  %v1018_v57 = vld [vmem:[#allocation8 + $0xa18] sm:$0xff]  ;;  %v5156_v34 = vcombine.high %v1017_v62, %v1021_v1  ;;  %v5155_v33 = vcombine.low %v1017_v62, %v1021_v1 }
 0x29e   :  { %4385 = vmatprep.subr.bf16.mxu1 %v5102_v5  ;;  %v5149_v5 = vcombine.low %v1010_v56, %v1014_v58  ;;  %v5158_v7 = vcombine.high %v1018_v57, %v1022_v3  ;;  %v5157_v40 = vcombine.low %v1018_v57, %v1022_v3 }
 0x29f   :  { %4222 = vmatpush1.bf16.msra.mxu0 %v5099_v9  ;;  %v1025_v9 = vld [vmem:[#allocation8 + $0xa50] sm:$0xff] }
 0x2a0   :  { %4386 = vmatpush1.bf16.msra.mxu1 %v5101_v10  ;;  %4223 = vmatprep.subr.bf16.mxu0 %v5108_v12  ;;  %v1029_v10 = vld [vmem:[#allocation8 + $0xa70] sm:$0xff]  ;;  %v1026_v12 = vld [vmem:[#allocation8 + $0xa58] sm:$0xff] }
 0x2a1   :  { %4387 = vmatprep.subr.bf16.mxu1 %v5110_v18  ;;  %v1030_v18 = vld [vmem:[#allocation8 + $0xa78] sm:$0xff]  ;;  %v5164_v19 = vcombine.high %v1025_v9, %v1029_v10  ;;  %v5163_v27 = vcombine.low %v1025_v9, %v1029_v10 }
 0x2a2   :  { %v5166_v21 = vcombine.high %v1026_v12, %v1030_v18  ;;  %v5165_v28 = vcombine.low %v1026_v12, %v1030_v18 }
 0x2a3   :  { %4224 = vmatpush1.bf16.msra.mxu0 %v5107_v22  ;;  %v1033_v22 = vld [vmem:[#allocation8 + $0xa90] sm:$0xff] }
 0x2a4   :  { %4388 = vmatpush1.bf16.msra.mxu1 %v5109_v17  ;;  %4225 = vmatprep.subr.bf16.mxu0 %v5116_v23  ;;  %v1037_v17 = vld [vmem:[#allocation8 + $0xab0] sm:$0xff]  ;;  %v1034_v23 = vld [vmem:[#allocation8 + $0xa98] sm:$0xff] }
 0x2a5   :  { %4389 = vmatprep.subr.bf16.mxu1 %v5118_v24  ;;  %v1038_v24 = vld [vmem:[#allocation8 + $0xab8] sm:$0xff]  ;;  %v5172_v29 = vcombine.high %v1033_v22, %v1037_v17  ;;  %v5171_v38 = vcombine.low %v1033_v22, %v1037_v17 }
 0x2a6   :  { %v5174_v31 = vcombine.high %v1034_v23, %v1038_v24  ;;  %v5173_v6 = vcombine.low %v1034_v23, %v1038_v24 }
 0x2a7   :  { %4226 = vmatpush1.bf16.msra.mxu0 %v5115_v26  ;;  %v1041_v26 = vld [vmem:[#allocation8 + $0xad0] sm:$0xff] }
 0x2a8   :  { %4390 = vmatpush1.bf16.msra.mxu1 %v5117_v32  ;;  %4227 = vmatprep.subr.bf16.mxu0 %v5124_v36  ;;  %v1045_v32 = vld [vmem:[#allocation8 + $0xaf0] sm:$0xff]  ;;  %v1042_v36 = vld [vmem:[#allocation8 + $0xad8] sm:$0xff] }
 0x2a9   :  { %4391 = vmatprep.subr.bf16.mxu1 %v5126_v37  ;;  %v1046_v37 = vld [vmem:[#allocation8 + $0xaf8] sm:$0xff]  ;;  %v5180_v41 = vcombine.high %v1041_v26, %v1045_v32  ;;  %v5179_v47 = vcombine.low %v1041_v26, %v1045_v32 }
 0x2aa   :  { %v5182_v0 = vcombine.high %v1042_v36, %v1046_v37  ;;  %v5181_v48 = vcombine.low %v1042_v36, %v1046_v37  ;;  %v1094_v26 = vld [vmem:[#allocation8 + $0xc78] sm:$0xff]  ;;  %v1097_v37 = vld [vmem:[#allocation8 + $0xc90] sm:$0xff] }
 0x2ab   :  { %4228 = vmatpush1.bf16.msra.mxu0 %v5123_v43  ;;  %v1049_v43 = vld [vmem:[#allocation8 + $0xb10] sm:$0xff] }
 0x2ac   :  { %4392 = vmatpush1.bf16.msra.mxu1 %v5125_v44  ;;  %4229 = vmatprep.subr.bf16.mxu0 %v5132_v45  ;;  %v1053_v44 = vld [vmem:[#allocation8 + $0xb30] sm:$0xff]  ;;  %v1050_v45 = vld [vmem:[#allocation8 + $0xb18] sm:$0xff] }
 0x2ad   :  { %4393 = vmatprep.subr.bf16.mxu1 %v5134_v46  ;;  %v1054_v46 = vld [vmem:[#allocation8 + $0xb38] sm:$0xff]  ;;  %v5188_v52 = vcombine.high %v1049_v43, %v1053_v44  ;;  %v5187_v55 = vcombine.low %v1049_v43, %v1053_v44 }
 0x2ae   :  { %v5190_v49 = vcombine.high %v1050_v45, %v1054_v46  ;;  %v5189_v39 = vcombine.low %v1050_v45, %v1054_v46 }
 0x2af   :  { %4230 = vmatpush1.bf16.msra.mxu0 %v5131_v50  ;;  %v1057_v50 = vld [vmem:[#allocation8 + $0xb50] sm:$0xff] }
 0x2b0   :  { %4394 = vmatpush1.bf16.msra.mxu1 %v5133_v35  ;;  %4231 = vmatprep.subr.bf16.mxu0 %v5140_v54  ;;  %v1061_v35 = vld [vmem:[#allocation8 + $0xb70] sm:$0xff]  ;;  %v1058_v54 = vld [vmem:[#allocation8 + $0xb58] sm:$0xff] }
 0x2b1   :  { %4395 = vmatprep.subr.bf16.mxu1 %v5142_v15  ;;  %v1062_v15 = vld [vmem:[#allocation8 + $0xb78] sm:$0xff]  ;;  %v5196_v56 = vcombine.high %v1057_v50, %v1061_v35  ;;  %v5195_v62 = vcombine.low %v1057_v50, %v1061_v35 }
 0x2b2   :  { %v5198_v58 = vcombine.high %v1058_v54, %v1062_v15  ;;  %v5197_v1 = vcombine.low %v1058_v54, %v1062_v15  ;;  %v1113_v15 = vld [vmem:[#allocation8 + $0xd10] sm:$0xff] }
 0x2b3   :  { %4232 = vmatpush1.bf16.msra.mxu0 %v5139_v53  ;;  %v1065_v53 = vld [vmem:[#allocation8 + $0xb90] sm:$0xff] }
 0x2b4   :  { %4396 = vmatpush1.bf16.msra.mxu1 %v5141_v59  ;;  %4233 = vmatprep.subr.bf16.mxu0 %v5148_v60  ;;  %v1069_v59 = vld [vmem:[#allocation8 + $0xbb0] sm:$0xff]  ;;  %v1066_v60 = vld [vmem:[#allocation8 + $0xb98] sm:$0xff] }
 0x2b5   :  { %4397 = vmatprep.subr.bf16.mxu1 %v5150_v61  ;;  %v1070_v61 = vld [vmem:[#allocation8 + $0xbb8] sm:$0xff]  ;;  %v5204_v57 = vcombine.high %v1065_v53, %v1069_v59  ;;  %v5203_v9 = vcombine.low %v1065_v53, %v1069_v59  ;;  %v5824_v59 = vld [vmem:[#allocation10] sm:$0xff] }
 0x2b6   :  { %v5206_v3 = vcombine.high %v1066_v60, %v1070_v61  ;;  %v5205_v10 = vcombine.low %v1066_v60, %v1070_v61  ;;  %v5826_v61 = vld [vmem:[#allocation8 + $0xd50] sm:$0xff] }
 0x2b7   :  { %4234 = vmatpush1.bf16.msra.mxu0 %v5147_v4  ;;  %v1073_v4 = vld [vmem:[#allocation8 + $0xbd0] sm:$0xff] }
 0x2b8   :  { %4398 = vmatpush1.bf16.msra.mxu1 %v5149_v5  ;;  %4235 = vmatprep.subr.bf16.mxu0 %v5156_v34  ;;  %v1077_v5 = vld [vmem:[#allocation8 + $0xbf0] sm:$0xff]  ;;  %v1074_v34 = vld [vmem:[#allocation8 + $0xbd8] sm:$0xff] }
 0x2b9   :  { %4399 = vmatprep.subr.bf16.mxu1 %v5158_v7  ;;  %v1078_v7 = vld [vmem:[#allocation8 + $0xbf8] sm:$0xff]  ;;  %v5212_v12 = vcombine.high %v1073_v4, %v1077_v5  ;;  %v5211_v22 = vcombine.low %v1073_v4, %v1077_v5  ;;  %v5836_v4 = vld [vmem:[#allocation8 + $0xdb0] sm:$0xff] }
 0x2ba   :  { %v5214_v18 = vcombine.high %v1074_v34, %v1078_v7  ;;  %v5213_v17 = vcombine.low %v1074_v34, %v1078_v7  ;;  %v1212_v7 = vrot.slane %v5824_v59, %v157_v14 }
 0x2bb   :  { %4236 = vmatpush1.bf16.msra.mxu0 %v5155_v33  ;;  %v1081_v33 = vld [vmem:[#allocation8 + $0xc10] sm:$0xff] }
 0x2bc   :  { %4400 = vmatpush1.bf16.msra.mxu1 %v5157_v40  ;;  %4237 = vmatprep.subr.bf16.mxu0 %v5164_v19  ;;  %v1085_v40 = vld [vmem:[#allocation8 + $0xc30] sm:$0xff]  ;;  %v1082_v19 = vld [vmem:[#allocation8 + $0xc18] sm:$0xff] }
 0x2bd   :  { %4401 = vmatprep.subr.bf16.mxu1 %v5166_v21  ;;  %v1086_v21 = vld [vmem:[#allocation8 + $0xc38] sm:$0xff]  ;;  %v5220_v23 = vcombine.high %v1081_v33, %v1085_v40 }
 0x2be   :  { %v5222_v24 = vcombine.high %v1082_v19, %v1086_v21  ;;  %v5221_v32 = vcombine.low %v1082_v19, %v1086_v21  ;;  %v1216_v19 = vrot.slane %v5824_v59, %v161_v16  ;;  %v5855_v21 = vld [vmem:[#allocation8 + $0xdf0] sm:$0xff] }
 0x2bf   :  { %4238 = vmatpush1.bf16.msra.mxu0 %v5163_v27  ;;  %v1089_v27 = vld [vmem:[#allocation8 + $0xc50] sm:$0xff] }
 0x2c0   :  { %4402 = vmatpush1.bf16.msra.mxu1 %v5165_v28  ;;  %4239 = vmatprep.subr.bf16.mxu0 %v5172_v29  ;;  %v1093_v28 = vld [vmem:[#allocation8 + $0xc70] sm:$0xff]  ;;  %v5219_v29 = vcombine.low %v1081_v33, %v1085_v40  ;;  %v1220_v40 = vrot.slane %v5824_v59, %v165_v30 }
 0x2c1   :  { %4403 = vmatprep.subr.bf16.mxu1 %v5174_v31  ;;  %v1090_v31 = vld [vmem:[#allocation8 + $0xc58] sm:$0xff]  ;;  %v5228_v36 = vcombine.high %v1089_v27, %v1093_v28  ;;  %v5227_v43 = vcombine.low %v1089_v27, %v1093_v28  ;;  %v5870_v27 = vld [vmem:[#allocation8 + $0xe10] sm:$0xff] }
 0x2c2   :  { %v5229_v44 = vcombine.low %v1090_v31, %v1094_v26  ;;  %v5872_v28 = vld [vmem:[#allocation8 + $0xe30] sm:$0xff] }
 0x2c3   :  { %4240 = vmatpush1.bf16.msra.mxu0 %v5171_v38  ;;  %v1101_v38 = vld [vmem:[#allocation8 + $0xcb0] sm:$0xff] }
 0x2c4   :  { %4404 = vmatpush1.bf16.msra.mxu1 %v5173_v6  ;;  %4241 = vmatprep.subr.bf16.mxu0 %v5180_v41  ;;  %v5230_v6 = vcombine.high %v1090_v31, %v1094_v26  ;;  %v1098_v41 = vld [vmem:[#allocation8 + $0xc98] sm:$0xff]  ;;  %v5236_v45 = vcombine.high %v1097_v37, %v1101_v38  ;;  %v5235_v50 = vcombine.low %v1097_v37, %v1101_v38  ;;  %v5886_v37 = vld [vmem:[#allocation8 + $0xe50] sm:$0xff] }
 0x2c5   :  { %4405 = vmatprep.subr.bf16.mxu1 %v5182_v0  ;;  %v1102_v0 = vld [vmem:[#allocation8 + $0xcb8] sm:$0xff]  ;;  %v5888_v38 = vld [vmem:[#allocation8 + $0xe70] sm:$0xff] }
 0x2c6   :  { %v5238_v46 = vcombine.high %v1098_v41, %v1102_v0 }
 0x2c7   :  { %4242 = vmatpush1.bf16.msra.mxu0 %v5179_v47  ;;  %v1105_v47 = vld [vmem:[#allocation8 + $0xcd0] sm:$0xff] }
 0x2c8   :  { %4406 = vmatpush1.bf16.msra.mxu1 %v5181_v48  ;;  %4243 = vmatprep.subr.bf16.mxu0 %v5188_v52  ;;  %v1109_v48 = vld [vmem:[#allocation8 + $0xcf0] sm:$0xff]  ;;  %v1106_v52 = vld [vmem:[#allocation8 + $0xcd8] sm:$0xff] }
 0x2c9   :  { %4407 = vmatprep.subr.bf16.mxu1 %v5190_v49  ;;  %v1110_v49 = vld [vmem:[#allocation8 + $0xcf8] sm:$0xff]  ;;  %v5244_v35 = vcombine.high %v1105_v47, %v1109_v48 }
 0x2ca   :  { %v5246_v54 = vcombine.high %v1106_v52, %v1110_v49 }
 0x2cb   :  { %4244 = vmatpush1.bf16.msra.mxu0 %v5187_v55  ;;  %v1117_v55 = vld [vmem:[#allocation8 + $0xd30] sm:$0xff] }
 0x2cc   :  { %4408 = vmatpush1.bf16.msra.mxu1 %v5189_v39  ;;  %4245 = vmatprep.subr.bf16.mxu0 %v5196_v56  ;;  %v1114_v39 = vld [vmem:[#allocation8 + $0xd18] sm:$0xff]  ;;  %v5252_v53 = vcombine.high %v1113_v15, %v1117_v55  ;;  %v5251_v5 = vcombine.low %v1113_v15, %v1117_v55  ;;  %v5291_v15 = vcombine.low %v5886_v37, %v5888_v38 }
 0x2cd   :  { %4409 = vmatprep.subr.bf16.mxu1 %v5198_v58  ;;  %v1118_v56 = vld [vmem:[#allocation8 + $0xd38] sm:$0xff]  ;;  %v5245_v58 = vcombine.low %v1106_v52, %v1110_v49  ;;  %v5906_v52 = vld [vmem:[#allocation8 + $0xe90] sm:$0xff]  ;;  %v5292_v55 = vcombine.high %v5886_v37, %v5888_v38 }
 0x2ce   :  { %v5254_v60 = vcombine.high %v1114_v39, %v1118_v56  ;;  %v5253_v34 = vcombine.low %v1114_v39, %v1118_v56  ;;  %v5908_v49 = vld [vmem:[#allocation8 + $0xeb0] sm:$0xff] }
 0x2cf   :  { %4246 = vmatpush1.bf16.msra.mxu0 %v5195_v62  ;;  %v5828_v62 = vld [vmem:[#allocation8 + $0xd70] sm:$0xff] }
 0x2d0   :  { %4410 = vmatpush1.bf16.msra.mxu1 %v5197_v1  ;;  %4247 = vmatprep.subr.bf16.mxu0 %v5204_v57  ;;  %v5830_v1 = vld [vmem:[#allocation8 + $0xd58] sm:$0xff]  ;;  %v5260_v14 = vcombine.high %v5826_v61, %v5828_v62  ;;  %v5259_v30 = vcombine.low %v5826_v61, %v5828_v62  ;;  %v1181_v37 = vld [vmem:[#allocation8 + $0xf30] sm:$0xff] }
 0x2d1   :  { %4411 = vmatprep.subr.bf16.mxu1 %v5206_v3  ;;  %v5832_v57 = vld [vmem:[#allocation8 + $0xd78] sm:$0xff]  ;;  %v5834_v3 = vld [vmem:[#allocation8 + $0xd90] sm:$0xff] }
 0x2d2   :  { %v5261_v16 = vcombine.low %v5830_v1, %v5832_v57  ;;  %v5267_v31 = vcombine.low %v5834_v3, %v5836_v4 }
 0x2d3   :  { %4248 = vmatpush1.bf16.msra.mxu0 %v5203_v9  ;;  %v5841_v9 = vld [vmem:[#allocation8 + $0xd98] sm:$0xff] }
 0x2d4   :  { %4412 = vmatpush1.bf16.msra.mxu1 %v5205_v10  ;;  %4249 = vmatprep.subr.bf16.mxu0 %v5212_v12  ;;  %v5843_v10 = vld [vmem:[#allocation8 + $0xdb8] sm:$0xff]  ;;  %v5845_v12 = vld [vmem:[#allocation8 + $0xdd0] sm:$0xff] }
 0x2d5   :  { %4413 = vmatprep.subr.bf16.mxu1 %v5214_v18  ;;  %v5614_v18 = vmov 1966171168   ;;  %v5269_v26 = vcombine.low %v5841_v9, %v5843_v10 }
 0x2d6   :  { %v4562_v33 = vunpack.c.l.s4 %v5614_v18 }
 0x2d7   :  { %4250 = vmatpush1.bf16.msra.mxu0 %v5211_v22  ;;  %v5857_v22 = vld [vmem:[#allocation8 + $0xdd8] sm:$0xff] }
 0x2d8   :  { %4414 = vmatpush1.bf16.msra.mxu1 %v5213_v17  ;;  %4260 = vmatprep.subr.bf16.mxu0 %v5220_v23  ;;  %v5859_v17 = vld [vmem:[#allocation8 + $0xdf8] sm:$0xff]  ;;  %v1224_v23 = vrot.slane %v5824_v59, %v169_v20  ;;  %v5268_v20 = vcombine.high %v5834_v3, %v5836_v4 }
 0x2d9   :  { %4424 = vmatprep.subr.bf16.mxu1 %v5222_v24  ;;  %v5262_v24 = vcombine.high %v5830_v1, %v5832_v57 }
 0x2da   :  { %4252 = vmatmul.mubr.bf16.vlgmr.msra.gmra.mrb[12].mxu0 %v5794_v63 }
 0x2db   :  { %4416 = vmatmul.mubr.bf16.vlgmr.msra.gmra.mrb[12].mxu1 %v5794_v63  ;;  %4261 = vmatpush1.bf16.msra.mxu0 %v5219_v29  ;;  %v5237_v63 = vcombine.low %v1098_v41, %v1102_v0  ;;  %v5874_v29 = vld [vmem:[#allocation8 + $0xe18] sm:$0xff]  ;;  %v5276_v41 = vcombine.high %v5845_v12, %v5855_v21  ;;  %v5277_v0 = vcombine.low %v5857_v22, %v5859_v17 }
 0x2dc   :  { %4292 = vmatprep.mubr.bf16.mxu0 %v5796_v8  ;;  %4425 = vmatpush1.bf16.msra.mxu1 %v5221_v32  ;;  %v5270_v32 = vcombine.high %v5841_v9, %v5843_v10 }
 0x2dd   :  { %4456 = vmatprep.mubr.bf16.mxu1 %v5796_v8  ;;  %4262 = vmatprep.subr.bf16.mxu0 %v5228_v36  ;;  %v5243_v8 = vcombine.low %v1105_v47, %v1109_v48  ;;  %v5884_v36 = vld [vmem:[#allocation8 + $0xe38] sm:$0xff]  ;;  %v5283_v47 = vcombine.low %v5870_v27, %v5872_v28  ;;  %v5284_v48 = vcombine.high %v5870_v27, %v5872_v28  ;;  %v1169_v27 = vld [vmem:[#allocation8 + $0xed0] sm:$0xff] }
 0x2de   :  { %4426 = vmatprep.subr.bf16.mxu1 %v5230_v6  ;;  %v5275_v6 = vcombine.low %v5845_v12, %v5855_v21  ;;  %v1162_v12 = vld [vmem:[#allocation8 + $0xe98] sm:$0xff]  ;;  %v1173_v28 = vld [vmem:[#allocation8 + $0xef0] sm:$0xff] }
 0x2df   :  { %4263 = vmatpush1.bf16.msra.mxu0 %v5227_v43  ;;  %v5896_v43 = vld [vmem:[#allocation8 + $0xe58] sm:$0xff] }
 0x2e0   :  { %4427 = vmatpush1.bf16.msra.mxu1 %v5229_v44  ;;  %4264 = vmatprep.subr.bf16.mxu0 %v5236_v45  ;;  %v5898_v44 = vld [vmem:[#allocation8 + $0xe78] sm:$0xff]  ;;  %v4563_v45 = vunpack.c.0.s8 %v4562_v33 }
 0x2e1   :  { %4428 = vmatprep.subr.bf16.mxu1 %v5238_v46  ;;  %v5278_v46 = vcombine.high %v5857_v22, %v5859_v17  ;;  %v1166_v21 = vld [vmem:[#allocation8 + $0xeb8] sm:$0xff] }
 0x2e3   :  { %4265 = vmatpush1.bf16.msra.mxu0 %v5235_v50 }
 0x2e4   :  { %4429 = vmatpush1.bf16.msra.mxu1 %v5237_v63  ;;  %4266 = vmatprep.subr.bf16.mxu0 %v5244_v35  ;;  %v5285_v35 = vcombine.low %v5874_v29, %v5884_v36 }
 0x2e5   :  { %4430 = vmatprep.subr.bf16.mxu1 %v5246_v54  ;;  %v5286_v54 = vcombine.high %v5874_v29, %v5884_v36  ;;  %v1170_v29 = vld [vmem:[#allocation8 + $0xed8] sm:$0xff] }
 0x2e6   :  { %v1174_v36 = vld [vmem:[#allocation8 + $0xef8] sm:$0xff] }
 0x2e7   :  { %4267 = vmatpush1.bf16.msra.mxu0 %v5243_v8 }
 0x2e8   :  { %4431 = vmatpush1.bf16.msra.mxu1 %v5245_v58  ;;  %4268 = vmatprep.subr.bf16.mxu0 %v5252_v53  ;;  %v5293_v53 = vcombine.low %v5896_v43, %v5898_v44 }
 0x2e9   :  { %4432 = vmatprep.subr.bf16.mxu1 %v5254_v60  ;;  %v5294_v60 = vcombine.high %v5896_v43, %v5898_v44  ;;  %v1182_v43 = vld [vmem:[#allocation8 + $0xf38] sm:$0xff]  ;;  %v5307_v44 = vcombine.low %v1169_v27, %v1173_v28 }
 0x2eb   :  { %4269 = vmatpush1.bf16.msra.mxu0 %v5251_v5  ;;  %v5300_v5 = vcombine.high %v5906_v52, %v5908_v49 }
 0x2ec   :  { %4433 = vmatpush1.bf16.msra.mxu1 %v5253_v34  ;;  %4270 = vmatprep.subr.bf16.mxu0 %v5260_v14  ;;  %v5925_v34 = vsub.s32 %v4563_v45, %v5728_v13 }
 0x2ed   :  { %v3966_v50 = vpop.f32.mrb[8].mxu0  ;;  %v4130_v63 = vpop.f32.mrb[8].mxu1  ;;  %4434 = vmatprep.subr.bf16.mxu1 %v5262_v24 }
 0x2ee   :  { %v5351_v39 = vadd.f32 %v3966_v50, %v1212_v7  ;;  %v5353_v56 = vadd.f32 %v4130_v63, %v1220_v40  ;;  %v3968_v8 = vpop.f32.mrb[9].mxu0  ;;  %v4132_v58 = vpop.f32.mrb[9].mxu1 }
 0x2ef   :  { %v5352_v61 = vadd.f32 %v3968_v8, %v1216_v19  ;;  %v5354_v62 = vadd.f32 %v4132_v58, %v1224_v23  ;;  %v3970_v1 = vpop.f32.mrb[10].mxu0  ;;  %v4134_v57 = vpop.f32.mrb[10].mxu1  ;;  %4271 = vmatpush1.bf16.msra.mxu0 %v5259_v30 }
 0x2f0   :  { %v4501_v7 = vrot.slane %v5351_v39, 4  ;;  %v4608_v18 = vmul.f32 %v5351_v39, %v5351_v39  ;;  %v4513_v33 = vrot.slane %v5353_v56, 4  ;;  %v4610_v40 = vmul.f32 %v5353_v56, %v5353_v56  ;;  %4435 = vmatpush1.bf16.msra.mxu1 %v5261_v16  ;;  %v3971_v14 = vpop.f32.mrb[11].mxu0  ;;  %v4135_v24 = vpop.f32.mrb[11].mxu1  ;;  %4272 = vmatprep.subr.bf16.mxu0 %v5268_v20 }
 0x2f1   :  { %v5347_v50 = vpack.c.bf16 %v5352_v61, %v5351_v39  ;;  %v4507_v19 = vrot.slane %v5352_v61, 4  ;;  %v4609_v23 = vmul.f32 %v5352_v61, %v5352_v61  ;;  %v5348_v63 = vpack.c.bf16 %v5354_v62, %v5353_v56  ;;  %4436 = vmatprep.subr.bf16.mxu1 %v5270_v32 }
 0x2f2   :  { %v4502_v30 = vadd.f32 %v5351_v39, %v4501_v7  ;;  %v4616_v8 = vrot.slane %v4608_v18, 4  ;;  %v4514_v58 = vadd.f32 %v5353_v56, %v4513_v33  ;;  %v4628_v1 = vrot.slane %v4610_v40, 4 }
 0x2f3   :  { %v4508_v57 = vadd.f32 %v5352_v61, %v4507_v19  ;;  %v4622_v45 = vrot.slane %v4609_v23, 4  ;;  %4497 = vst [vmem:[#allocation11] sm:$0xff] %v5347_v50  ;;  %v4519_v25 = vrot.slane %v5354_v62, 4  ;;  %v4611_v42 = vmul.f32 %v5354_v62, %v5354_v62  ;;  %4498 = vst [vmem:[#allocation11 + $0x8] sm:$0xff] %v5348_v63  ;;  %4273 = vmatpush1.bf16.msra.mxu0 %v5267_v31 }
 0x2f4   :  { %v4503_v16 = vrot.slane %v4502_v30, 2  ;;  %v4617_v20 = vadd.f32 %v4616_v8, %v4608_v18  ;;  %v4515_v14 = vrot.slane %v4514_v58, 2  ;;  %v4629_v24 = vadd.f32 %v4628_v1, %v4610_v40  ;;  %4437 = vmatpush1.bf16.msra.mxu1 %v5269_v26  ;;  %4274 = vmatprep.subr.bf16.mxu0 %v5276_v41 }
 0x2f5   :  { %v4509_v32 = vrot.slane %v4508_v57, 2  ;;  %v4623_v39 = vadd.f32 %v4622_v45, %v4609_v23  ;;  %v4520_v56 = vadd.f32 %v5354_v62, %v4519_v25  ;;  %v4634_v61 = vrot.slane %v4611_v42, 4  ;;  %4438 = vmatprep.subr.bf16.mxu1 %v5278_v46 }
 0x2f6   :  { %v4504_v7 = vadd.f32 %v4503_v16, %v4502_v30  ;;  %v4618_v33 = vrot.slane %v4617_v20, 2  ;;  %v4516_v50 = vadd.f32 %v4515_v14, %v4514_v58  ;;  %v4630_v19 = vrot.slane %v4629_v24, 2 }
 0x2f7   :  { %v4510_v3 = vadd.f32 %v4509_v32, %v4508_v57  ;;  %v4624_v4 = vrot.slane %v4623_v39, 2  ;;  %v4521_v31 = vrot.slane %v4520_v56, 2  ;;  %v4635_v18 = vadd.f32 %v4634_v61, %v4611_v42  ;;  %4275 = vmatpush1.bf16.msra.mxu0 %v5275_v6  ;;  %v1177_v32 = vld [vmem:[#allocation8 + $0xf10] sm:$0xff] }
 0x2f8   :  { %v4505_v9 = vrot.slane %v4504_v7, 1  ;;  %v4619_v10 = vadd.f32 %v4618_v33, %v4617_v20  ;;  %v4517_v26 = vrot.slane %v4516_v50, 1  ;;  %v4631_v41 = vadd.f32 %v4630_v19, %v4629_v24  ;;  %4439 = vmatpush1.bf16.msra.mxu1 %v5277_v0  ;;  %4276 = vmatprep.subr.bf16.mxu0 %v5284_v48  ;;  %v1189_v33 = vld [vmem:[#allocation8 + $0xf70] sm:$0xff]  ;;  %v1186_v19 = vld [vmem:[#allocation8 + $0xf58] sm:$0xff] }
 0x2f9   :  { %v4511_v25 = vrot.slane %v4510_v3, 1  ;;  %v4625_v46 = vadd.f32 %v4624_v4, %v4623_v39  ;;  %v4522_v62 = vadd.f32 %v4521_v31, %v4520_v56  ;;  %v4636_v42 = vrot.slane %v4635_v18, 2  ;;  %4440 = vmatprep.subr.bf16.mxu1 %v5286_v54  ;;  %v1178_v56 = vld [vmem:[#allocation8 + $0xf18] sm:$0xff] }
 0x2fa   :  { %v4506_v6 = vadd.f32 %v4505_v9, %v4504_v7  ;;  %v4620_v40 = vrot.slane %v4619_v10, 1  ;;  %v4518_v23 = vadd.f32 %v4517_v26, %v4516_v50  ;;  %v4632_v63 = vrot.slane %v4631_v41, 1  ;;  %v1185_v7 = vld [vmem:[#allocation8 + $0xf50] sm:$0xff] }
 0x2fb   :  { %v4512_v22 = vadd.f32 %v4511_v25, %v4510_v3  ;;  %v4626_v17 = vrot.slane %v4625_v46, 1  ;;  %v4523_v0 = vrot.slane %v4522_v62, 1  ;;  %v4637_v30 = vadd.f32 %v4636_v42, %v4635_v18  ;;  %4277 = vmatpush1.bf16.msra.mxu0 %v5283_v47  ;;  %v1190_v3 = vld [vmem:[#allocation8 + $0xf78] sm:$0xff]  ;;  %v1197_v26 = vld [vmem:[#allocation8 + $0xfb0] sm:$0xff] }
 0x2fc   :  { %v4621_v48 = vadd.f32 %v4620_v40, %v4619_v10  ;;  %v4633_v8 = vadd.f32 %v4632_v63, %v4631_v41  ;;  %4441 = vmatpush1.bf16.msra.mxu1 %v5285_v35  ;;  %4278 = vmatprep.subr.bf16.mxu0 %v5292_v55  ;;  %v5302_v54 = vcombine.high %v1162_v12, %v1166_v21  ;;  %v1193_v10 = vld [vmem:[#allocation8 + $0xf90] sm:$0xff]  ;;  %v1194_v41 = vld [vmem:[#allocation8 + $0xf98] sm:$0xff] }
 0x2fd   :  { %v4627_v58 = vadd.f32 %v4626_v17, %v4625_v46  ;;  %v4524_v1 = vadd.f32 %v4523_v0, %v4522_v62  ;;  %v4638_v57 = vrot.slane %v4637_v30, 1  ;;  %4442 = vmatprep.subr.bf16.mxu1 %v5294_v60  ;;  %v4557_v47 = vcombine.low %v4506_v6, %v4512_v22  ;;  %v1198_v25 = vld [vmem:[#allocation8 + $0xfb8] sm:$0xff]  ;;  %v1205_v6 = vld [vmem:[#allocation8 + $0xff0] sm:$0xff] }
 0x2fe   :  { %v5299_v45 = vcombine.low %v5906_v52, %v5908_v49  ;;  %v5301_v60 = vcombine.low %v1162_v12, %v1166_v21  ;;  %v5308_v14 = vcombine.high %v1169_v27, %v1173_v28  ;;  %v5310_v24 = vcombine.high %v1170_v29, %v1174_v36  ;;  %v1201_v21 = vld [vmem:[#allocation8 + $0xfd0] sm:$0xff]  ;;  %v1202_v40 = vld [vmem:[#allocation8 + $0xfd8] sm:$0xff] }
 0x2ff   :  { %v4639_v35 = vadd.f32 %v4638_v57, %v4637_v30  ;;  %4279 = vmatpush1.bf16.msra.mxu0 %v5291_v15  ;;  %v4558_v55 = vcombine.low %v4518_v23, %v4524_v1  ;;  %v5963_v16 = vrot.slane %v4557_v47, %v5925_v34  ;;  %v4672_v20 = vcombine.low %v4621_v48, %v4627_v58  ;;  %v1206_v23 = vld [vmem:[#allocation8 + $0xff8] sm:$0xff] }
 0x300   :  { %4443 = vmatpush1.bf16.msra.mxu1 %v5293_v53  ;;  %4280 = vmatprep.subr.bf16.mxu0 %v5300_v5  ;;  %v5309_v53 = vcombine.low %v1170_v29, %v1174_v36  ;;  %v5316_v5 = vcombine.high %v1177_v32, %v1181_v37  ;;  %v5318_v61 = vcombine.high %v1178_v56, %v1182_v43  ;;  %v6058_v58 = vsub.s32 5, %v5728_v13 }
 0x301   :  { %4444 = vmatprep.subr.bf16.mxu1 %v5302_v54  ;;  %v5972_v38 = vrot.slane %v4558_v55, %v5925_v34  ;;  %v4673_v15 = vcombine.low %v4633_v8, %v4639_v35  ;;  %v5975_v39 = vrot.slane %v4672_v20, %v5925_v34  ;;  %v5315_v4 = vcombine.low %v1177_v32, %v1181_v37 }
 0x302   :  { %v5317_v31 = vcombine.low %v1178_v56, %v1182_v43  ;;  %v5324_v18 = vcombine.high %v1185_v7, %v1189_v33  ;;  %v5326_v9 = vcombine.high %v1186_v19, %v1190_v3  ;;  %v5323_v46 = vcombine.low %v1185_v7, %v1189_v33 }
 0x303   :  { %4281 = vmatpush1.bf16.msra.mxu0 %v5299_v45  ;;  %v4589_v52 = vcombine.low %v5963_v16, %v5972_v38  ;;  %v5980_v49 = vrot.slane %v4673_v15, %v5925_v34  ;;  %v5325_v62 = vcombine.low %v1186_v19, %v1190_v3  ;;  %v5332_v42 = vcombine.high %v1193_v10, %v1197_v26 }
 0x304   :  { %4445 = vmatpush1.bf16.msra.mxu1 %v5301_v60  ;;  %4282 = vmatprep.subr.bf16.mxu0 %v5308_v14  ;;  %v5334_v12 = vcombine.high %v1194_v41, %v1198_v25  ;;  %v5331_v63 = vcombine.low %v1193_v10, %v1197_v26  ;;  %v5333_v22 = vcombine.low %v1194_v41, %v1198_v25  ;;  %v6059_v57 = vsub.s32 7, %v5728_v13 }
 0x305   :  { %4446 = vmatprep.subr.bf16.mxu1 %v5310_v24  ;;  %v4704_v50 = vcombine.low %v5975_v39, %v5980_v49  ;;  %v5340_v17 = vcombine.high %v1201_v21, %v1205_v6  ;;  %v5342_v0 = vcombine.high %v1202_v40, %v1206_v23  ;;  %v5339_v30 = vcombine.low %v1201_v21, %v1205_v6 }
 0x306   :  { %v5341_v48 = vcombine.low %v1202_v40, %v1206_v23  ;;  %v1228_v8 = vrot.slane %v5824_v59, %v173_v11  ;;  %v1236_v54 = vrot.slane %v5824_v59, %v181_v2  ;;  %v1232_v1 = vrot.slane %v5824_v59, %v6058_v58 }
 0x307   :  { %4283 = vmatpush1.bf16.msra.mxu0 %v5307_v44  ;;  %v1240_v27 = vrot.slane %v5824_v59, %v6059_v57 }
 0x308   :  { %4447 = vmatpush1.bf16.msra.mxu1 %v5309_v53  ;;  %4284 = vmatprep.subr.bf16.mxu0 %v5316_v5 }
 0x309   :  { %4448 = vmatprep.subr.bf16.mxu1 %v5318_v61 }
 0x30b   :  { %4285 = vmatpush1.bf16.msra.mxu0 %v5315_v4 }
 0x30c   :  { %4449 = vmatpush1.bf16.msra.mxu1 %v5317_v31  ;;  %4286 = vmatprep.subr.bf16.mxu0 %v5324_v18 }
 0x30d   :  { %4450 = vmatprep.subr.bf16.mxu1 %v5326_v9 }
 0x30f   :  { %4287 = vmatpush1.bf16.msra.mxu0 %v5323_v46 }
 0x310   :  { %4451 = vmatpush1.bf16.msra.mxu1 %v5325_v62  ;;  %4288 = vmatprep.subr.bf16.mxu0 %v5332_v42 }
 0x311   :  { %4452 = vmatprep.subr.bf16.mxu1 %v5334_v12 }
 0x313   :  { %4289 = vmatpush1.bf16.msra.mxu0 %v5331_v63 }
 0x314   :  { %4453 = vmatpush1.bf16.msra.mxu1 %v5333_v22  ;;  %4290 = vmatprep.subr.bf16.mxu0 %v5340_v17 }
 0x315   :  { %4454 = vmatprep.subr.bf16.mxu1 %v5342_v0 }
 0x317   :  { %4291 = vmatpush1.bf16.msra.mxu0 %v5339_v30 }
 0x318   :  { %4455 = vmatpush1.bf16.msra.mxu1 %v5341_v48 }
 0x31a   :  { %4293 = vmatmul.mubr.bf16.vlgmr.msra.gmra.mrb[12].mxu0 %v5806_v51 }
 0x31b   :  { %4457 = vmatmul.mubr.bf16.vlgmr.msra.gmra.mrb[12].mxu1 %v5806_v51 }
 0x3ed   :  { %v4294_v28 = vpop.f32.mrb[12].mxu0 }
 0x3ee   :  { %v5355_v47 = vadd.f32 %v4294_v28, %v1228_v8  ;;  %v4458_v45 = vpop.f32.mrb[12].mxu1  ;;  %v4296_v51 = vpop.f32.mrb[13].mxu0 }
 0x3ef   :  { %v5357_v29 = vadd.f32 %v4458_v45, %v1236_v54  ;;  %v5356_v36 = vadd.f32 %v4296_v51, %v1232_v1  ;;  %v4460_v35 = vpop.f32.mrb[13].mxu1  ;;  %v4298_v11 = vpop.f32.mrb[14].mxu0 }
 0x3f0   :  { %v4525_v55 = vrot.slane %v5355_v47, 4  ;;  %v4612_v2 = vmul.f32 %v5355_v47, %v5355_v47  ;;  %v5358_v20 = vadd.f32 %v4460_v35, %v1240_v27  ;;  %v4462_v60 = vpop.f32.mrb[14].mxu1  ;;  %v4299_v14 = vpop.f32.mrb[15].mxu0 }
 0x3f1   :  { %v4537_v24 = vrot.slane %v5357_v29, 4  ;;  %v4614_v32 = vmul.f32 %v5357_v29, %v5357_v29  ;;  %v5349_v13 = vpack.c.bf16 %v5356_v36, %v5355_v47  ;;  %v4531_v37 = vrot.slane %v5356_v36, 4  ;;  %v4463_v59 = vpop.f32.mrb[15].mxu1 }
 0x3f2   :  { %v4526_v15 = vadd.f32 %v5355_v47, %v4525_v55  ;;  %v4640_v56 = vrot.slane %v4612_v2, 4  ;;  %v4613_v43 = vmul.f32 %v5356_v36, %v5356_v36  ;;  %v5350_v44 = vpack.c.bf16 %v5358_v20, %v5357_v29 }
 0x3f3   :  { %v4538_v53 = vadd.f32 %v5357_v29, %v4537_v24  ;;  %v4652_v5 = vrot.slane %v4614_v32, 4  ;;  %v4532_v61 = vadd.f32 %v5356_v36, %v4531_v37  ;;  %4499 = vst [vmem:[#allocation11 + $0x10] sm:$0xff] %v5349_v13  ;;  %v4543_v7 = vrot.slane %v5358_v20, 4 }
 0x3f4   :  { %v4527_v33 = vrot.slane %v4526_v15, 2  ;;  %v4641_v19 = vadd.f32 %v4640_v56, %v4612_v2  ;;  %v4646_v3 = vrot.slane %v4613_v43, 4  ;;  %v4615_v4 = vmul.f32 %v5358_v20, %v5358_v20  ;;  %4500 = vst [vmem:[#allocation11 + $0x18] sm:$0xff] %v5350_v44 }
 0x3f5   :  { %v4539_v31 = vrot.slane %v4538_v53, 2  ;;  %v4653_v18 = vadd.f32 %v4652_v5, %v4614_v32  ;;  %v4533_v9 = vrot.slane %v4532_v61, 2  ;;  %v4544_v10 = vadd.f32 %v5358_v20, %v4543_v7 }
 0x3f6   :  { %5541 = shalt.err (!%p5538_p2)
}
 0x3f7   :  { %s5542_s15 = scalar_lea.hbm %s6053_s5, 512 }
 0x3f8   :  { %p5543_p3 = scmp.ne.s32.totalorder %s6053_s5, %s5542_s15  ;;  %p5546_p4 = scmp.lt.u32.totalorder %s5542_s15, %s6053_s5 }
 0x3fa   :  { %p5548_p5 = pnand %p5546_p4, %p5543_p3 }
 0x3fc   :  { %5551 = shalt.err (!%p5548_p5)
}
 0x3fd   :  { %4732 = dma.vmem_to_hbm [thread:$0]  %s4730_s14, 512, %s6053_s5, [#allocation4]   ;;  %v4528_v26 = vadd.f32 %v4527_v33, %v4526_v15  ;;  %v4642_v41 = vrot.slane %v4641_v19, 2  ;;  %v4647_v25 = vadd.f32 %v4646_v3, %v4613_v43  ;;  %v4658_v46 = vrot.slane %v4615_v4, 4 }
 0x3fe   :  { %v4540_v62 = vadd.f32 %v4539_v31, %v4538_v53  ;;  %v4654_v42 = vrot.slane %v4653_v18, 2  ;;  %v4534_v12 = vadd.f32 %v4533_v9, %v4532_v61  ;;  %v4545_v21 = vrot.slane %v4544_v10, 2  ;;  %s5616_s5 = smov [#allocation12]   ;;  %s5617_s24 = smov [#allocation14]  }
 0x3ff   :  { %v4529_v6 = vrot.slane %v4528_v26, 1  ;;  %v4643_v40 = vadd.f32 %v4642_v41, %v4641_v19  ;;  %v4648_v23 = vrot.slane %v4647_v25, 2  ;;  %v4659_v63 = vadd.f32 %v4658_v46, %v4615_v4  ;;  %s4739_s23 = sshll.u32 %s5616_s5, 4  ;;  %s4749_s26 = sshll.u32 %s5617_s24, 4  ;;  %s4740_s23 = int_to_ptr.vmem [resolvable:$true] %s4739_s23  ;;  %s4750_s26 = int_to_ptr.vmem [resolvable:$true] %s4749_s26 }
 0x400   :  { %v4541_v22 = vrot.slane %v4540_v62, 1  ;;  %v4655_v17 = vadd.f32 %v4654_v42, %v4653_v18  ;;  %v4535_v0 = vrot.slane %v4534_v12, 1  ;;  %v4546_v30 = vadd.f32 %v4545_v21, %v4544_v10  ;;  %s5552_s0 = scalar_lea.vmem %s4740_s23, 128  ;;  %p5557_p7 = scmp.lt.s32.totalorder %s4740_s23, %s4740_s23 }
 0x401   :  { %v4530_v48 = vadd.f32 %v4529_v6, %v4528_v26  ;;  %v4644_v8 = vrot.slane %v4643_v40, 1  ;;  %v4649_v54 = vadd.f32 %v4648_v23, %v4647_v25  ;;  %v4660_v58 = vrot.slane %v4659_v63, 2  ;;  %p5553_p6 = scmp.ne.s32.totalorder %s4740_s23, %s5552_s0  ;;  %p5558_p8 = scmp.lt.s32.totalorder %s5552_s0, %s5552_s0 }
 0x402   :  { %v4542_v1 = vadd.f32 %v4541_v22, %v4540_v62  ;;  %v4656_v57 = vrot.slane %v4655_v17, 1  ;;  %v4536_v27 = vadd.f32 %v4535_v0, %v4534_v12  ;;  %v4547_v28 = vrot.slane %v4546_v30, 1 }
 0x403   :  { %v4645_v47 = vadd.f32 %v4644_v8, %v4643_v40  ;;  %v4650_v45 = vrot.slane %v4649_v54, 1  ;;  %v4661_v51 = vadd.f32 %v4660_v58, %v4659_v63  ;;  %v4597_v15 = vrot.slane %v4589_v52, %v5925_v34  ;;  %p5559_p9 = por %p5558_p8, %p5557_p7 }
 0x404   :  { %v4548_v29 = vadd.f32 %v4547_v28, %v4546_v30  ;;  %v4559_v36 = vcombine.low %v4530_v48, %v4536_v27  ;;  %v4657_v35 = vadd.f32 %v4656_v57, %v4655_v17  ;;  %v4712_v53 = vrot.slane %v4704_v50, %v5925_v34 }
 0x405   :  { %v4651_v11 = vadd.f32 %v4650_v45, %v4649_v54  ;;  %v4662_v55 = vrot.slane %v4661_v51, 1  ;;  %p5560_p10 = pnand %p5559_p9, %p5553_p6 }
 0x406   :  { %v4560_v2 = vcombine.low %v4542_v1, %v4548_v29  ;;  %v4581_v20 = vrot.slane %v4559_v36, %v5925_v34 }
 0x407   :  { %v4663_v60 = vadd.f32 %v4662_v55, %v4661_v51  ;;  %v4674_v14 = vcombine.low %v4645_v47, %v4651_v11 }
 0x408   :  { %v4588_v24 = vrot.slane %v4560_v2, %v5925_v34 }
 0x409   :  { %v4675_v32 = vcombine.low %v4657_v35, %v4663_v60  ;;  %v4696_v13 = vrot.slane %v4674_v14, %v5925_v34 }
 0x40a   :  { %v4590_v37 = vcombine.low %v4581_v20, %v4588_v24 }
 0x40b   :  { %v4703_v59 = vrot.slane %v4675_v32, %v5925_v34 }
 0x40c   :  { %v4604_v56 = vrot.slane %v4590_v37, %v5925_v34 }
 0x40d   :  { %v4705_v43 = vcombine.low %v4696_v13, %v4703_v59 }
 0x40e   :  { %v4605_v44 = vcombine.low %v4597_v15, %v4604_v56 }
 0x40f   :  { %v4719_v5 = vrot.slane %v4705_v43, %v5925_v34 }
 0x410   :  { %4607 = vst [vmem:[#allocation12] sm:$0xff] %v4605_v44 }
 0x411   :  { %5563 = shalt.err (!%p5560_p10)
}
 0x412   :  { %s5564_s25 = scalar_lea.hbm %s6054_s6, 128 }
 0x413   :  { %p5565_p11 = scmp.ne.s32.totalorder %s6054_s6, %s5564_s25  ;;  %p5568_p12 = scmp.lt.u32.totalorder %s5564_s25, %s6054_s6 }
 0x415   :  { %p5570_p13 = pnand %p5568_p12, %p5565_p11 }
 0x417   :  { %5573 = shalt.err (!%p5570_p13)
}
 0x418   :  { %4742 = dma.vmem_to_hbm [thread:$0]  %s4740_s23, 128, %s6054_s6, [#allocation13]   ;;  %v4720_v34 = vcombine.low %v4712_v53, %v4719_v5 }
 0x419   :  { %s5574_s10 = scalar_lea.vmem %s4750_s26, 128  ;;  %p5579_p1 = scmp.lt.s32.totalorder %s4750_s26, %s4750_s26 }
 0x41a   :  { %4722 = vst [vmem:[#allocation14] sm:$0xff] %v4720_v34  ;;  %p5575_p0 = scmp.ne.s32.totalorder %s4750_s26, %s5574_s10  ;;  %p5580_p2 = scmp.lt.s32.totalorder %s5574_s10, %s5574_s10 }
 0x41c   :  { %p5581_p3 = por %p5580_p2, %p5579_p1 }
 0x41e   :  { %p5582_p4 = pnand %p5581_p3, %p5575_p0 }
 0x420   :  { %5585 = shalt.err (!%p5582_p4)
}
 0x421   :  { %s5586_s4 = scalar_lea.hbm %s6055_s7, 128 }
 0x422   :  { %p5587_p5 = scmp.ne.s32.totalorder %s6055_s7, %s5586_s4  ;;  %p5590_p6 = scmp.lt.u32.totalorder %s5586_s4, %s6055_s7 }
 0x424   :  { %p5592_p7 = pnand %p5590_p6, %p5587_p5 }
 0x426   :  { %5595 = shalt.err (!%p5592_p7)
}
 0x427   :  { %4752 = dma.vmem_to_hbm [thread:$0]  %s4750_s26, 128, %s6055_s7, [#allocation13]  }
 0x428   :  { %5602 = dma.done.wait [#allocation4], 512  }
 0x429   :  { %5603 = vsyncadd [#allocation4], 4294966784 }
 0x42a   :  { %5604 = dma.done.wait [#allocation13], 256  }
 0x42b   :  { %5605 = vsyncadd [#allocation13], 4294967040 }
 0x42c   :  { %4762 = vsyncpa [#allocation3], 1 }
 0x42d   :  { %4763 = vsyncpa [#allocation6], 1 }
 0x42e   :  { %4764 = vsyncpa [#allocation9], 1 }
 0x42f   :  { %4765 = vsyncpa [#allocation4], 1 }
 0x430   :  { %4766 = vsyncpa [#allocation13], 1 }

</bundles_post_ra>
